<compile_context>
chip_gen: v5e
topology: v5e:2x2
jax: 0.10.0
libtpu: 0.0.40
codegen_flags: <defaults>
</compile_context>

<pallas_src>
import functools

import jax
import jax.numpy as jnp
from jax.experimental import pallas as pl
from jax.experimental.pallas import tpu as pltpu


def _largest_divisor_at_most(n, cap):
    cap = max(1, min(n, cap))
    for d in range(cap, 0, -1):
        if n % d == 0:
            return d
    return 1


# ----------------------------------------------------------------------------
# Pallas kernel: fused im2col + 3x3 conv matmul + bias + ReLU (NHWC, bf16 MXU)
# ----------------------------------------------------------------------------
def _fused_conv3x3_relu_kernel(x_ref, w_ref, b_ref, o_ref, *, th, w_out, cin):
    # x_ref: (1, H+2, W+2, cin)  bf16 padded image of batch n (resident over h)
    # w_ref: (9, cin, cout_p)    bf16, one (cin, cout_p) slab per conv tap
    # b_ref: (1, cout_p)         f32 bias row (zero-padded)
    # o_ref: (th*w_out, cout_p)  f32 lane-dense output tile
    h = pl.program_id(1)
    row0 = h * th
    tile = th * w_out
    cout_p = o_ref.shape[-1]

    # Seed the accumulator with the broadcast bias (done once per tile; no
    # separate bias add in the epilogue and no re-broadcast inside the loop).
    acc = jnp.broadcast_to(b_ref[...], (tile, cout_p))

    # Fused im2col: 9 shifted (th, w_out, cin) views of the padded activation,
    # each contracted against its tap weight, accumulated in f32.
    for tap in range(9):
        dy, dx = tap // 3, tap % 3
        v = x_ref[0, pl.ds(row0 + dy, th), pl.ds(dx, w_out), :]      # (th, W, cin) bf16
        acc = acc + jnp.dot(v.reshape(tile, cin), w_ref[tap],
                            preferred_element_type=jnp.float32)

    o_ref[...] = jnp.maximum(acc, 0.0).astype(o_ref.dtype)


def fused_conv3x3_relu(x_pad, w_taps, bias_row, *, h_out, w_out, th):
    """x_pad: (N, H+2, W+2, cin) bf16; w_taps: (9, cin, cout_p) bf16;
    bias_row: (1, cout_p) f32.  Returns (N*H*W, cout_p) f32 (lane-dense)."""
    n, hp, wp, cin = x_pad.shape
    _, _, cout_p = w_taps.shape
    tile = th * w_out
    kernel = functools.partial(_fused_conv3x3_relu_kernel,
                               th=th, w_out=w_out, cin=cin)
    return pl.pallas_call(
        kernel,
        out_shape=jax.ShapeDtypeStruct((n * h_out * w_out, cout_p), jnp.float32),
        grid_spec=pltpu.PrefetchScalarGridSpec(
            num_scalar_prefetch=0,
            grid=(n, h_out // th),
            in_specs=[
                # Full padded image per batch; block index only depends on n,
                # so it is DMA'd once and stays resident across the h tiles.
                pl.BlockSpec((1, hp, wp, cin), lambda b, i: (b, 0, 0, 0)),
                pl.BlockSpec((9, cin, cout_p), lambda b, i: (0, 0, 0)),
                pl.BlockSpec((1, cout_p), lambda b, i: (0, 0)),
            ],
            out_specs=pl.BlockSpec((tile, cout_p),
                                   lambda b, i: (b * (h_out // th) + i, 0)),
        ),
        compiler_params=pltpu.CompilerParams(
            dimension_semantics=("parallel", "parallel")),
    )(x_pad, w_taps, bias_row)


# ----------------------------------------------------------------------------
# Wrapped "module": Conv2d(cin, cout, 3, padding=1) + ReLU, NCHW interface.
# ----------------------------------------------------------------------------
class ConvReluModule:
    def __init__(self, cin, cout, key):
        kw, kb = jax.random.split(key)
        fan_in = cin * 3 * 3
        # PyTorch conv weight layout (cout, cin, kh, kw).
        self.weight = (jax.random.normal(kw, (cout, cin, 3, 3), jnp.float32)
                       * (2.0 / fan_in) ** 0.5)
        self.bias = jax.random.normal(kb, (cout,), jnp.float32) * 0.01
        self.cin, self.cout = cin, cout
        self.cout_p = ((cout + 127) // 128) * 128   # lane-dense output width

    def __call__(self, x_nchw):
        N, C, H, W = x_nchw.shape
        assert C == self.cin
        # TODO(synk): accept/produce NHWC at the model boundary so these two
        # full-activation layout transposes can be dropped / fused away.
        x = jnp.transpose(x_nchw, (0, 2, 3, 1))                       # NCHW -> NHWC
        xp = jnp.pad(x, ((0, 0), (1, 1), (1, 1), (0, 0)))             # conv pad=1
        xp = xp.astype(jnp.bfloat16)                                  # bf16 MXU operands

        # (cout,cin,3,3) -> (3,3,cin,cout) -> (9,cin,cout), zero-pad cout -> cout_p.
        w = jnp.transpose(self.weight, (2, 3, 1, 0)).reshape(9, self.cin, self.cout)
        w = jnp.pad(w, ((0, 0), (0, 0), (0, self.cout_p - self.cout)))
        w = w.astype(jnp.bfloat16)
        b = jnp.pad(self.bias, (0, self.cout_p - self.cout))
        b = b.reshape(1, self.cout_p).astype(jnp.float32)

        # Row tile: whole image rows, targeting ~2048 output pixels per grid
        # step to amortize the ~0.35us/step overhead, with H % th == 0 by
        # construction (no failing divisibility asserts for odd H like 300).
        th = _largest_divisor_at_most(H, max(1, 2048 // W))
        assert (th * W) % 8 == 0, "output tile rows must be sublane aligned"
        # TODO(synk): ragged W (not a multiple of 8) would need a padded/masked tail.

        out2d = fused_conv3x3_relu(xp, w, b, h_out=H, w_out=W, th=th)  # (N*H*W, cout_p)
        out = out2d[:, :self.cout].reshape(N, H, W, self.cout)
        return jnp.transpose(out, (0, 3, 1, 2))                        # NHWC -> NCHW


# ----------------------------------------------------------------------------
# DistributedDataParallel wrapper (forward-pass semantics only).
# ----------------------------------------------------------------------------
class DistributedDataParallel:
    def __init__(self, module):
        self.module = module
        self.needs_reduction = False
        # TODO(synk): dist.broadcast(param, 0) at init and the backward-hook
        # gradient all_reduce (/world_size) are multi-device collectives outside
        # the forward pass; on a single device they are identity ops, omitted.

    def forward(self, *inputs, **kwargs):
        self.needs_reduction = True
        return self.module(*inputs, **kwargs)

    __call__ = forward


# ----------------------------------------------------------------------------
if __name__ == "__main__":
    key = jax.random.PRNGKey(0)
    k_mod, k_x = jax.random.split(key)

    cin, cout = 4, 32
    ddp = DistributedDataParallel(ConvReluModule(cin, cout, k_mod))

    # layout: module interface is NCHW, matching the PyTorch convention.
    x = jax.random.normal(k_x, (2, cin, 16, 16), jnp.float32)

    out = ddp(x)
    out = jax.block_until_ready(out)
    assert out.shape == (2, cout, 16, 16)
    assert bool(ddp.needs_reduction)

    # Reference: same bf16 quantization of the conv operands, f32 accumulation.
    xq = x.astype(jnp.bfloat16).astype(jnp.float32)
    wq = ddp.module.weight.astype(jnp.bfloat16).astype(jnp.float32)
    ref = jax.lax.conv_general_dilated(
        xq, wq, window_strides=(1, 1), padding="SAME",
        dimension_numbers=("NCHW", "OIHW", "NCHW"),
        precision=jax.lax.Precision.HIGHEST,
    ) + ddp.module.bias.reshape(1, cout, 1, 1)
    ref = jnp.maximum(ref, 0.0)
    assert jnp.allclose(out, ref, atol=1e-3, rtol=1e-3), \
        float(jnp.max(jnp.abs(out - ref)))

    print("KERNEL_OK")
</pallas_src>

<mosaic_0001>
module attributes {stable_mosaic.version = 11 : i64} {
  func.func @_fused_conv3x3_relu_kernel(%arg0: i32, %arg1: i32, %arg2: memref<1x18x18x4xbf16, #tpu.memory_space<vmem>>, %arg3: memref<9x4x128xbf16, #tpu.memory_space<vmem>>, %arg4: memref<1x128xf32, #tpu.memory_space<vmem>>, %arg5: memref<256x128xf32, #tpu.memory_space<vmem>>) attributes {dimension_semantics = [#tpu.dimension_semantics<parallel>, #tpu.dimension_semantics<parallel>], iteration_bounds = array<i64: 2, 1>, scalar_prefetch = 0 : i64, scratch_operands = 0 : i64, tpu.core_type = #tpu.core_type<tc>, window_params = [{transform_indices = @transform_0, window_bounds = array<i64: 1, 18, 18, 4>}, {pipeline_mode = #tpu.pipeline_mode<synchronous>, transform_indices = @transform_1, window_bounds = array<i64: 9, 4, 128>}, {pipeline_mode = #tpu.pipeline_mode<synchronous>, transform_indices = @transform_2, window_bounds = array<i64: 1, 128>}, {transform_indices = @transform_3, window_bounds = array<i64: 256, 128>}]} {
    %c16_i32 = arith.constant 16 : i32
    %0 = arith.muli %arg1, %c16_i32 : i32
    %c0 = arith.constant 0 : index
    %c0_0 = arith.constant 0 : index
    %1 = vector.load %arg4[%c0, %c0_0] : memref<1x128xf32, #tpu.memory_space<vmem>>, vector<1x128xf32>
    %2 = vector.shape_cast %1 : vector<1x128xf32> to vector<1x128xf32>
    %3 = vector.broadcast %2 : vector<1x128xf32> to vector<256x128xf32>
    %c0_i32 = arith.constant 0 : i32
    %4 = arith.addi %0, %c0_i32 : i32
    %c0_1 = arith.constant 0 : index
    %5 = arith.index_cast %4 : i32 to index
    %c0_2 = arith.constant 0 : index
    %c0_3 = arith.constant 0 : index
    %6 = vector.load %arg2[%c0_1, %5, %c0_2, %c0_3] : memref<1x18x18x4xbf16, #tpu.memory_space<vmem>>, vector<1x16x16x4xbf16>
    %7 = vector.shape_cast %6 : vector<1x16x16x4xbf16> to vector<16x16x4xbf16>
    %8 = vector.shape_cast %7 : vector<16x16x4xbf16> to vector<256x4xbf16>
    %c0_4 = arith.constant 0 : index
    %c0_5 = arith.constant 0 : index
    %c0_6 = arith.constant 0 : index
    %9 = vector.load %arg3[%c0_4, %c0_5, %c0_6] : memref<9x4x128xbf16, #tpu.memory_space<vmem>>, vector<1x4x128xbf16>
    %10 = vector.shape_cast %9 : vector<1x4x128xbf16> to vector<4x128xbf16>
    %cst = arith.constant dense<0.000000e+00> : vector<256x128xf32>
    %11 = tpu.matmul %8, %10, %cst {dimension_numbers = #tpu.dot_dimension_numbers<[1], [0], [0], [1], [0, 0, 1, 1], [], []>} : vector<256x4xbf16>, vector<4x128xbf16>, vector<256x128xf32> -> vector<256x128xf32>
    %12 = arith.addf %3, %11 : vector<256x128xf32>
    %c0_i32_7 = arith.constant 0 : i32
    %13 = arith.addi %0, %c0_i32_7 : i32
    %c0_8 = arith.constant 0 : index
    %14 = arith.index_cast %13 : i32 to index
    %c1 = arith.constant 1 : index
    %c0_9 = arith.constant 0 : index
    %15 = vector.load %arg2[%c0_8, %14, %c1, %c0_9] : memref<1x18x18x4xbf16, #tpu.memory_space<vmem>>, vector<1x16x16x4xbf16>
    %16 = vector.shape_cast %15 : vector<1x16x16x4xbf16> to vector<16x16x4xbf16>
    %17 = vector.shape_cast %16 : vector<16x16x4xbf16> to vector<256x4xbf16>
    %c1_10 = arith.constant 1 : index
    %c0_11 = arith.constant 0 : index
    %c0_12 = arith.constant 0 : index
    %18 = vector.load %arg3[%c1_10, %c0_11, %c0_12] : memref<9x4x128xbf16, #tpu.memory_space<vmem>>, vector<1x4x128xbf16>
    %19 = vector.shape_cast %18 : vector<1x4x128xbf16> to vector<4x128xbf16>
    %cst_13 = arith.constant dense<0.000000e+00> : vector<256x128xf32>
    %20 = tpu.matmul %17, %19, %cst_13 {dimension_numbers = #tpu.dot_dimension_numbers<[1], [0], [0], [1], [0, 0, 1, 1], [], []>} : vector<256x4xbf16>, vector<4x128xbf16>, vector<256x128xf32> -> vector<256x128xf32>
    %21 = arith.addf %12, %20 : vector<256x128xf32>
    %c0_i32_14 = arith.constant 0 : i32
    %22 = arith.addi %0, %c0_i32_14 : i32
    %c0_15 = arith.constant 0 : index
    %23 = arith.index_cast %22 : i32 to index
    %c2 = arith.constant 2 : index
    %c0_16 = arith.constant 0 : index
    %24 = vector.load %arg2[%c0_15, %23, %c2, %c0_16] : memref<1x18x18x4xbf16, #tpu.memory_space<vmem>>, vector<1x16x16x4xbf16>
    %25 = vector.shape_cast %24 : vector<1x16x16x4xbf16> to vector<16x16x4xbf16>
    %26 = vector.shape_cast %25 : vector<16x16x4xbf16> to vector<256x4xbf16>
    %c2_17 = arith.constant 2 : index
    %c0_18 = arith.constant 0 : index
    %c0_19 = arith.constant 0 : index
    %27 = vector.load %arg3[%c2_17, %c0_18, %c0_19] : memref<9x4x128xbf16, #tpu.memory_space<vmem>>, vector<1x4x128xbf16>
    %28 = vector.shape_cast %27 : vector<1x4x128xbf16> to vector<4x128xbf16>
    %cst_20 = arith.constant dense<0.000000e+00> : vector<256x128xf32>
    %29 = tpu.matmul %26, %28, %cst_20 {dimension_numbers = #tpu.dot_dimension_numbers<[1], [0], [0], [1], [0, 0, 1, 1], [], []>} : vector<256x4xbf16>, vector<4x128xbf16>, vector<256x128xf32> -> vector<256x128xf32>
    %30 = arith.addf %21, %29 : vector<256x128xf32>
    %c1_i32 = arith.constant 1 : i32
    %31 = arith.addi %0, %c1_i32 : i32
    %c0_21 = arith.constant 0 : index
    %32 = arith.index_cast %31 : i32 to index
    %c0_22 = arith.constant 0 : index
    %c0_23 = arith.constant 0 : index
    %33 = vector.load %arg2[%c0_21, %32, %c0_22, %c0_23] : memref<1x18x18x4xbf16, #tpu.memory_space<vmem>>, vector<1x16x16x4xbf16>
    %34 = vector.shape_cast %33 : vector<1x16x16x4xbf16> to vector<16x16x4xbf16>
    %35 = vector.shape_cast %34 : vector<16x16x4xbf16> to vector<256x4xbf16>
    %c3 = arith.constant 3 : index
    %c0_24 = arith.constant 0 : index
    %c0_25 = arith.constant 0 : index
    %36 = vector.load %arg3[%c3, %c0_24, %c0_25] : memref<9x4x128xbf16, #tpu.memory_space<vmem>>, vector<1x4x128xbf16>
    %37 = vector.shape_cast %36 : vector<1x4x128xbf16> to vector<4x128xbf16>
    %cst_26 = arith.constant dense<0.000000e+00> : vector<256x128xf32>
    %38 = tpu.matmul %35, %37, %cst_26 {dimension_numbers = #tpu.dot_dimension_numbers<[1], [0], [0], [1], [0, 0, 1, 1], [], []>} : vector<256x4xbf16>, vector<4x128xbf16>, vector<256x128xf32> -> vector<256x128xf32>
    %39 = arith.addf %30, %38 : vector<256x128xf32>
    %c1_i32_27 = arith.constant 1 : i32
    %40 = arith.addi %0, %c1_i32_27 : i32
    %c0_28 = arith.constant 0 : index
    %41 = arith.index_cast %40 : i32 to index
    %c1_29 = arith.constant 1 : index
    %c0_30 = arith.constant 0 : index
    %42 = vector.load %arg2[%c0_28, %41, %c1_29, %c0_30] : memref<1x18x18x4xbf16, #tpu.memory_space<vmem>>, vector<1x16x16x4xbf16>
    %43 = vector.shape_cast %42 : vector<1x16x16x4xbf16> to vector<16x16x4xbf16>
    %44 = vector.shape_cast %43 : vector<16x16x4xbf16> to vector<256x4xbf16>
    %c4 = arith.constant 4 : index
    %c0_31 = arith.constant 0 : index
    %c0_32 = arith.constant 0 : index
    %45 = vector.load %arg3[%c4, %c0_31, %c0_32] : memref<9x4x128xbf16, #tpu.memory_space<vmem>>, vector<1x4x128xbf16>
    %46 = vector.shape_cast %45 : vector<1x4x128xbf16> to vector<4x128xbf16>
    %cst_33 = arith.constant dense<0.000000e+00> : vector<256x128xf32>
    %47 = tpu.matmul %44, %46, %cst_33 {dimension_numbers = #tpu.dot_dimension_numbers<[1], [0], [0], [1], [0, 0, 1, 1], [], []>} : vector<256x4xbf16>, vector<4x128xbf16>, vector<256x128xf32> -> vector<256x128xf32>
    %48 = arith.addf %39, %47 : vector<256x128xf32>
    %c1_i32_34 = arith.constant 1 : i32
    %49 = arith.addi %0, %c1_i32_34 : i32
    %c0_35 = arith.constant 0 : index
    %50 = arith.index_cast %49 : i32 to index
    %c2_36 = arith.constant 2 : index
    %c0_37 = arith.constant 0 : index
    %51 = vector.load %arg2[%c0_35, %50, %c2_36, %c0_37] : memref<1x18x18x4xbf16, #tpu.memory_space<vmem>>, vector<1x16x16x4xbf16>
    %52 = vector.shape_cast %51 : vector<1x16x16x4xbf16> to vector<16x16x4xbf16>
    %53 = vector.shape_cast %52 : vector<16x16x4xbf16> to vector<256x4xbf16>
    %c5 = arith.constant 5 : index
    %c0_38 = arith.constant 0 : index
    %c0_39 = arith.constant 0 : index
    %54 = vector.load %arg3[%c5, %c0_38, %c0_39] : memref<9x4x128xbf16, #tpu.memory_space<vmem>>, vector<1x4x128xbf16>
    %55 = vector.shape_cast %54 : vector<1x4x128xbf16> to vector<4x128xbf16>
    %cst_40 = arith.constant dense<0.000000e+00> : vector<256x128xf32>
    %56 = tpu.matmul %53, %55, %cst_40 {dimension_numbers = #tpu.dot_dimension_numbers<[1], [0], [0], [1], [0, 0, 1, 1], [], []>} : vector<256x4xbf16>, vector<4x128xbf16>, vector<256x128xf32> -> vector<256x128xf32>
    %57 = arith.addf %48, %56 : vector<256x128xf32>
    %c2_i32 = arith.constant 2 : i32
    %58 = arith.addi %0, %c2_i32 : i32
    %c0_41 = arith.constant 0 : index
    %59 = arith.index_cast %58 : i32 to index
    %c0_42 = arith.constant 0 : index
    %c0_43 = arith.constant 0 : index
    %60 = vector.load %arg2[%c0_41, %59, %c0_42, %c0_43] : memref<1x18x18x4xbf16, #tpu.memory_space<vmem>>, vector<1x16x16x4xbf16>
    %61 = vector.shape_cast %60 : vector<1x16x16x4xbf16> to vector<16x16x4xbf16>
    %62 = vector.shape_cast %61 : vector<16x16x4xbf16> to vector<256x4xbf16>
    %c6 = arith.constant 6 : index
    %c0_44 = arith.constant 0 : index
    %c0_45 = arith.constant 0 : index
    %63 = vector.load %arg3[%c6, %c0_44, %c0_45] : memref<9x4x128xbf16, #tpu.memory_space<vmem>>, vector<1x4x128xbf16>
    %64 = vector.shape_cast %63 : vector<1x4x128xbf16> to vector<4x128xbf16>
    %cst_46 = arith.constant dense<0.000000e+00> : vector<256x128xf32>
    %65 = tpu.matmul %62, %64, %cst_46 {dimension_numbers = #tpu.dot_dimension_numbers<[1], [0], [0], [1], [0, 0, 1, 1], [], []>} : vector<256x4xbf16>, vector<4x128xbf16>, vector<256x128xf32> -> vector<256x128xf32>
    %66 = arith.addf %57, %65 : vector<256x128xf32>
    %c2_i32_47 = arith.constant 2 : i32
    %67 = arith.addi %0, %c2_i32_47 : i32
    %c0_48 = arith.constant 0 : index
    %68 = arith.index_cast %67 : i32 to index
    %c1_49 = arith.constant 1 : index
    %c0_50 = arith.constant 0 : index
    %69 = vector.load %arg2[%c0_48, %68, %c1_49, %c0_50] : memref<1x18x18x4xbf16, #tpu.memory_space<vmem>>, vector<1x16x16x4xbf16>
    %70 = vector.shape_cast %69 : vector<1x16x16x4xbf16> to vector<16x16x4xbf16>
    %71 = vector.shape_cast %70 : vector<16x16x4xbf16> to vector<256x4xbf16>
    %c7 = arith.constant 7 : index
    %c0_51 = arith.constant 0 : index
    %c0_52 = arith.constant 0 : index
    %72 = vector.load %arg3[%c7, %c0_51, %c0_52] : memref<9x4x128xbf16, #tpu.memory_space<vmem>>, vector<1x4x128xbf16>
    %73 = vector.shape_cast %72 : vector<1x4x128xbf16> to vector<4x128xbf16>
    %cst_53 = arith.constant dense<0.000000e+00> : vector<256x128xf32>
    %74 = tpu.matmul %71, %73, %cst_53 {dimension_numbers = #tpu.dot_dimension_numbers<[1], [0], [0], [1], [0, 0, 1, 1], [], []>} : vector<256x4xbf16>, vector<4x128xbf16>, vector<256x128xf32> -> vector<256x128xf32>
    %75 = arith.addf %66, %74 : vector<256x128xf32>
    %c2_i32_54 = arith.constant 2 : i32
    %76 = arith.addi %0, %c2_i32_54 : i32
    %c0_55 = arith.constant 0 : index
    %77 = arith.index_cast %76 : i32 to index
    %c2_56 = arith.constant 2 : index
    %c0_57 = arith.constant 0 : index
    %78 = vector.load %arg2[%c0_55, %77, %c2_56, %c0_57] : memref<1x18x18x4xbf16, #tpu.memory_space<vmem>>, vector<1x16x16x4xbf16>
    %79 = vector.shape_cast %78 : vector<1x16x16x4xbf16> to vector<16x16x4xbf16>
    %80 = vector.shape_cast %79 : vector<16x16x4xbf16> to vector<256x4xbf16>
    %c8 = arith.constant 8 : index
    %c0_58 = arith.constant 0 : index
    %c0_59 = arith.constant 0 : index
    %81 = vector.load %arg3[%c8, %c0_58, %c0_59] : memref<9x4x128xbf16, #tpu.memory_space<vmem>>, vector<1x4x128xbf16>
    %82 = vector.shape_cast %81 : vector<1x4x128xbf16> to vector<4x128xbf16>
    %cst_60 = arith.constant dense<0.000000e+00> : vector<256x128xf32>
    %83 = tpu.matmul %80, %82, %cst_60 {dimension_numbers = #tpu.dot_dimension_numbers<[1], [0], [0], [1], [0, 0, 1, 1], [], []>} : vector<256x4xbf16>, vector<4x128xbf16>, vector<256x128xf32> -> vector<256x128xf32>
    %84 = arith.addf %75, %83 : vector<256x128xf32>
    %cst_61 = arith.constant 0.000000e+00 : f32
    %85 = vector.broadcast %cst_61 : f32 to vector<256x128xf32>
    %86 = arith.maximumf %84, %85 : vector<256x128xf32>
    %c0_62 = arith.constant 0 : index
    %c0_63 = arith.constant 0 : index
    %87 = vector.load %arg5[%c0_62, %c0_63] : memref<256x128xf32, #tpu.memory_space<vmem>>, vector<256x128xf32>
    tpu.vector_store %arg5[%c0_62, %c0_63], %86 {strides = array<i32>} : memref<256x128xf32, #tpu.memory_space<vmem>>, vector<256x128xf32>,
    return
  }
  func.func @transform_0(%arg0: i32, %arg1: i32) -> (i32, i32, i32, i32) {
    %c0_i32 = arith.constant 0 : i32
    %c0_i32_0 = arith.constant 0 : i32
    %c0_i32_1 = arith.constant 0 : i32
    %c0_i32_2 = arith.constant 0 : i32
    return %arg0, %c0_i32, %c0_i32_0, %c0_i32_1 : i32, i32, i32, i32
  }
  func.func @transform_1(%arg0: i32, %arg1: i32) -> (i32, i32, i32) {
    %c0_i32 = arith.constant 0 : i32
    %c0_i32_0 = arith.constant 0 : i32
    %c0_i32_1 = arith.constant 0 : i32
    %c0_i32_2 = arith.constant 0 : i32
    return %c0_i32, %c0_i32_0, %c0_i32_1 : i32, i32, i32
  }
  func.func @transform_2(%arg0: i32, %arg1: i32) -> (i32, i32) {
    %c0_i32 = arith.constant 0 : i32
    %c0_i32_0 = arith.constant 0 : i32
    %c0_i32_1 = arith.constant 0 : i32
    return %c0_i32, %c0_i32_0 : i32, i32
  }
  func.func @transform_3(%arg0: i32, %arg1: i32) -> (i32, i32) {
    %c1_i32 = arith.constant 1 : i32
    %0 = arith.muli %arg0, %c1_i32 : i32
    %1 = arith.addi %0, %arg1 : i32
    %c0_i32 = arith.constant 0 : i32
    %c0_i32_0 = arith.constant 0 : i32
    return %1, %c0_i32 : i32, i32
  }
}

</mosaic_0001>

<bundles_post_ra>
// kernel: tpu_custom_call.1
= control target key start
LH: loop header
LB: loop body
LE: loop exit
PB: predicated region body
PF: predicated region fallthrough
CT: control target
= control target key end

     0   :  { %8 = vsyncpa [#allocation3], 0  ;;  %s6773_s0 = inlined_call_operand.vmem [shape: bf16[2,18,18,4], index: 0, kind: input, shape index: {}]   ;;  %s6774_s1 = inlined_call_operand.vmem [shape: bf16[9,4,128], index: 1, kind: input, shape index: {}]   ;;  %s6775_s2 = inlined_call_operand.vmem [shape: f32[1,128], index: 2, kind: input, shape index: {}]   ;;  %s6776_s3 = inlined_call_operand.hbm [shape: f32[512,128], index: 3, kind: output, shape index: {}]  }
   0x1   :  { %10 = vsyncpa [#allocation3 + $0x1], 0  ;;  %s5227_s12 = smov 0   ;;  %s5229_s13 = smov 0  }
   0x2   :  { %s5231_s14 = smov 0   ;;  %s5233_s15 = smov 0  }
   0x3   :  { %s5235_s16 = smov 0   ;;  %s5237_s17 = smov 0  }
   0x4 LB: > { %s4385_s18 = sadd.s32 4294967295, %s5203_s17   ;;  %s4386_s19 = sadd.s32 4294967294, %s5203_s17   ;;  %s5203_s17 = sphi %s5237_s17, %s16_s17   ;;  %s5199_s16 = sphi %s5235_s16, %s6805_s16   ;;  %s5195_s15 = sphi %s5233_s15, %s6804_s15   ;;  %s5191_s14 = sphi %s5231_s14, %s6803_s14   ;;  %s5187_s13 = sphi %s5229_s13, %s6802_s13   ;;  %s5183_s12 = sphi %s5227_s12, %s6801_s12  }
   0x5   : > { %s28_s20 = sadd.s32 1, %s5199_s16  ;;  %s105_s21 = sadd.s32 1, %s5191_s14 }
   0x6   : > { %p30_p0 = scmp.ge.s32.totalorder %s28_s20, 2  ;;  %p115_p1 = scmp.ne.s32.totalorder %s5191_s14, %s5187_s13 }
   0x7   : > { %p116_p2 = scmp.eq.s32.totalorder %s4385_s18, 1  ;;  %p121_p3 = scmp.ne.s32.totalorder %s5187_s13, %s5183_s12 }
   0x8   : > { %s6807_s20 = smov (%p30_p0, %s28_s20), 0  ;;  %p122_p5 = scmp.eq.s32.totalorder %s4386_s19, 1 }
   0x9   : > { %p5267_p4 = por %p116_p2, %p115_p1  ;;  %s102_s23 = ssub.s32 %s5199_s16, %s6807_s20 }
   0xa   : > { %p4389_p6 = scmp.ge.s32.totalorder %s5203_s17, 1  ;;  %p103_p7 = scmp.eq.s32.totalorder %s102_s23, 0 }
   0xb   : > { %p5274_p8 = por %p122_p5, %p121_p3  ;;  %p154_p9 = scmp.lt.s32.totalorder %s5203_s17, 3 }
   0xc   : > { %s5280_s25 = scalar_select %p103_p7, %s5191_s14, %s105_s21  }
   0xd   : > { %p155_p10 = pnand %p4389_p6, %p154_p9 }
   0xf   : > { %158 = sbr.rel (%p155_p10) target bundleno = 740 (0x2e4), region = 32 }
  0x14   : > { %v226_v0 = vld [vmem:[%s6774_s1] sm:$0x3]  ;;  %vm356_vm0 = vcmask 1041408   ;;  %p178_p11 = scmp.lt.s32.totalorder %s5195_s15, 1  ;;  %v4505_v2 = vld [vmem:[%s6774_s1 + $0x4] sm:$0x3] }
  0x15   : > { %v358_v1 = vsel %vm356_vm0, %v226_v0, 0  ;;  %v4554_v3 = vld [vmem:[%s6774_s1 + $0x6] sm:$0x3]  ;;  %v1416_v4 = vsel %vm356_vm0, %v4505_v2, 0  ;;  %v4472_v6 = vld [vmem:[%s6774_s1 + $0x2] sm:$0x3] }
  0x16   : > { %5030 = vmatpush.bf16.msra.mxu1 %v358_v1  ;;  %5031 = vmatpush.bf16.msra.mxu2 %v358_v1  ;;  %s179_s5 = scalar_select %p178_p11, %s5195_s15, 1  ;;  %v1706_v5 = vsel %vm356_vm0, %v4554_v3, 0  ;;  %v1015_v7 = vsel %vm356_vm0, %v4472_v6, 0  ;;  %v4683_v8 = vld [vmem:[%s6774_s1 + $0x8] sm:$0x3]  ;;  %vm307_vm1 = vcmask 31744  }
  0x17   : > { %5032 = vmatpush.bf16.msra.mxu3 %v358_v1  ;;  %367 = vmatpush.bf16.msra.mxu0 %v358_v1  ;;  %v2360_v9 = vsel %vm356_vm0, %v4683_v8, 0  ;;  %v4781_v30 = vld [vmem:[%s6774_s1 + $0xc] sm:$0x3]  ;;  %v4910_v34 = vld [vmem:[%s6774_s1 + $0xe] sm:$0x3]  ;;  %vm1202_vm4 = vcmask 1042432  }
  0x18   : > { %s5033_s10 = smul.u32 216, %s179_s5  ;;  %v3048_v32 = vsel %vm356_vm0, %v4781_v30, 0  ;;  %v4732_v35 = vld [vmem:[%s6774_s1 + $0xa] sm:$0x3]  ;;  %v3702_v38 = vsel %vm356_vm0, %v4910_v34, 0  ;;  %vm1203_vm5 = vcmask 1046532  }
  0x19   : > { %v2758_v39 = vsel %vm356_vm0, %v4732_v35, 0  ;;  %v4959_v40 = vld [vmem:[%s6774_s1 + $0x10] sm:$0x3]  ;;  %vm529_vm2 = vsmask.f32 3328  ;;  %vm5371_vm7 = vmor %vm1202_vm4, %vm1203_vm5  ;;  %s175_s9 = sand.u32 1, %s5187_s13  }
  0x1a   : > { %1425 = vmatpush.bf16.msrb.mxu2 %v1416_v4  ;;  %1024 = vmatpush.bf16.msrb.mxu1 %v1015_v7  ;;  %s5307_s19 = scalar_lea.vmem %s6773_s0, %s5033_s10  ;;  %v4100_v41 = vsel %vm356_vm0, %v4959_v40, 0  ;;  %vm530_vm3 = vsmask.f32 7440  ;;  %s4390_s10 = sshll.u32 %s175_s9, 8 }
  0x1b   : > { %1715 = vmatpush.bf16.msrb.mxu3 %v1706_v5  ;;  %2369 = vmatpush.bf16.msrb.mxu0 %v2360_v9  ;;  %v4985_v10 = vld [vmem:[%s5307_s19 + $0x30] sm:$0xff]  ;;  %v4989_v11 = vld [vmem:[%s5307_s19 + $0x60] sm:$0xff]  ;;  %v4987_v18 = vld [vmem:[%s5307_s19 + $0x48] sm:$0xff]  ;;  %s6483_s11 = scalar_lea.vmem [#allocation2], %s4390_s10  ;;  %s5029_s18 = sshll.u32 %s5195_s15, 8 }
  0x1c   : > { %v4993_v12 = vld [vmem:[%s5307_s19 + $0x90] sm:$0xff]  ;;  %v4981_v13 = vld [vmem:[%s5307_s19] sm:$0xff]  ;;  %4460 = vmatmul.msk.bf16.vlgmr.msra.gmra.mxu1 %vm307_vm1, %v4985_v10  ;;  %4464 = vmatmul.msk.bf16.vlgmr.msra.gmra.mxu2 %vm307_vm1, %v4989_v11  ;;  %v4991_v19 = vld [vmem:[%s5307_s19 + $0x78] sm:$0xff]  ;;  %s4300_s23 = scalar_lea.hbm %s6776_s3, %s5029_s18  ;;  %s4301_s26 = sshll.u32 %s6483_s11, 4  ;;  %s4302_s26 = int_to_ptr.vmem [resolvable:$true] %s4301_s26 }
  0x1d   : > { %4468 = vmatmul.msk.bf16.vlgmr.msra.gmra.mxu3 %vm307_vm1, %v4993_v12  ;;  %4456 = vmatmul.msk.bf16.vlgmr.msra.gmra.mxu0 %vm307_vm1, %v4981_v13  ;;  %v4986_v14 = vld [vmem:[%s5307_s19 + $0x3c] sm:$0xff]  ;;  %v4990_v15 = vld [vmem:[%s5307_s19 + $0x6c] sm:$0xff]  ;;  %v5331_v23 = vld [vmem:[%s5307_s19 + $0x4] sm:$0xf]  ;;  %s4303_s27 = sshll.u32 %s4300_s23, 4  ;;  %s4288_s15 = scalar_lea.sflag [#allocation3], %s175_s9  ;;  %s4304_s27 = int_to_ptr.hbm [resolvable:$true] %s4303_s27 }
  0x1e   : > { %v4994_v16 = vld [vmem:[%s5307_s19 + $0x9c] sm:$0xff]  ;;  %v4982_v17 = vld [vmem:[%s5307_s19 + $0xc] sm:$0xff]  ;;  %v542_v28 = vshll.u32 %v5331_v23, 16  ;;  %v546_v29 = vshrl.u32 %v5331_v23, 16  ;;  %3057 = vmatpush.bf16.msra.mxu2 %v3048_v32  ;;  %2767 = vmatpush.bf16.msra.mxu1 %v2758_v39  ;;  %v483_v42 = vld [vmem:[%s5307_s19 + $0x8] sm:$0x1] }
  0x1f   : > { %v4995_v20 = vld [vmem:[%s5307_s19 + $0xa8] sm:$0xff]  ;;  %v4983_v21 = vld [vmem:[%s5307_s19 + $0x18] sm:$0xff]  ;;  %v481_v22 = vld [vmem:[%s5307_s19] sm:$0xf]  ;;  %3711 = vmatpush.bf16.msra.mxu3 %v3702_v38  ;;  %4109 = vmatpush.bf16.msra.mxu0 %v4100_v41  ;;  %v552_v52 = vshll.u32 %v483_v42, 16  ;;  %v1207_v55 = vrot.slane %v5331_v23, 5 }
  0x20   : > { %v4635_v24 = vld [vmem:[%s5307_s19 + $0xc] sm:$0xf]  ;;  %v533_v25 = vshrl.u32 %v481_v22, 16  ;;  %v4636_v26 = vld [vmem:[%s5307_s19 + $0x10] sm:$0xf]  ;;  %v536_v27 = vshll.u32 %v481_v22, 16  ;;  %vm5365_vm6 = vmor %vm529_vm2, %vm530_vm3 }
  0x21   : > { %v1878_v31 = vshrl.u32 %v4635_v24, 16  ;;  %v1881_v33 = vshll.u32 %v4635_v24, 16  ;;  %v1887_v36 = vshll.u32 %v4636_v26, 16  ;;  %v1891_v37 = vshrl.u32 %v4636_v26, 16  ;;  %v4637_v51 = vld [vmem:[%s5307_s19 + $0x14] sm:$0x1] }
  0x22   : > { %v535_v43 = vrot.slane %v533_v25, 4  ;;  %v538_v44 = vrot.slane %v536_v27, 5  ;;  %v544_v45 = vrot.slane %v542_v28, 5  ;;  %v548_v46 = vrot.slane %v546_v29, 4  ;;  %v1138_v56 = vld [vmem:[%s5307_s19] sm:$0xe] }
  0x23   : > { %v1880_v47 = vrot.slane %v1878_v31, 4  ;;  %v1883_v48 = vrot.slane %v1881_v33, 5  ;;  %v1889_v49 = vrot.slane %v1887_v36, 5  ;;  %v1893_v50 = vrot.slane %v1891_v37, 4  ;;  %v4988_v60 = vld [vmem:[%s5307_s19 + $0x54] sm:$0xff]  ;;  %v4992_v61 = vld [vmem:[%s5307_s19 + $0x84] sm:$0xff] }
  0x24   : > { %v539_v53 = vor.u32 %v538_v44, %v535_v43  ;;  %v549_v54 = vor.u32 %v548_v46, %v544_v45  ;;  %v1897_v59 = vshll.u32 %v4637_v51, 16  ;;  %v4996_v62 = vld [vmem:[%s5307_s19 + $0xb4] sm:$0xff]  ;;  %v4984_v63 = vld [vmem:[%s5307_s19 + $0x24] sm:$0xff]  ;;  %v554_v0 = vrot.slane %v552_v52, 5  ;;  %v484_v11 = vld [vmem:[%s5307_s19 + $0xc] sm:$0xf] }
  0x25   : > { %v1884_v57 = vor.u32 %v1883_v48, %v1880_v47  ;;  %v1894_v58 = vor.u32 %v1893_v50, %v1889_v49  ;;  %v4489_v3 = vrot.slane %v1138_v56, 9  ;;  %v1209_v4 = vrot.slane %v1207_v55, 4  ;;  %v5379_v12 = vld [vmem:[%s5307_s19 + $0x10] sm:$0xf]  ;;  %v486_v35 = vld [vmem:[%s5307_s19 + $0x14] sm:$0x1] }
  0x26   : > { %v540_v1 = vrot.slane %v539_v53, 4  ;;  %v550_v2 = vrot.slane %v549_v54, 4  ;;  %v1210_v6 = vrot.slane %v483_v42, 5  ;;  %v1899_v9 = vrot.slane %v1897_v59, 5  ;;  %v1139_v51 = vld [vmem:[%s5307_s19 + $0xc] sm:$0xe] }
  0x27   : > { %v1885_v7 = vrot.slane %v1884_v57, 4  ;;  %v1895_v8 = vrot.slane %v1894_v58, 4  ;;  %v560_v22 = vshll.u32 %v484_v11, 16  ;;  %v566_v23 = vshll.u32 %v5379_v12, 16  ;;  %v4997_v52 = vld [vmem:[%s5307_s19 + $0xc] sm:$0xff]  ;;  %s5139_s28 = sshra.s32 %s4304_s27, 4  ;;  %s5140_s28 = int_to_ptr.hbm [resolvable:$true] %s5139_s28 }
  0x28   : > { %v545_v13 = vsel %vm5365_vm6, %v540_v1, %v544_v45  ;;  %v570_v24 = vshrl.u32 %v5379_v12, 16  ;;  %v576_v44 = vshll.u32 %v486_v35, 16  ;;  %v4640_v45 = vld [vmem:[%s5307_s19 + $0x20] sm:$0x1]  ;;  %v1214_v46 = vrot.slane %v5379_v12, 5  ;;  %s5141_s29 = scalar_lea.hbm %s5140_s28, 256  ;;  %p5146_p1 = scmp.lt.s32.totalorder %s5140_s28, %s6776_s3 }
  0x29   : > { %v918_v29 = vunpack.c.l.b16 %v545_v13  ;;  %v562_v37 = vrot.slane %v560_v22, 5  ;;  %v568_v38 = vrot.slane %v566_v23, 5  ;;  %v1921_v56 = vshll.u32 %v4640_v45, 16  ;;  %v4642_v1 = vld [vmem:[%s5307_s19 + $0x28] sm:$0xf]  ;;  %p5142_p12 = scmp.ne.s32.totalorder %s5140_s28, %s5141_s29  ;;  %s5145_s5 = scalar_lea.hbm %s6776_s3, 512 }
  0x2a   : > { %v572_v39 = vrot.slane %v570_v24, 4  ;;  %v578_v57 = vrot.slane %v576_v44, 5  ;;  %v4490_v58 = vrot.slane %v1139_v51, 9  ;;  %v1216_v59 = vrot.slane %v1214_v46, 4  ;;  %v489_v22 = vld [vmem:[%s5307_s19 + $0x20] sm:$0x1]  ;;  %p5147_p2 = scmp.lt.s32.totalorder %s5145_s5, %s5141_s29 }
  0x2b   : > { %p5143_p13 = pnand %p5142_p12, %p5267_p4 }
  0x2c   : > { %4461 = vmatmul.msk.bf16.gmra.mxu1 %vm307_vm1, %v4986_v14  ;;  %4465 = vmatmul.msk.bf16.gmra.mxu2 %vm307_vm1, %v4990_v15  ;;  %v555_v14 = vsel %vm5365_vm6, %v550_v2, %v554_v0  ;;  %v4638_v15 = vld [vmem:[%s5307_s19 + $0x18] sm:$0xf]  ;;  %v573_v53 = vor.u32 %v572_v39, %v568_v38  ;;  %v4641_v0 = vld [vmem:[%s5307_s19 + $0x24] sm:$0xf]  ;;  %p5148_p3 = por %p5147_p2, %p5146_p1 }
  0x2d   : > { %4469 = vmatmul.msk.bf16.gmra.mxu3 %vm307_vm1, %v4994_v16  ;;  %4457 = vmatmul.msk.bf16.gmra.mxu0 %vm307_vm1, %v4982_v17  ;;  %v4639_v16 = vld [vmem:[%s5307_s19 + $0x1c] sm:$0xf]  ;;  %v1208_v17 = vsel %vm5371_vm7, %v4489_v3, %v1207_v55  ;;  %v1902_v25 = vshrl.u32 %v4638_v15, 16  ;;  %v1905_v26 = vshll.u32 %v4638_v15, 16  ;;  %v919_v30 = vunpack.c.l.b16 %v555_v14  ;;  %p5144_p0 = pneg %p5143_p13 }
  0x2e   : > { %v1911_v27 = vshll.u32 %v4639_v16, 16  ;;  %v1915_v28 = vshrl.u32 %v4639_v16, 16  ;;  %v1319_v31 = vunpack.c.l.b16 %v1208_v17  ;;  %v574_v2 = vrot.slane %v573_v53, 4 }
  0x2f   : > { %v1904_v40 = vrot.slane %v1902_v25, 4  ;;  %v1907_v41 = vrot.slane %v1905_v26, 5  ;;  %v950_v47 = vpack.c.b16 %v919_v30, %v918_v29  ;;  %v1926_v12 = vshrl.u32 %v4641_v0, 16  ;;  %p5149_p5 = pnand %p5148_p3, %p5144_p0 }
  0x30   : > { %v1913_v42 = vrot.slane %v1911_v27, 5  ;;  %v1917_v43 = vrot.slane %v1915_v28, 4  ;;  %v1929_v13 = vshll.u32 %v4641_v0, 16  ;;  %v1935_v14 = vshll.u32 %v4642_v1, 16  ;;  %v4645_v0 = vld [vmem:[%s5307_s19 + $0x34] sm:$0xf] }
  0x31   : > { %v1908_v54 = vor.u32 %v1907_v41, %v1904_v40  ;;  %v1939_v15 = vshrl.u32 %v4642_v1, 16  ;;  %v1215_v16 = vsel %vm5371_vm7, %v4490_v58, %v1214_v46  ;;  %v1928_v27 = vrot.slane %v1926_v12, 4 }
  0x32   : > { %v1918_v55 = vor.u32 %v1917_v43, %v1913_v42  ;;  %v1931_v28 = vrot.slane %v1929_v13, 5  ;;  %v1937_v29 = vrot.slane %v1935_v14, 5  ;;  %v1959_v13 = vshll.u32 %v4645_v0, 16 }
  0x33   : > { %v1909_v3 = vrot.slane %v1908_v54, 4  ;;  %v1941_v30 = vrot.slane %v1939_v15, 4  ;;  %v1963_v14 = vshrl.u32 %v4645_v0, 16 }
  0x34   : > { %v1932_v43 = vor.u32 %v1931_v28, %v1928_v27  ;;  %v1961_v28 = vrot.slane %v1959_v13, 5 }
  0x35   : > { %v1942_v44 = vor.u32 %v1941_v30, %v1937_v29  ;;  %v4646_v30 = vld [vmem:[%s5307_s19 + $0x38] sm:$0x1] }
  0x3c   : > { %4462 = vmatmul.msk.bf16.gmra.mxu1 %vm307_vm1, %v4987_v18  ;;  %4466 = vmatmul.msk.bf16.gmra.mxu2 %vm307_vm1, %v4991_v19  ;;  %v1211_v18 = vsel %vm5371_vm7, %v1209_v4, %v1210_v6  ;;  %v1890_v19 = vsel %vm5365_vm6, %v1885_v7, %v1889_v49  ;;  %v1919_v4 = vrot.slane %v1918_v55, 4  ;;  %v1923_v6 = vrot.slane %v1921_v56, 5 }
  0x3d   : > { %4470 = vmatmul.msk.bf16.gmra.mxu3 %vm307_vm1, %v4995_v20  ;;  %4458 = vmatmul.msk.bf16.gmra.mxu0 %vm307_vm1, %v4983_v21  ;;  %v1900_v20 = vsel %vm5365_vm6, %v1895_v8, %v1899_v9  ;;  %v557_v21 = vshrl.u32 %v484_v11, 16  ;;  %v1320_v32 = vunpack.c.l.b16 %v1211_v18  ;;  %v2263_v33 = vunpack.c.l.b16 %v1890_v19 }
  0x3e   : > { %v2264_v34 = vunpack.c.l.b16 %v1900_v20  ;;  %v579_v19 = vsel %vm5365_vm6, %v574_v2, %v578_v57  ;;  %v1914_v20 = vsel %vm5365_vm6, %v1909_v3, %v1913_v42  ;;  %v1140_v42 = vld [vmem:[%s5307_s19 + $0x18] sm:$0xe]  ;;  %v1224_v55 = vrot.slane %v489_v22, 5 }
  0x3f   : > { %v559_v36 = vrot.slane %v557_v21, 4  ;;  %v1351_v48 = vpack.c.b16 %v1320_v32, %v1319_v31  ;;  %v1924_v21 = vsel %vm5365_vm6, %v1919_v4, %v1923_v6  ;;  %v921_v32 = vunpack.c.l.b16 %v579_v19 }
  0x40   : > { %v2295_v49 = vpack.c.b16 %v2264_v34, %v2263_v33  ;;  %v1321_v33 = vunpack.c.l.b16 %v1215_v16  ;;  %v4491_v53 = vrot.slane %v1140_v42, 9  ;;  %v1933_v56 = vrot.slane %v1932_v43, 4 }
  0x41   : > { %v563_v50 = vor.u32 %v562_v37, %v559_v36  ;;  %v2265_v36 = vunpack.c.l.b16 %v1914_v20  ;;  %v2266_v37 = vunpack.c.l.b16 %v1924_v21  ;;  %v1943_v57 = vrot.slane %v1942_v44, 4  ;;  %v492_v21 = vld [vmem:[%s5307_s19 + $0x2c] sm:$0x1] }
  0x42   : > { %v1938_v3 = vsel %vm5365_vm6, %v1933_v56, %v1937_v29  ;;  %v1965_v29 = vrot.slane %v1963_v14, 4  ;;  %v1969_v42 = vshll.u32 %v4646_v30, 16  ;;  %v4647_v56 = vld [vmem:[%s5307_s19 + $0x3c] sm:$0xf]  ;;  %v495_v14 = vld [vmem:[%s5307_s19 + $0x38] sm:$0x1] }
  0x43   : > { %v2267_v19 = vunpack.c.l.b16 %v1938_v3  ;;  %v1977_v3 = vshll.u32 %v4647_v56, 16  ;;  %v1142_v30 = vld [vmem:[%s5307_s19 + $0x30] sm:$0xe] }
  0x4c   : > { %4463 = vmatmul.msk.bf16.gmra.mxu1 %vm307_vm1, %v4988_v60  ;;  %4467 = vmatmul.msk.bf16.gmra.mxu2 %vm307_vm1, %v4992_v61  ;;  %v487_v60 = vld [vmem:[%s5307_s19 + $0x18] sm:$0xf]  ;;  %v5404_v61 = vld [vmem:[%s5307_s19 + $0x1c] sm:$0xf] }
  0x4d   : > { %4471 = vmatmul.msk.bf16.gmra.mxu3 %vm307_vm1, %v4996_v62  ;;  %4459 = vmatmul.msk.bf16.gmra.mxu0 %vm307_vm1, %v4984_v63  ;;  %v564_v62 = vrot.slane %v563_v50, 4  ;;  %v1217_v63 = vrot.slane %v486_v35, 5  ;;  %v581_v7 = vshrl.u32 %v487_v60, 16  ;;  %v584_v8 = vshll.u32 %v487_v60, 16  ;;  %v4643_v35 = vld [vmem:[%s5307_s19 + $0x2c] sm:$0x1] }
  0x4e   : > { %v590_v9 = vshll.u32 %v5404_v61, 16  ;;  %v594_v11 = vshrl.u32 %v5404_v61, 16  ;;  %v1221_v41 = vrot.slane %v5404_v61, 5  ;;  %v1945_v45 = vshll.u32 %v4643_v35, 16  ;;  %v5437_v60 = vld [vmem:[%s5307_s19 + $0x28] sm:$0xf] }
  0x4f   : > { %v1218_v17 = vsel %vm5371_vm7, %v1216_v59, %v1217_v63  ;;  %v569_v18 = vsel %vm5365_vm6, %v564_v62, %v568_v38  ;;  %v583_v23 = vrot.slane %v581_v7, 4  ;;  %v586_v24 = vrot.slane %v584_v8, 5  ;;  %v490_v59 = vld [vmem:[%s5307_s19 + $0x24] sm:$0xf]  ;;  %v4644_v63 = vld [vmem:[%s5307_s19 + $0x30] sm:$0xf] }
  0x50   : > { %v592_v25 = vrot.slane %v590_v9, 5  ;;  %v596_v26 = vrot.slane %v594_v11, 4  ;;  %v920_v31 = vunpack.c.l.b16 %v569_v18  ;;  %v1322_v34 = vunpack.c.l.b16 %v1218_v17 }
  0x51   : > { %v600_v38 = vshll.u32 %v489_v22, 16  ;;  %v587_v39 = vor.u32 %v586_v24, %v583_v23  ;;  %v1223_v54 = vrot.slane %v1221_v41, 4  ;;  %v1947_v58 = vrot.slane %v1945_v45, 5 }
  0x52   : > { %v597_v40 = vor.u32 %v596_v26, %v592_v25  ;;  %v951_v46 = vpack.c.b16 %v921_v32, %v920_v31  ;;  %v1222_v1 = vsel %vm5371_vm7, %v4491_v53, %v1221_v41  ;;  %v605_v6 = vshrl.u32 %v490_v59, 16  ;;  %v5466_v53 = vld [vmem:[%s5307_s19 + $0x34] sm:$0xf] }
  0x53   : > { %v602_v50 = vrot.slane %v600_v38, 5  ;;  %v588_v51 = vrot.slane %v587_v39, 4  ;;  %v1225_v2 = vsel %vm5371_vm7, %v1223_v54, %v1224_v55  ;;  %v1948_v4 = vsel %vm5365_vm6, %v1943_v57, %v1947_v58  ;;  %v1141_v39 = vld [vmem:[%s5307_s19 + $0x24] sm:$0xe]  ;;  %v4648_v57 = vld [vmem:[%s5307_s19 + $0x40] sm:$0xf] }
  0x54   : > { %v608_v7 = vshll.u32 %v490_v59, 16  ;;  %v614_v8 = vshll.u32 %v5437_v60, 16  ;;  %v618_v9 = vshrl.u32 %v5437_v60, 16  ;;  %v1950_v11 = vshrl.u32 %v4644_v63, 16 }
  0x55   : > { %v593_v61 = vsel %vm5365_vm6, %v588_v51, %v592_v25  ;;  %v1953_v12 = vshll.u32 %v4644_v63, 16  ;;  %v1323_v17 = vunpack.c.l.b16 %v1222_v1  ;;  %v1324_v18 = vunpack.c.l.b16 %v1225_v2 }
  0x56   : > { %v922_v15 = vunpack.c.l.b16 %v593_v61  ;;  %v2268_v20 = vunpack.c.l.b16 %v1948_v4  ;;  %v607_v22 = vrot.slane %v605_v6, 4  ;;  %v610_v23 = vrot.slane %v608_v7, 5 }
  0x57   : > { %v616_v24 = vrot.slane %v614_v8, 5  ;;  %v620_v25 = vrot.slane %v618_v9, 4  ;;  %v1952_v26 = vrot.slane %v1950_v11, 4  ;;  %v1955_v27 = vrot.slane %v1953_v12, 5 }
  0x58   : > { %v624_v32 = vshll.u32 %v492_v21, 16  ;;  %v2297_v38 = vpack.c.b16 %v2268_v20, %v2267_v19  ;;  %v1966_v41 = vor.u32 %v1965_v29, %v1961_v28  ;;  %v642_v61 = vshrl.u32 %v5466_v53, 16 }
  0x59   : > { %v621_v35 = vor.u32 %v620_v25, %v616_v24  ;;  %v1974_v2 = vshrl.u32 %v4647_v56, 16  ;;  %v1983_v4 = vshll.u32 %v4648_v57, 16  ;;  %v1987_v6 = vshrl.u32 %v4648_v57, 16 }
  0x5a   : > { %v626_v43 = vrot.slane %v624_v32, 5  ;;  %v1967_v51 = vrot.slane %v1966_v41, 4  ;;  %v1979_v20 = vrot.slane %v1977_v3, 5  ;;  %v1235_v25 = vrot.slane %v5466_v53, 5  ;;  %v498_v3 = vld [vmem:[%s5307_s19 + $0x44] sm:$0x1] }
  0x5b   : > { %v622_v45 = vrot.slane %v621_v35, 4  ;;  %v1976_v19 = vrot.slane %v1974_v2, 4 }
  0x5c   : > { %4473 = vmatmul.msk.bf16.vlgmr.msrb.gmra.mxu1 %vm307_vm1, %v950_v47  ;;  %4506 = vmatmul.msk.bf16.vlgmr.msrb.gmra.mxu2 %vm307_vm1, %v1351_v48  ;;  %v1352_v47 = vpack.c.b16 %v1322_v34, %v1321_v33  ;;  %v4998_v48 = vld [vmem:[%s5307_s19 + $0x18] sm:$0xff]  ;;  %v1353_v33 = vpack.c.b16 %v1324_v18, %v1323_v17  ;;  %v611_v34 = vor.u32 %v610_v23, %v607_v22  ;;  %v1989_v22 = vrot.slane %v1987_v6, 4 }
  0x5d   : > { %4619 = vmatmul.msk.bf16.vlgmr.msrb.gmra.mxu3 %vm307_vm1, %v4997_v52  ;;  %4684 = vmatmul.msk.bf16.vlgmr.msrb.gmra.mxu0 %vm307_vm1, %v2295_v49  ;;  %v2296_v49 = vpack.c.b16 %v2266_v37, %v2265_v36  ;;  %v598_v52 = vrot.slane %v597_v40, 4  ;;  %v1228_v36 = vrot.slane %v5437_v60, 5  ;;  %v4999_v37 = vld [vmem:[%s5307_s19 + $0x24] sm:$0xff]  ;;  %v1956_v40 = vor.u32 %v1955_v27, %v1952_v26 }
  0x5e   : > { %v612_v44 = vrot.slane %v611_v34, 4  ;;  %v627_v59 = vsel %vm5365_vm6, %v622_v45, %v626_v43  ;;  %v638_v60 = vshll.u32 %v5466_v53, 16  ;;  %v4649_v26 = vld [vmem:[%s5307_s19 + $0x44] sm:$0x1]  ;;  %v1237_v41 = vrot.slane %v1235_v25, 4 }
  0x5f   : > { %v603_v62 = vsel %vm5365_vm6, %v598_v52, %v602_v50  ;;  %v1957_v50 = vrot.slane %v1956_v40, 4  ;;  %v1971_v52 = vrot.slane %v1969_v42, 5  ;;  %v925_v8 = vunpack.c.l.b16 %v627_v59  ;;  %v4651_v45 = vld [vmem:[%s5307_s19 + $0x4c] sm:$0xf] }
  0x60   : > { %v923_v16 = vunpack.c.l.b16 %v603_v62  ;;  %v617_v58 = vsel %vm5365_vm6, %v612_v44, %v616_v24  ;;  %v648_v24 = vshll.u32 %v495_v14, 16  ;;  %v1993_v35 = vshll.u32 %v4649_v26, 16  ;;  %v4650_v44 = vld [vmem:[%s5307_s19 + $0x48] sm:$0xf] }
  0x61   : > { %v1962_v0 = vsel %vm5365_vm6, %v1957_v50, %v1961_v28  ;;  %v1972_v1 = vsel %vm5365_vm6, %v1967_v51, %v1971_v52  ;;  %v924_v7 = vunpack.c.l.b16 %v617_v58  ;;  %v4493_v40 = vrot.slane %v1142_v30, 9 }
  0x62   : > { %v952_v31 = vpack.c.b16 %v923_v16, %v922_v15  ;;  %v640_v15 = vrot.slane %v638_v60, 5  ;;  %v644_v16 = vrot.slane %v642_v61, 4  ;;  %v2269_v17 = vunpack.c.l.b16 %v1962_v0 }
  0x63   : > { %v2270_v18 = vunpack.c.l.b16 %v1972_v1  ;;  %v953_v27 = vpack.c.b16 %v925_v8, %v924_v7  ;;  %v1238_v43 = vrot.slane %v495_v14, 5  ;;  %v1995_v52 = vrot.slane %v1993_v35, 5  ;;  %v4652_v14 = vld [vmem:[%s5307_s19 + $0x50] sm:$0x1] }
  0x64   : > { %v645_v29 = vor.u32 %v644_v16, %v640_v15  ;;  %v1998_v53 = vshrl.u32 %v4650_v44, 16  ;;  %v2011_v56 = vshrl.u32 %v4651_v45, 16  ;;  %v1236_v59 = vsel %vm5371_vm7, %v4493_v40, %v1235_v25 }
  0x65   : > { %v2298_v32 = vpack.c.b16 %v2270_v18, %v2269_v17  ;;  %v1239_v60 = vsel %vm5371_vm7, %v1237_v41, %v1238_v43  ;;  %v2017_v25 = vshll.u32 %v4652_v14, 16  ;;  %v1245_v40 = vrot.slane %v498_v3, 5 }
  0x66   : > { %v646_v42 = vrot.slane %v645_v29, 4  ;;  %v2013_v8 = vrot.slane %v2011_v56, 4  ;;  %v4654_v56 = vld [vmem:[%s5307_s19 + $0x58] sm:$0xf] }
  0x67   : > { %v2019_v43 = vrot.slane %v2017_v25, 5 }
  0x6c   : > { %4474 = vmatmul.msk.bf16.gmra.mxu1 %vm307_vm1, %v951_v46  ;;  %4507 = vmatmul.msk.bf16.gmra.mxu2 %vm307_vm1, %v1352_v47  ;;  %v4492_v46 = vrot.slane %v1141_v39, 9  ;;  %v1230_v47 = vrot.slane %v1228_v36, 4  ;;  %v650_v39 = vrot.slane %v648_v24, 5 }
  0x6d   : > { %4620 = vmatmul.msk.bf16.gmra.mxu3 %vm307_vm1, %v4998_v48  ;;  %4685 = vmatmul.msk.bf16.gmra.mxu0 %vm307_vm1, %v2296_v49  ;;  %v493_v48 = vld [vmem:[%s5307_s19 + $0x30] sm:$0xf]  ;;  %v1231_v49 = vrot.slane %v492_v21, 5  ;;  %v1985_v21 = vrot.slane %v1983_v4, 5  ;;  %v2000_v4 = vrot.slane %v1998_v53, 4 }
  0x6e   : > { %v629_v54 = vshrl.u32 %v493_v48, 16  ;;  %v632_v55 = vshll.u32 %v493_v48, 16  ;;  %v1229_v62 = vsel %vm5371_vm7, %v4492_v46, %v1228_v36  ;;  %v496_v36 = vld [vmem:[%s5307_s19 + $0x3c] sm:$0xf]  ;;  %v651_v58 = vsel %vm5365_vm6, %v646_v42, %v650_v39 }
  0x6f   : > { %v1232_v63 = vsel %vm5371_vm7, %v1230_v47, %v1231_v49  ;;  %v1325_v12 = vunpack.c.l.b16 %v1229_v62  ;;  %v1990_v34 = vor.u32 %v1989_v22, %v1985_v21  ;;  %v653_v46 = vshrl.u32 %v496_v36, 16  ;;  %v1143_v22 = vld [vmem:[%s5307_s19 + $0x3c] sm:$0xe] }
  0x70   : > { %v631_v9 = vrot.slane %v629_v54, 4  ;;  %v634_v11 = vrot.slane %v632_v55, 5  ;;  %v1326_v13 = vunpack.c.l.b16 %v1232_v63  ;;  %v656_v47 = vshll.u32 %v496_v36, 16 }
  0x71   : > { %v1991_v51 = vrot.slane %v1990_v34, 4  ;;  %v2001_v54 = vshll.u32 %v4650_v44, 16  ;;  %v2007_v55 = vshll.u32 %v4651_v45, 16  ;;  %v655_v61 = vrot.slane %v653_v46, 4  ;;  %v5531_v34 = vld [vmem:[%s5307_s19 + $0x4c] sm:$0xf] }
  0x72   : > { %v635_v23 = vor.u32 %v634_v11, %v631_v9  ;;  %v1354_v28 = vpack.c.b16 %v1326_v13, %v1325_v12  ;;  %v658_v62 = vrot.slane %v656_v47, 5  ;;  %v927_v11 = vunpack.c.l.b16 %v651_v58 }
  0x73   : > { %v1996_v2 = vsel %vm5365_vm6, %v1991_v51, %v1995_v52  ;;  %v2003_v6 = vrot.slane %v2001_v54, 5  ;;  %v5516_v7 = vrot.slane %v2007_v55, 5  ;;  %v1327_v12 = vunpack.c.l.b16 %v1236_v59 }
  0x74   : > { %v1328_v13 = vunpack.c.l.b16 %v1239_v60  ;;  %v2272_v16 = vunpack.c.l.b16 %v1996_v2  ;;  %v659_v17 = vor.u32 %v658_v62, %v655_v61  ;;  %v686_v46 = vshll.u32 %v5531_v34, 16 }
  0x75   : > { %v2014_v24 = vor.u32 %v2013_v8, %v5516_v7  ;;  %v690_v47 = vshrl.u32 %v5531_v34, 16  ;;  %v2035_v8 = vshrl.u32 %v4654_v56, 16 }
  0x76   : > { %v5563_v61 = vrot.slane %v686_v46, 5 }
  0x77   : > { %v2015_v42 = vrot.slane %v2014_v24, 4 }
  0x79   : > { %v2020_v55 = vsel %vm5365_vm6, %v2015_v42, %v2019_v43  ;;  %v502_v42 = vld [vmem:[%s5307_s19 + $0x54] sm:$0xf] }
  0x7c   : > { %4475 = vmatmul.msk.bf16.gmra.mxu1 %vm307_vm1, %v952_v31  ;;  %4508 = vmatmul.msk.bf16.gmra.mxu2 %vm307_vm1, %v1353_v33  ;;  %v5000_v31 = vld [vmem:[%s5307_s19 + $0x30] sm:$0xff]  ;;  %v1980_v33 = vor.u32 %v1979_v20, %v1976_v19  ;;  %v5523_v19 = vld [vmem:[%s6775_s2] ss:$0 sm:$0xff]  ;;  %v672_v20 = vshll.u32 %v498_v3, 16 }
  0x7d   : > { %4621 = vmatmul.msk.bf16.gmra.mxu3 %vm307_vm1, %v4999_v37  ;;  %4686 = vmatmul.msk.bf16.gmra.mxu0 %vm307_vm1, %v2297_v38  ;;  %v5491_v37 = vld [vmem:[%s5307_s19 + $0x40] sm:$0xf]  ;;  %v636_v38 = vrot.slane %v635_v23, 4  ;;  %v2004_v23 = vor.u32 %v2003_v6, %v2000_v4  ;;  %v5574_v6 = vld [vmem:[%s5307_s19 + $0x50] sm:$0x1] }
  0x7e   : > { %v662_v48 = vshll.u32 %v5491_v37, 16  ;;  %v666_v49 = vshrl.u32 %v5491_v37, 16  ;;  %v1981_v50 = vrot.slane %v1980_v33, 4  ;;  %v499_v33 = vld [vmem:[%s5307_s19 + $0x48] sm:$0xf] }
  0x7f   : > { %v641_v57 = vsel %vm5365_vm6, %v636_v38, %v640_v15  ;;  %v4494_v38 = vrot.slane %v1143_v22, 9  ;;  %v2005_v41 = vrot.slane %v2004_v23, 4  ;;  %v677_v44 = vshrl.u32 %v499_v33, 16 }
  0x80   : > { %v5509_v63 = vrot.slane %v662_v48, 5  ;;  %v668_v0 = vrot.slane %v666_v49, 4  ;;  %v1986_v1 = vsel %vm5365_vm6, %v1981_v50, %v1985_v21  ;;  %v926_v9 = vunpack.c.l.b16 %v641_v57  ;;  %v4653_v50 = vld [vmem:[%s5307_s19 + $0x54] sm:$0xf] }
  0x81   : > { %v2271_v15 = vunpack.c.l.b16 %v1986_v1  ;;  %v1242_v21 = vrot.slane %v5491_v37, 5  ;;  %v674_v37 = vrot.slane %v672_v20, 5  ;;  %v680_v45 = vshll.u32 %v499_v33, 16  ;;  %v1144_v33 = vld [vmem:[%s5307_s19 + $0x48] sm:$0xe] }
  0x82   : > { %v669_v18 = vor.u32 %v668_v0, %v5509_v63  ;;  %v954_v26 = vpack.c.b16 %v927_v11, %v926_v9  ;;  %v2010_v54 = vsel %vm5365_vm6, %v2005_v41, %v5516_v7  ;;  %v679_v59 = vrot.slane %v677_v44, 4 }
  0x83   : > { %v2299_v30 = vpack.c.b16 %v2272_v16, %v2271_v15  ;;  %v1244_v39 = vrot.slane %v1242_v21, 4  ;;  %v1243_v52 = vsel %vm5371_vm7, %v4494_v38, %v1242_v21  ;;  %v682_v60 = vrot.slane %v680_v45, 5 }
  0x84   : > { %v692_v0 = vrot.slane %v690_v47, 4  ;;  %v2022_v1 = vshrl.u32 %v4653_v50, 16  ;;  %v2025_v2 = vshll.u32 %v4653_v50, 16  ;;  %v2031_v7 = vshll.u32 %v4654_v56, 16 }
  0x85   : > { %v1246_v53 = vsel %vm5371_vm7, %v1244_v39, %v1245_v40  ;;  %v2273_v14 = vunpack.c.l.b16 %v2010_v54  ;;  %v2274_v15 = vunpack.c.l.b16 %v2020_v55  ;;  %v683_v16 = vor.u32 %v682_v60, %v679_v59  ;;  %v5002_v39 = vld [vmem:[%s5307_s19 + $0x48] sm:$0xff] }
  0x86   : > { %v2024_v20 = vrot.slane %v2022_v1, 4  ;;  %v2027_v21 = vrot.slane %v2025_v2, 5  ;;  %v5578_v22 = vrot.slane %v2031_v7, 5  ;;  %v2037_v23 = vrot.slane %v2035_v8, 4 }
  0x87   : > { %v4495_v47 = vrot.slane %v1144_v33, 9  ;;  %v701_v50 = vshrl.u32 %v502_v42, 16  ;;  %v1252_v56 = vrot.slane %v5574_v6, 5 }
  0x88   : > { %v2038_v45 = vor.u32 %v2037_v23, %v5578_v22 }
  0x8a   : > { %v2039_v59 = vrot.slane %v2038_v45, 4 }
  0x8c   : > { %4476 = vmatmul.msk.bf16.gmra.mxu1 %vm307_vm1, %v953_v27  ;;  %4509 = vmatmul.msk.bf16.gmra.mxu2 %vm307_vm1, %v1354_v28  ;;  %v1355_v27 = vpack.c.b16 %v1328_v13, %v1327_v12  ;;  %v5001_v28 = vld [vmem:[%s5307_s19 + $0x3c] sm:$0xff]  ;;  %v1329_v12 = vunpack.c.l.b16 %v1243_v52  ;;  %v1330_v13 = vunpack.c.l.b16 %v1246_v53  ;;  %v4657_v53 = vld [vmem:[%s5307_s19 + $0x64] sm:$0xf] }
  0x8d   : > { %4622 = vmatmul.msk.bf16.gmra.mxu3 %vm307_vm1, %v5000_v31  ;;  %4687 = vmatmul.msk.bf16.gmra.mxu0 %vm307_vm1, %v2298_v32  ;;  %v660_v31 = vrot.slane %v659_v17, 4  ;;  %v670_v32 = vrot.slane %v669_v18, 4  ;;  %v693_v17 = vor.u32 %v692_v0, %v5563_v61  ;;  %v696_v18 = vshll.u32 %v5574_v6, 16  ;;  %v4656_v52 = vld [vmem:[%s5307_s19 + $0x60] sm:$0xf] }
  0x8e   : > { %v2046_v2 = vshrl.u32 %v4656_v52, 16  ;;  %v2049_v7 = vshll.u32 %v4656_v52, 16  ;;  %v2055_v8 = vshll.u32 %v4657_v53, 16 }
  0x8f   : > { %v665_v48 = vsel %vm5365_vm6, %v660_v31, %v5509_v63  ;;  %v675_v49 = vsel %vm5365_vm6, %v670_v32, %v674_v37  ;;  %v2300_v31 = vpack.c.b16 %v2274_v15, %v2273_v14  ;;  %v684_v32 = vrot.slane %v683_v16, 4 }
  0x90   : > { %v928_v9 = vunpack.c.l.b16 %v665_v48  ;;  %v929_v11 = vunpack.c.l.b16 %v675_v49  ;;  %v694_v40 = vrot.slane %v693_v17, 4  ;;  %v698_v41 = vrot.slane %v696_v18, 5  ;;  %v5598_v49 = vld [vmem:[%s5307_s19 + $0x58] sm:$0xf] }
  0x91   : > { %v689_v54 = vsel %vm5365_vm6, %v684_v32, %v5563_v61  ;;  %v714_v0 = vshrl.u32 %v5598_v49, 16  ;;  %v1256_v45 = vrot.slane %v5598_v49, 5 }
  0x92   : > { %v955_v25 = vpack.c.b16 %v929_v11, %v928_v9  ;;  %v699_v55 = vsel %vm5365_vm6, %v694_v40, %v698_v41  ;;  %v2059_v9 = vshrl.u32 %v4657_v53, 16  ;;  %v930_v16 = vunpack.c.l.b16 %v689_v54 }
  0x93   : > { %v931_v32 = vunpack.c.l.b16 %v699_v55 }
  0x95   : > { %v956_v54 = vpack.c.b16 %v931_v32, %v930_v16 }
  0x99   : > { %v389_v29 = vpop.f32.mrf.mxu1 }
  0x9a   : > { %v5534_v35 = vadd.f32 %v5523_v19, %v389_v29  ;;  %v5536_v36 = vpop.f32.mrf.mxu0 }
  0x9c   : > { %4477 = vmatmul.msk.bf16.gmra.mxu1 %vm307_vm1, %v954_v26  ;;  %4510 = vmatmul.msk.bf16.gmra.mxu2 %vm307_vm1, %v1355_v27  ;;  %v1249_v26 = vrot.slane %v5531_v34, 5  ;;  %v4655_v27 = vld [vmem:[%s5307_s19 + $0x5c] sm:$0x1]  ;;  %v2028_v34 = vor.u32 %v2027_v21, %v2024_v20 }
  0x9d   : > { %4623 = vmatmul.msk.bf16.gmra.mxu3 %vm307_vm1, %v5001_v28  ;;  %4688 = vmatmul.msk.bf16.gmra.mxu0 %vm307_vm1, %v2299_v30  ;;  %v1356_v30 = vpack.c.b16 %v1330_v13, %v1329_v12  ;;  %v2041_v46 = vshll.u32 %v4655_v27, 16  ;;  %v703_v12 = vrot.slane %v701_v50, 4  ;;  %v2048_v27 = vrot.slane %v2046_v2, 4 }
  0x9e   : > { %v1251_v48 = vrot.slane %v1249_v26, 4  ;;  %v1250_v6 = vsel %vm5371_vm7, %v4495_v47, %v1249_v26  ;;  %v716_v26 = vrot.slane %v714_v0, 4  ;;  %v1145_v47 = vld [vmem:[%s5307_s19 + $0x54] sm:$0xe]  ;;  %v505_v0 = vld [vmem:[%s5307_s19 + $0x60] sm:$0xf] }
  0x9f   : > { %v409_v51 = vpop.f32.mrf.mxu2  ;;  %v2043_v60 = vrot.slane %v2041_v46, 5  ;;  %v1331_v33 = vunpack.c.l.b16 %v1250_v6 }
  0xa0   : > { %v5561_v57 = vadd.f32 %v5523_v19, %v409_v51  ;;  %v429_v58 = vpop.f32.mrf.mxu3  ;;  %v704_v51 = vshll.u32 %v502_v42, 16  ;;  %v1253_v17 = vsel %vm5371_vm7, %v1251_v48, %v1252_v56 }
  0xa1   : > { %v5566_v62 = vadd.f32 %v5523_v19, %v429_v58  ;;  %v391_v63 = vpop.f32.mrf.mxu1  ;;  %v2029_v58 = vrot.slane %v2028_v34, 4  ;;  %v2044_v23 = vsel %vm5365_vm6, %v2039_v59, %v2043_v60 }
  0xa2   : > { %v5569_v3 = vadd.f32 %v5523_v19, %v391_v63  ;;  %v5571_v4 = vpop.f32.mrf.mxu0  ;;  %v710_v63 = vshll.u32 %v5598_v49, 16  ;;  %v706_v13 = vrot.slane %v704_v51, 5  ;;  %v2276_v41 = vunpack.c.l.b16 %v2044_v23  ;;  %v5003_v49 = vld [vmem:[%s5307_s19 + $0x54] sm:$0xff] }
  0xa3   : > { %v2034_v18 = vsel %vm5365_vm6, %v2029_v58, %v5578_v22  ;;  %v1332_v22 = vunpack.c.l.b16 %v1253_v17  ;;  %v725_v17 = vshrl.u32 %v505_v0, 16 }
  0xa4   : > { %v2275_v40 = vunpack.c.l.b16 %v2034_v18  ;;  %v728_v18 = vshll.u32 %v505_v0, 16 }
  0xa5   : > { %v1357_v55 = vpack.c.b16 %v1332_v22, %v1331_v33 }
  0xa6   : > { %v2301_v60 = vpack.c.b16 %v2276_v41, %v2275_v40  ;;  %v727_v41 = vrot.slane %v725_v17, 4 }
  0xa7   : > { %v411_v24 = vpop.f32.mrf.mxu2 }
  0xa8   : > { %v5583_v28 = vadd.f32 %v5523_v19, %v411_v24  ;;  %v431_v29 = vpop.f32.mrf.mxu3  ;;  %v504_v24 = vld [vmem:[%s5307_s19 + $0x5c] sm:$0x1] }
  0xa9   : > { %v5587_v37 = vadd.f32 %v5523_v19, %v431_v29  ;;  %v394_v38 = vpop.f32.mrf.mxu1  ;;  %v2051_v29 = vrot.slane %v2049_v7, 5  ;;  %v720_v34 = vshll.u32 %v504_v24, 16  ;;  %v1259_v6 = vrot.slane %v504_v24, 5 }
  0xaa   : > { %v5592_v43 = vadd.f32 %v5523_v19, %v394_v38  ;;  %v5594_v44 = vpop.f32.mrf.mxu0  ;;  %v707_v38 = vor.u32 %v706_v13, %v703_v12 }
  0xab   : > { %v2052_v48 = vor.u32 %v2051_v29, %v2048_v27  ;;  %v4659_v29 = vld [vmem:[%s5307_s19 + $0x6c] sm:$0xf] }
  0xac   : > { %4478 = vmatmul.msk.bf16.gmra.mxu1 %vm307_vm1, %v955_v25  ;;  %4511 = vmatmul.msk.bf16.gmra.mxu2 %vm307_vm1, %v1356_v30  ;;  %v712_v25 = vrot.slane %v710_v63, 5  ;;  %v5635_v30 = vrot.slane %v2055_v8, 5  ;;  %v708_v56 = vrot.slane %v707_v38, 4  ;;  %v722_v63 = vrot.slane %v720_v34, 5  ;;  %v4660_v38 = vld [vmem:[%s5307_s19 + $0x70] sm:$0xf] }
  0xad   : > { %4624 = vmatmul.msk.bf16.gmra.mxu3 %vm307_vm1, %v5002_v39  ;;  %4689 = vmatmul.msk.bf16.gmra.mxu0 %vm307_vm1, %v2300_v31  ;;  %v2061_v31 = vrot.slane %v2059_v9, 4  ;;  %v4658_v39 = vld [vmem:[%s5307_s19 + $0x68] sm:$0x1]  ;;  %v4496_v9 = vrot.slane %v1145_v47, 9  ;;  %v2053_v12 = vrot.slane %v2052_v48, 4  ;;  %v730_v34 = vrot.slane %v728_v18, 5 }
  0xae   : > { %v717_v42 = vor.u32 %v716_v26, %v712_v25  ;;  %v2065_v51 = vshll.u32 %v4658_v39, 16  ;;  %v713_v16 = vsel %vm5365_vm6, %v708_v56, %v712_v25  ;;  %v5687_v47 = vld [vmem:[%s5307_s19 + $0x68] sm:$0x1]  ;;  %v2083_v56 = vshrl.u32 %v4660_v38, 16 }
  0xaf   : > { %v414_v1 = vpop.f32.mrf.mxu2  ;;  %v2062_v50 = vor.u32 %v2061_v31, %v5635_v30  ;;  %v1257_v27 = vsel %vm5371_vm7, %v4496_v9, %v1256_v45  ;;  %v932_v25 = vunpack.c.l.b16 %v713_v16  ;;  %v2058_v33 = vsel %vm5365_vm6, %v2053_v12, %v5635_v30  ;;  %v1146_v12 = vld [vmem:[%s5307_s19 + $0x60] sm:$0xe] }
  0xb0   : > { %v5615_v61 = vadd.f32 %v5523_v19, %v414_v1  ;;  %v434_v11 = vpop.f32.mrf.mxu3  ;;  %v5650_v1 = vld [vmem:[%s5307_s19 + $0x64] sm:$0xf]  ;;  %v718_v8 = vrot.slane %v717_v42, 4  ;;  %v2070_v30 = vshrl.u32 %v4659_v29, 16  ;;  %v731_v0 = vor.u32 %v730_v34, %v727_v41 }
  0xb1   : > { %v5620_v14 = vadd.f32 %v5523_v19, %v434_v11  ;;  %v396_v15 = vpop.f32.mrf.mxu1  ;;  %v1258_v11 = vrot.slane %v1256_v45, 4  ;;  %v2063_v13 = vrot.slane %v2062_v50, 4  ;;  %v734_v23 = vshll.u32 %v5650_v1, 16 }
  0xb2   : > { %v5628_v20 = vadd.f32 %v5523_v19, %v396_v15  ;;  %v5630_v21 = vpop.f32.mrf.mxu0  ;;  %v2067_v15 = vrot.slane %v2065_v51, 5  ;;  %v738_v24 = vshrl.u32 %v5650_v1, 16  ;;  %v723_v26 = vsel %vm5365_vm6, %v718_v8, %v722_v63 }
  0xb3   : > { %6783 = vst [vmem:[#allocation5_spill] sm:$0xff] %v5620_v14  ;;  %v1260_v32 = vsel %vm5371_vm7, %v1258_v11, %v1259_v6  ;;  %v5681_v42 = vrot.slane %v734_v23, 5  ;;  %v2073_v50 = vshll.u32 %v4659_v29, 16  ;;  %v744_v8 = vshll.u32 %v5687_v47, 16 }
  0xb4   : > { %v2068_v22 = vsel %vm5365_vm6, %v2063_v13, %v2067_v15  ;;  %v740_v48 = vrot.slane %v738_v24, 4  ;;  %v2072_v11 = vrot.slane %v2070_v30, 4  ;;  %v2085_v15 = vrot.slane %v2083_v56, 4  ;;  %v4661_v24 = vld [vmem:[%s5307_s19 + $0x74] sm:$0x1] }
  0xb5   : > { %v2278_v63 = vunpack.c.l.b16 %v2068_v22  ;;  %v2075_v6 = vrot.slane %v2073_v50, 5  ;;  %v732_v29 = vrot.slane %v731_v0, 4  ;;  %v2089_v30 = vshll.u32 %v4661_v24, 16  ;;  %v4662_v56 = vld [vmem:[%s5307_s19 + $0x78] sm:$0xf] }
  0xb6   : > { %v741_v9 = vor.u32 %v740_v48, %v5681_v42  ;;  %v4663_v0 = vld [vmem:[%s5307_s19 + $0x7c] sm:$0xf] }
  0xb7   : > { %v416_v46 = vpop.f32.mrf.mxu2  ;;  %v2076_v41 = vor.u32 %v2075_v6, %v2072_v11  ;;  %v2103_v24 = vshll.u32 %v4663_v0, 16 }
  0xb8   : > { %v5642_v52 = vadd.f32 %v5523_v19, %v416_v46  ;;  %v436_v53 = vpop.f32.mrf.mxu3 }
  0xb9   : > { %v5645_v58 = vadd.f32 %v5523_v19, %v436_v53  ;;  %v399_v59 = vpop.f32.mrf.mxu1 }
  0xba   : > { %v5653_v2 = vadd.f32 %v5523_v19, %v399_v59  ;;  %v5655_v7 = vpop.f32.mrf.mxu0  ;;  %v1333_v59 = vunpack.c.l.b16 %v1257_v27 }
  0xbb   : > { %6784 = vst [vmem:[#allocation6_spill] sm:$0xff] %v5645_v58 }
  0xbc   : > { %4479 = vmatmul.msk.bf16.gmra.mxu1 %vm307_vm1, %v956_v54  ;;  %4512 = vmatmul.msk.bf16.gmra.mxu2 %vm307_vm1, %v1357_v55  ;;  %v933_v54 = vunpack.c.l.b16 %v723_v26  ;;  %v2079_v55 = vshll.u32 %v4660_v38, 16  ;;  %v5004_v38 = vld [vmem:[%s5307_s19 + $0x60] sm:$0xff] }
  0xbd   : > { %4625 = vmatmul.msk.bf16.gmra.mxu3 %vm307_vm1, %v5003_v49  ;;  %4690 = vmatmul.msk.bf16.gmra.mxu0 %vm307_vm1, %v2301_v60  ;;  %v1334_v49 = vunpack.c.l.b16 %v1260_v32  ;;  %v2277_v60 = vunpack.c.l.b16 %v2058_v33  ;;  %v1263_v32 = vrot.slane %v5650_v1, 5  ;;  %v508_v1 = vld [vmem:[%s5307_s19 + $0x6c] sm:$0xf] }
  0xbe   : > { %v5697_v13 = vrot.slane %v2079_v55, 5  ;;  %v957_v17 = vpack.c.b16 %v933_v54, %v932_v25  ;;  %v742_v25 = vrot.slane %v741_v9, 4  ;;  %v1266_v54 = vrot.slane %v5687_v47, 5  ;;  %v5719_v55 = vld [vmem:[%s5307_s19 + $0x70] sm:$0xf] }
  0xbf   : > { %v419_v31 = vpop.f32.mrf.mxu2  ;;  %v1358_v18 = vpack.c.b16 %v1334_v49, %v1333_v59  ;;  %v2302_v23 = vpack.c.b16 %v2278_v63, %v2277_v60  ;;  %v1265_v50 = vrot.slane %v1263_v32, 4  ;;  %v737_v59 = vsel %vm5365_vm6, %v732_v29, %v5681_v42 }
  0xc0   : > { %v5679_v39 = vadd.f32 %v5523_v19, %v419_v31  ;;  %v439_v40 = vpop.f32.mrf.mxu3  ;;  %v746_v31 = vrot.slane %v744_v8, 5  ;;  %v2086_v48 = vor.u32 %v2085_v15, %v5697_v13  ;;  %v2077_v63 = vrot.slane %v2076_v41, 4 }
  0xc1   : > { %v5684_v45 = vadd.f32 %v5523_v19, %v439_v40  ;;  %v401_v46 = vpop.f32.mrf.mxu1  ;;  %v4497_v40 = vrot.slane %v1146_v12, 9  ;;  %v2091_v8 = vrot.slane %v2089_v30, 5  ;;  %v749_v9 = vshrl.u32 %v508_v1, 16 }
  0xc2   : > { %v5690_v51 = vadd.f32 %v5523_v19, %v401_v46  ;;  %v5692_v53 = vpop.f32.mrf.mxu0  ;;  %v747_v49 = vsel %vm5365_vm6, %v742_v25, %v746_v31  ;;  %v2087_v47 = vrot.slane %v2086_v48, 4  ;;  %v752_v11 = vshll.u32 %v508_v1, 16  ;;  %v510_v1 = vld [vmem:[%s5307_s19 + $0x74] sm:$0x1] }
  0xc3   : > { %6785 = vst [vmem:[#allocation7_spill] sm:$0xff] %v5684_v45  ;;  %v1264_v60 = vsel %vm5371_vm7, %v4497_v40, %v1263_v32  ;;  %v758_v12 = vshll.u32 %v5719_v55, 16  ;;  %v762_v15 = vshrl.u32 %v5719_v55, 16  ;;  %v935_v32 = vunpack.c.l.b16 %v747_v49 }
  0xc4   : > { %v2092_v41 = vsel %vm5365_vm6, %v2087_v47, %v2091_v8  ;;  %v751_v48 = vrot.slane %v749_v9, 4  ;;  %v754_v30 = vrot.slane %v752_v11, 5  ;;  %v1335_v49 = vunpack.c.l.b16 %v1264_v60 }
  0xc5   : > { %v449_v47 = vadd.f32 %v5523_v19, %v5536_v36  ;;  %v768_v9 = vshll.u32 %v510_v1, 16  ;;  %v1270_v60 = vrot.slane %v5719_v55, 5 }
  0xc6   : > { %v755_v8 = vor.u32 %v754_v30, %v751_v48  ;;  %v511_v30 = vld [vmem:[%s5307_s19 + $0x78] sm:$0xf] }
  0xc7   : > { %v421_v16 = vpop.f32.mrf.mxu2 }
  0xc8   : > { %v5701_v26 = vadd.f32 %v5523_v19, %v421_v16  ;;  %v441_v27 = vpop.f32.mrf.mxu3  ;;  %v2094_v16 = vshrl.u32 %v4662_v56, 16  ;;  %v756_v55 = vrot.slane %v755_v8, 4  ;;  %v450_v8 = vadd.f32 %v5523_v19, %v5571_v4 }
  0xc9   : > { %v5705_v33 = vadd.f32 %v5523_v19, %v441_v27  ;;  %v404_v22 = vpop.f32.mrf.mxu1  ;;  %v2107_v27 = vshrl.u32 %v4663_v0, 16 }
  0xca   : > { %v5709_v34 = vadd.f32 %v5523_v19, %v404_v22  ;;  %v5711_v46 = vpop.f32.mrf.mxu0  ;;  %v1267_v22 = vsel %vm5371_vm7, %v1265_v50, %v1266_v54  ;;  %v2096_v50 = vrot.slane %v2094_v16, 4  ;;  %v1147_v16 = vld [vmem:[%s5307_s19 + $0x6c] sm:$0xe] }
  0xcb   : > { %6786 = vst [vmem:[#allocation8_spill] sm:$0xff] %v5705_v33  ;;  %v2109_v0 = vrot.slane %v2107_v27, 4  ;;  %v1272_v33 = vrot.slane %v1270_v60, 4 }
  0xcc   : > { %4480 = vmatmul.msk.bf16.gmra.mxu1 %vm307_vm1, %v957_v17  ;;  %4513 = vmatmul.msk.bf16.gmra.mxu2 %vm307_vm1, %v1358_v18  ;;  %v2097_v17 = vshll.u32 %v4662_v56, 16  ;;  %v5753_v56 = vrot.slane %v758_v12, 5 }
  0xcd   : > { %4626 = vmatmul.msk.bf16.gmra.mxu3 %vm307_vm1, %v5004_v38  ;;  %4691 = vmatmul.msk.bf16.gmra.mxu0 %vm307_vm1, %v2302_v23  ;;  %v934_v23 = vunpack.c.l.b16 %v737_v59  ;;  %v2082_v38 = vsel %vm5365_vm6, %v2077_v63, %v5697_v13  ;;  %v764_v59 = vrot.slane %v762_v15, 4  ;;  %v1336_v13 = vunpack.c.l.b16 %v1267_v22 }
  0xce   : > { %v2099_v54 = vrot.slane %v2097_v17, 5  ;;  %v5755_v63 = vrot.slane %v2103_v24, 5 }
  0xcf   : > { %v424_v6 = vpop.f32.mrf.mxu2  ;;  %v958_v12 = vpack.c.b16 %v935_v32, %v934_v23  ;;  %v765_v15 = vor.u32 %v764_v59, %v5753_v56  ;;  %v1359_v22 = vpack.c.b16 %v1336_v13, %v1335_v49  ;;  %v5005_v23 = vld [vmem:[%s5307_s19 + $0x6c] sm:$0xff]  ;;  %v1273_v49 = vrot.slane %v510_v1, 5 }
  0xd0   : > { %v5735_v42 = vadd.f32 %v5523_v19, %v424_v6  ;;  %v444_v18 = vpop.f32.mrf.mxu3  ;;  %v2279_v6 = vunpack.c.l.b16 %v2082_v38  ;;  %v2100_v17 = vor.u32 %v2099_v54, %v2096_v50  ;;  %v2110_v38 = vor.u32 %v2109_v0, %v5755_v63  ;;  %v5775_v0 = vld [vmem:[%s5307_s19 + $0x7c] sm:$0xf] }
  0xd1   : > { %v5738_v29 = vadd.f32 %v5523_v19, %v444_v18  ;;  %v406_v31 = vpop.f32.mrf.mxu1  ;;  %v2280_v18 = vunpack.c.l.b16 %v2092_v41  ;;  %v770_v50 = vrot.slane %v768_v9, 5  ;;  %v4498_v54 = vrot.slane %v1147_v16, 9  ;;  %v4666_v16 = vld [vmem:[%s5307_s19 + $0x88] sm:$0xf] }
  0xd2   : > { %v5746_v25 = vadd.f32 %v5523_v19, %v406_v31  ;;  %v5748_v40 = vpop.f32.mrf.mxu0  ;;  %v4664_v31 = vld [vmem:[%s5307_s19 + $0x80] sm:$0x1]  ;;  %v2101_v13 = vrot.slane %v2100_v17, 4  ;;  %v761_v1 = vsel %vm5365_vm6, %v756_v55, %v5753_v56  ;;  %v782_v9 = vshll.u32 %v5775_v0, 16 }
  0xd3   : > { %6787 = vst [vmem:[#allocation9_spill] sm:$0xff] %v5738_v29  ;;  %v2113_v36 = vshll.u32 %v4664_v31, 16  ;;  %v2303_v32 = vpack.c.b16 %v2280_v18, %v2279_v6  ;;  %v2111_v6 = vrot.slane %v2110_v38, 4  ;;  %v773_v31 = vshrl.u32 %v511_v30, 16  ;;  %v5802_v55 = vld [vmem:[%s5307_s19 + $0x80] sm:$0x1] }
  0xd4   : > { %v1274_v4 = vsel %vm5371_vm7, %v1272_v33, %v1273_v49  ;;  %v2106_v56 = vsel %vm5365_vm6, %v2101_v13, %v5755_v63  ;;  %v5804_v45 = vrot.slane %v782_v9, 5  ;;  %v792_v58 = vshll.u32 %v5802_v55, 16 }
  0xd5   : > { %v2115_v18 = vrot.slane %v2113_v36, 5 }
  0xd7   : > { %v426_v11 = vpop.f32.mrf.mxu2 }
  0xd8   : > { %v5764_v24 = vadd.f32 %v5523_v19, %v426_v11  ;;  %v446_v27 = vpop.f32.mrf.mxu3  ;;  %v766_v11 = vrot.slane %v765_v15, 4  ;;  %v4665_v15 = vld [vmem:[%s5307_s19 + $0x84] sm:$0xf] }
  0xd9   : > { %v5768_v41 = vadd.f32 %v5523_v19, %v446_v27  ;;  %v1026_v48 = vpop.f32.mrf.mxu1 }
  0xda   : > { %v1106_v59 = vadd.f32 %v1026_v48, %v449_v47  ;;  %v5772_v29 = vpop.f32.mrf.mxu0  ;;  %v776_v47 = vshll.u32 %v511_v30, 16  ;;  %v771_v27 = vsel %vm5365_vm6, %v766_v11, %v770_v50  ;;  %v2116_v48 = vsel %vm5365_vm6, %v2111_v6, %v2115_v18 }
  0xdb   : > { %6788 = vst [vmem:[#allocation10_spill] sm:$0xff] %v5768_v41  ;;  %v2118_v50 = vshrl.u32 %v4665_v15, 16  ;;  %v2121_v11 = vshll.u32 %v4665_v15, 16  ;;  %v937_v13 = vunpack.c.l.b16 %v771_v27  ;;  %v1338_v6 = vunpack.c.l.b16 %v1274_v4  ;;  %v1148_v4 = vld [vmem:[%s5307_s19 + $0x78] sm:$0xe] }
  0xdc   : > { %4481 = vmatmul.msk.bf16.gmra.mxu1 %vm307_vm1, %v958_v12  ;;  %4514 = vmatmul.msk.bf16.gmra.mxu2 %vm307_vm1, %v1359_v22  ;;  %v786_v12 = vshrl.u32 %v5775_v0, 16  ;;  %v1271_v22 = vsel %vm5371_vm7, %v4498_v54, %v1270_v60  ;;  %v2127_v60 = vshll.u32 %v4666_v16, 16  ;;  %v2131_v54 = vshrl.u32 %v4666_v16, 16 }
  0xdd   : > { %4627 = vmatmul.msk.bf16.gmra.mxu3 %vm307_vm1, %v5005_v23  ;;  %4692 = vmatmul.msk.bf16.gmra.mxu0 %vm307_vm1, %v2303_v32  ;;  %v775_v23 = vrot.slane %v773_v31, 4  ;;  %v778_v32 = vrot.slane %v776_v47, 5  ;;  %v2281_v18 = vunpack.c.l.b16 %v2106_v56  ;;  %v2282_v31 = vunpack.c.l.b16 %v2116_v48 }
  0xde   : > { %v788_v63 = vrot.slane %v786_v12, 4  ;;  %v2120_v15 = vrot.slane %v2118_v50, 4  ;;  %v2123_v14 = vrot.slane %v2121_v11, 5  ;;  %v5807_v16 = vrot.slane %v2127_v60, 5  ;;  %v5006_v50 = vld [vmem:[%s5307_s19 + $0x78] sm:$0xff] }
  0xdf   : > { %v1427_v17 = vpop.f32.mrf.mxu2  ;;  %v779_v47 = vor.u32 %v778_v32, %v775_v23  ;;  %v2304_v48 = vpack.c.b16 %v2282_v31, %v2281_v18  ;;  %v1277_v32 = vrot.slane %v5775_v0, 5  ;;  %v794_v11 = vrot.slane %v792_v58, 5  ;;  %v514_v0 = vld [vmem:[%s5307_s19 + $0x84] sm:$0xf]  ;;  %v5826_v18 = vld [vmem:[%s5307_s19 + $0x88] sm:$0xf] }
  0xe0   : > { %v1507_v38 = vadd.f32 %v1427_v17, %v1106_v59  ;;  %v1717_v36 = vpop.f32.mrf.mxu3  ;;  %v936_v59 = vunpack.c.l.b16 %v761_v1  ;;  %v1337_v17 = vunpack.c.l.b16 %v1271_v22  ;;  %v789_v9 = vor.u32 %v788_v63, %v5804_v45  ;;  %v4668_v31 = vld [vmem:[%s5307_s19 + $0x90] sm:$0xf] }
  0xe1   : > { %v1028_v30 = vpop.f32.mrf.mxu1  ;;  %v451_v1 = vadd.f32 %v5523_v19, %v5594_v44  ;;  %v780_v23 = vrot.slane %v779_v47, 4  ;;  %v2124_v60 = vor.u32 %v2123_v14, %v2120_v15  ;;  %v1279_v58 = vrot.slane %v1277_v32, 4 }
  0xe2   : > { %v1797_v41 = vadd.f32 %v1717_v36, %v1507_v38  ;;  %v1107_v33 = vadd.f32 %v1028_v30, %v450_v8  ;;  %v2373_v49 = vpop.f32.mrf.mxu0  ;;  %v2133_v8 = vrot.slane %v2131_v54, 4  ;;  %v4667_v38 = vld [vmem:[%s5307_s19 + $0x8c] sm:$0x1]  ;;  %v959_v27 = vpack.c.b16 %v937_v13, %v936_v59 }
  0xe3   : > { %v1360_v22 = vpack.c.b16 %v1338_v6, %v1337_v17  ;;  %v2137_v44 = vshll.u32 %v4667_v38, 16  ;;  %v4499_v17 = vrot.slane %v1148_v4, 9  ;;  %v452_v6 = vadd.f32 %v5523_v19, %v5630_v21 }
  0xe4   : > { %v2134_v54 = vor.u32 %v2133_v8, %v5807_v16  ;;  %v1280_v14 = vrot.slane %v5802_v55, 5  ;;  %v5830_v47 = vadd.f32 %v5772_v29, %v1797_v41  ;;  %v785_v21 = vsel %vm5365_vm6, %v780_v23, %v5804_v45  ;;  %v4669_v55 = vld [vmem:[%s5307_s19 + $0x94] sm:$0xf] }
  0xe5   : > { %v2125_v8 = vrot.slane %v2124_v60, 4  ;;  %v2139_v38 = vrot.slane %v2137_v44, 5  ;;  %v1278_v29 = vsel %vm5371_vm7, %v4499_v17, %v1277_v32  ;;  %v797_v41 = vshrl.u32 %v514_v0, 16 }
  0xe6   : > { %v2142_v4 = vshrl.u32 %v4668_v31, 16  ;;  %v2151_v23 = vshll.u32 %v4669_v55, 16  ;;  %v1281_v32 = vsel %vm5371_vm7, %v1279_v58, %v1280_v14  ;;  %v516_v14 = vld [vmem:[%s5307_s19 + $0x8c] sm:$0x1] }
  0xe7   : > { %v1429_v12 = vpop.f32.mrf.mxu2  ;;  %v2130_v60 = vsel %vm5365_vm6, %v2125_v8, %v5807_v16  ;;  %v1340_v58 = vunpack.c.l.b16 %v1281_v32 }
  0xe8   : > { %v1508_v56 = vadd.f32 %v1429_v12, %v1107_v33  ;;  %v1719_v36 = vpop.f32.mrf.mxu3  ;;  %v790_v33 = vrot.slane %v789_v9, 4  ;;  %v2135_v9 = vrot.slane %v2134_v54, 4  ;;  %v2283_v8 = vunpack.c.l.b16 %v2130_v60  ;;  %v5007_v60 = vld [vmem:[%s5307_s19 + $0x84] sm:$0xff] }
  0xe9   : > { %v1031_v30 = vpop.f32.mrf.mxu1 }
  0xea   : > { %v1798_v63 = vadd.f32 %v1719_v36, %v1508_v56  ;;  %v1108_v59 = vadd.f32 %v1031_v30, %v451_v1  ;;  %v5817_v13 = vpop.f32.mrf.mxu0  ;;  %v795_v1 = vsel %vm5365_vm6, %v790_v33, %v794_v11  ;;  %v2145_v56 = vshll.u32 %v4668_v31, 16 }
  0xeb   : > { %v2155_v30 = vshrl.u32 %v4669_v55, 16  ;;  %v939_v11 = vunpack.c.l.b16 %v795_v1  ;;  %v2140_v54 = vsel %vm5365_vm6, %v2135_v9, %v2139_v38  ;;  %v799_v33 = vrot.slane %v797_v41, 4  ;;  %v4670_v38 = vld [vmem:[%s5307_s19 + $0x98] sm:$0x1] }
  0xec   : > { %4482 = vmatmul.msk.bf16.gmra.mxu1 %vm307_vm1, %v959_v27  ;;  %4515 = vmatmul.msk.bf16.gmra.mxu2 %vm307_vm1, %v1360_v22  ;;  %v5832_v15 = vadd.f32 %v2373_v49, %v1798_v63  ;;  %v800_v49 = vshll.u32 %v514_v0, 16  ;;  %v806_v27 = vshll.u32 %v5826_v18, 16  ;;  %v810_v22 = vshrl.u32 %v5826_v18, 16 }
  0xed   : > { %4628 = vmatmul.msk.bf16.gmra.mxu3 %vm307_vm1, %v5006_v50  ;;  %4693 = vmatmul.msk.bf16.gmra.mxu0 %vm307_vm1, %v2304_v48  ;;  %v938_v48 = vunpack.c.l.b16 %v785_v21  ;;  %v2144_v21 = vrot.slane %v2142_v4, 4  ;;  %v2147_v55 = vrot.slane %v2145_v56, 5  ;;  %v1339_v1 = vunpack.c.l.b16 %v1278_v29 }
  0xee   : > { %6789 = vst [vmem:[#allocation11_spill] sm:$0xff] %v5832_v15  ;;  %v802_v17 = vrot.slane %v800_v49, 5  ;;  %v5853_v0 = vrot.slane %v806_v27, 5  ;;  %v812_v31 = vrot.slane %v810_v22, 4  ;;  %v5857_v15 = vrot.slane %v2151_v23, 5 }
  0xef   : > { %v1432_v12 = vpop.f32.mrf.mxu2  ;;  %v2157_v16 = vrot.slane %v2155_v30, 4  ;;  %v2284_v9 = vunpack.c.l.b16 %v2140_v54  ;;  %v453_v41 = vadd.f32 %v5523_v19, %v5655_v7  ;;  %v960_v49 = vpack.c.b16 %v939_v11, %v938_v48 }
  0xf0   : > { %v1509_v45 = vadd.f32 %v1432_v12, %v1108_v59  ;;  %v1722_v36 = vpop.f32.mrf.mxu3  ;;  %v1149_v12 = vld [vmem:[%s5307_s19 + $0x84] sm:$0xe]  ;;  %v803_v27 = vor.u32 %v802_v17, %v799_v33  ;;  %v813_v29 = vor.u32 %v812_v31, %v5853_v0  ;;  %v816_v4 = vshll.u32 %v516_v14, 16 }
  0xf1   : > { %v1033_v50 = vpop.f32.mrf.mxu1  ;;  %v4500_v56 = vrot.slane %v1149_v12, 9  ;;  %v1361_v30 = vpack.c.b16 %v1340_v58, %v1339_v1  ;;  %v2305_v54 = vpack.c.b16 %v2284_v9, %v2283_v8  ;;  %v1287_v48 = vrot.slane %v516_v14, 5  ;;  %v517_v1 = vld [vmem:[%s5307_s19 + $0x90] sm:$0xf] }
  0xf2   : > { %v1799_v44 = vadd.f32 %v1722_v36, %v1509_v45  ;;  %v1109_v63 = vadd.f32 %v1033_v50, %v452_v6  ;;  %v2378_v59 = vpop.f32.mrf.mxu0  ;;  %v1284_v6 = vrot.slane %v5826_v18, 5  ;;  %v2148_v45 = vor.u32 %v2147_v55, %v2144_v21 }
  0xf3   : > { %v2158_v50 = vor.u32 %v2157_v16, %v5857_v15  ;;  %v2161_v18 = vshll.u32 %v4670_v38, 16  ;;  %v804_v31 = vrot.slane %v803_v27, 4  ;;  %v814_v12 = vrot.slane %v813_v29, 4  ;;  %v5874_v16 = vld [vmem:[%s5307_s19 + $0x94] sm:$0xf] }
  0xf4   : > { %v1286_v7 = vrot.slane %v1284_v6, 4  ;;  %v818_v21 = vrot.slane %v816_v4, 5  ;;  %v2149_v55 = vrot.slane %v2148_v45, 4  ;;  %v5877_v8 = vadd.f32 %v5817_v13, %v1799_v44  ;;  %v4671_v13 = vld [vmem:[%s5307_s19 + $0x9c] sm:$0xf] }
  0xf5   : > { %v2159_v58 = vrot.slane %v2158_v50, 4  ;;  %v2163_v14 = vrot.slane %v2161_v18, 5  ;;  %v454_v38 = vadd.f32 %v5523_v19, %v5692_v53  ;;  %v824_v27 = vshll.u32 %v517_v1, 16  ;;  %v4672_v44 = vld [vmem:[%s5307_s19 + $0xa0] sm:$0xf] }
  0xf6   : > { %v830_v4 = vshll.u32 %v5874_v16, 16  ;;  %v2154_v53 = vsel %vm5365_vm6, %v2149_v55, %v5857_v15  ;;  %v2169_v50 = vshll.u32 %v4671_v13, 16  ;;  %v2175_v18 = vshll.u32 %v4672_v44, 16  ;;  %v519_v55 = vld [vmem:[%s5307_s19 + $0x98] sm:$0x1] }
  0xf7   : > { %v1434_v22 = vpop.f32.mrf.mxu2 }
  0xf8   : > { %v1510_v36 = vadd.f32 %v1434_v22, %v1109_v63  ;;  %v1724_v23 = vpop.f32.mrf.mxu3  ;;  %v1285_v63 = vsel %vm5371_vm7, %v4500_v56, %v1284_v6  ;;  %v1288_v6 = vsel %vm5371_vm7, %v1286_v7, %v1287_v48  ;;  %v819_v22 = vsel %vm5365_vm6, %v814_v12, %v818_v21 }
  0xf9   : > { %v1036_v32 = vpop.f32.mrf.mxu1  ;;  %v1341_v29 = vunpack.c.l.b16 %v1285_v63  ;;  %v834_v56 = vshrl.u32 %v5874_v16, 16  ;;  %v1342_v19 = vunpack.c.l.b16 %v1288_v6  ;;  %v5901_v12 = vrot.slane %v830_v4, 5 }
  0xfa   : > { %v1800_v11 = vadd.f32 %v1724_v23, %v1510_v36  ;;  %v1110_v33 = vadd.f32 %v1036_v32, %v453_v41  ;;  %v5866_v17 = vpop.f32.mrf.mxu0  ;;  %v809_v41 = vsel %vm5365_vm6, %v804_v31, %v5853_v0  ;;  %v2164_v0 = vsel %vm5365_vm6, %v2159_v58, %v2163_v14  ;;  %v1150_v58 = vld [vmem:[%s5307_s19 + $0x90] sm:$0xe] }
  0xfb   : > { %v2179_v32 = vshrl.u32 %v4672_v44, 16  ;;  %v941_v31 = vunpack.c.l.b16 %v819_v22  ;;  %v836_v15 = vrot.slane %v834_v56, 4  ;;  %v2285_v21 = vunpack.c.l.b16 %v2154_v53  ;;  %v4673_v44 = vld [vmem:[%s5307_s19 + $0xa4] sm:$0x1] }
  0xfc   : > { %4483 = vmatmul.msk.bf16.gmra.mxu1 %vm307_vm1, %v960_v49  ;;  %4516 = vmatmul.msk.bf16.gmra.mxu2 %vm307_vm1, %v1361_v30  ;;  %v5879_v9 = vadd.f32 %v2378_v59, %v1800_v11  ;;  %v821_v49 = vshrl.u32 %v517_v1, 16  ;;  %v2166_v30 = vshrl.u32 %v4671_v13, 16  ;;  %v826_v11 = vrot.slane %v824_v27, 5 }
  0xfd   : > { %4629 = vmatmul.msk.bf16.gmra.mxu3 %vm307_vm1, %v5007_v60  ;;  %4694 = vmatmul.msk.bf16.gmra.mxu0 %vm307_vm1, %v2305_v54  ;;  %v2286_v63 = vunpack.c.l.b16 %v2164_v0  ;;  %v1291_v1 = vrot.slane %v5874_v16, 5  ;;  %v2171_v6 = vrot.slane %v2169_v50, 5  ;;  %v5906_v13 = vrot.slane %v2175_v18, 5  ;;  %v5008_v50 = vld [vmem:[%s5307_s19 + $0x90] sm:$0xff] }
  0xfe   : > { %v823_v48 = vrot.slane %v821_v49, 4  ;;  %v2168_v14 = vrot.slane %v2166_v30, 4  ;;  %v1362_v4 = vpack.c.b16 %v1342_v19, %v1341_v29  ;;  %v837_v16 = vor.u32 %v836_v15, %v5901_v12  ;;  %v520_v15 = vld [vmem:[%s5307_s19 + $0x9c] sm:$0xf] }
  0xff   : > { %v1437_v59 = vpop.f32.mrf.mxu2  ;;  %v840_v56 = vshll.u32 %v519_v55, 16  ;;  %v2306_v53 = vpack.c.b16 %v2286_v63, %v2285_v21  ;;  %v4501_v0 = vrot.slane %v1150_v58, 9  ;;  %v1294_v18 = vrot.slane %v519_v55, 5  ;;  %v5924_v63 = vld [vmem:[%s5307_s19 + $0xa0] sm:$0xf] }
 0x100   : > { %v1511_v45 = vadd.f32 %v1437_v59, %v1110_v33  ;;  %v1727_v36 = vpop.f32.mrf.mxu3  ;;  %v940_v33 = vunpack.c.l.b16 %v809_v41  ;;  %v5092_v41 = vld [vmem:[%s6775_s2] ss:$0 sm:$0xff]  ;;  %v827_v27 = vor.u32 %v826_v11, %v823_v48  ;;  %v2185_v48 = vshll.u32 %v4673_v44, 16  ;;  %v4675_v44 = vld [vmem:[%s5307_s19 + $0xac] sm:$0xf] }
 0x101   : > { %v1038_v23 = vpop.f32.mrf.mxu1  ;;  %v455_v49 = vadd.f32 %v5092_v41, %v5711_v46  ;;  %v1292_v21 = vsel %vm5371_vm7, %v4501_v0, %v1291_v1 }
 0x102   : > { %v1801_v60 = vadd.f32 %v1727_v36, %v1511_v45  ;;  %v1111_v54 = vadd.f32 %v1038_v23, %v454_v38  ;;  %v2383_v7 = vpop.f32.mrf.mxu0  ;;  %v2181_v38 = vrot.slane %v2179_v32, 4  ;;  %v961_v22 = vpack.c.b16 %v941_v31, %v940_v33 }
 0x103   : > { %v1293_v23 = vrot.slane %v1291_v1, 4  ;;  %v2172_v32 = vor.u32 %v2171_v6, %v2168_v14  ;;  %v828_v19 = vrot.slane %v827_v27, 4  ;;  %v842_v31 = vrot.slane %v840_v56, 5  ;;  %v4674_v27 = vld [vmem:[%s5307_s19 + $0xa8] sm:$0xf] }
 0x104   : > { %v2182_v46 = vor.u32 %v2181_v38, %v5906_v13  ;;  %v5927_v55 = vadd.f32 %v5866_v17, %v1801_v60  ;;  %v456_v1 = vadd.f32 %v5092_v41, %v5748_v40  ;;  %v845_v60 = vshrl.u32 %v520_v15, 16 }
 0x105   : > { %v1295_v14 = vsel %vm5371_vm7, %v1293_v23, %v1294_v18  ;;  %v2173_v6 = vrot.slane %v2172_v32, 4  ;;  %v833_v17 = vsel %vm5365_vm6, %v828_v19, %v5901_v12  ;;  %v858_v56 = vshrl.u32 %v5924_v63, 16 }
 0x106   : > { %v2183_v38 = vrot.slane %v2182_v46, 4  ;;  %v1344_v40 = vunpack.c.l.b16 %v1295_v14  ;;  %v2190_v41 = vshrl.u32 %v4674_v27, 16 }
 0x107   : > { %v1439_v59 = vpop.f32.mrf.mxu2  ;;  %v2178_v0 = vsel %vm5365_vm6, %v2173_v6, %v5906_v13  ;;  %v1298_v13 = vrot.slane %v5924_v63, 5 }
 0x108   : > { %v1512_v45 = vadd.f32 %v1439_v59, %v1111_v54  ;;  %v1729_v36 = vpop.f32.mrf.mxu3  ;;  %v838_v54 = vrot.slane %v837_v16, 4  ;;  %v854_v16 = vshll.u32 %v5924_v63, 16  ;;  %v2192_v14 = vrot.slane %v2190_v41, 4 }
 0x109   : > { %v1041_v30 = vpop.f32.mrf.mxu1 }
 0x10a   : > { %v1802_v11 = vadd.f32 %v1729_v36, %v1512_v45  ;;  %v1112_v33 = vadd.f32 %v1041_v30, %v455_v49  ;;  %v5916_v29 = vpop.f32.mrf.mxu0  ;;  %v2187_v49 = vrot.slane %v2185_v48, 5  ;;  %v2199_v30 = vshll.u32 %v4675_v44, 16 }
 0x10b   : > { %v847_v48 = vrot.slane %v845_v60, 4 }
 0x10c   : > { %4484 = vmatmul.msk.bf16.gmra.mxu1 %vm307_vm1, %v961_v22  ;;  %4517 = vmatmul.msk.bf16.gmra.mxu2 %vm307_vm1, %v1362_v4  ;;  %v5929_v58 = vadd.f32 %v2383_v7, %v1802_v11  ;;  %v848_v7 = vshll.u32 %v520_v15, 16  ;;  %v843_v22 = vsel %vm5365_vm6, %v838_v54, %v842_v31  ;;  %v1343_v4 = vunpack.c.l.b16 %v1292_v21  ;;  %v522_v54 = vld [vmem:[%s5307_s19 + $0xa4] sm:$0x1]  ;;  %v1151_v21 = vld [vmem:[%s5307_s19 + $0x9c] sm:$0xe] }
 0x10d   : > { %4630 = vmatmul.msk.bf16.gmra.mxu3 %vm307_vm1, %v5008_v50  ;;  %4695 = vmatmul.msk.bf16.gmra.mxu0 %vm307_vm1, %v2306_v53  ;;  %v2193_v53 = vshll.u32 %v4674_v27, 16  ;;  %v2188_v23 = vsel %vm5365_vm6, %v2183_v38, %v2187_v49  ;;  %v2203_v50 = vshrl.u32 %v4675_v44, 16  ;;  %v943_v19 = vunpack.c.l.b16 %v843_v22  ;;  %v4676_v44 = vld [vmem:[%s5307_s19 + $0xb0] sm:$0x1] }
 0x10e   : > { %v850_v11 = vrot.slane %v848_v7, 5  ;;  %v5951_v31 = vrot.slane %v854_v16, 5  ;;  %v860_v15 = vrot.slane %v858_v56, 4  ;;  %v2287_v38 = vunpack.c.l.b16 %v2178_v0  ;;  %v5009_v0 = vld [vmem:[%s5307_s19 + $0x9c] sm:$0xff] }
 0x10f   : > { %v1442_v59 = vpop.f32.mrf.mxu2  ;;  %v2195_v6 = vrot.slane %v2193_v53, 5  ;;  %v2288_v49 = vunpack.c.l.b16 %v2188_v23  ;;  %v5955_v27 = vrot.slane %v2199_v30, 5  ;;  %v1363_v60 = vpack.c.b16 %v1344_v40, %v1343_v4 }
 0x110   : > { %v1513_v45 = vadd.f32 %v1442_v59, %v1112_v33  ;;  %v1732_v36 = vpop.f32.mrf.mxu3  ;;  %v942_v33 = vunpack.c.l.b16 %v833_v17  ;;  %v851_v7 = vor.u32 %v850_v11, %v847_v48  ;;  %v861_v22 = vor.u32 %v860_v15, %v5951_v31  ;;  %v5968_v15 = vld [vmem:[%s5307_s19 + $0xac] sm:$0xf] }
 0x111   : > { %v1043_v12 = vpop.f32.mrf.mxu1  ;;  %v864_v16 = vshll.u32 %v522_v54, 16  ;;  %v4502_v56 = vrot.slane %v1151_v21, 9  ;;  %v1301_v41 = vrot.slane %v522_v54, 5  ;;  %v2196_v53 = vor.u32 %v2195_v6, %v2192_v14  ;;  %v4677_v14 = vld [vmem:[%s5307_s19 + $0xb4] sm:$0xf] }
 0x112   : > { %v1803_v18 = vadd.f32 %v1732_v36, %v1513_v45  ;;  %v1113_v32 = vadd.f32 %v1043_v12, %v456_v1  ;;  %v2388_v46 = vpop.f32.mrf.mxu0  ;;  %v2205_v1 = vrot.slane %v2203_v50, 4  ;;  %v962_v59 = vpack.c.b16 %v943_v19, %v942_v33  ;;  %v523_v33 = vld [vmem:[%s5307_s19 + $0xa8] sm:$0xf] }
 0x113   : > { %v1300_v36 = vrot.slane %v1298_v13, 4  ;;  %v2307_v23 = vpack.c.b16 %v2288_v49, %v2287_v38  ;;  %v2209_v40 = vshll.u32 %v4676_v44, 16  ;;  %v852_v11 = vrot.slane %v851_v7, 4  ;;  %v4678_v44 = vld [vmem:[%s5307_s19 + $0xb8] sm:$0xf] }
 0x114   : > { %v2206_v4 = vor.u32 %v2205_v1, %v5955_v27  ;;  %v866_v19 = vrot.slane %v864_v16, 5  ;;  %v1299_v54 = vsel %vm5371_vm7, %v4502_v56, %v1298_v13  ;;  %v5976_v6 = vadd.f32 %v5916_v29, %v1803_v18 }
 0x115   : > { %v1302_v21 = vsel %vm5371_vm7, %v1300_v36, %v1301_v41  ;;  %v2211_v49 = vrot.slane %v2209_v40, 5  ;;  %v869_v1 = vshrl.u32 %v523_v33, 16  ;;  %v872_v7 = vshll.u32 %v523_v33, 16 }
 0x116   : > { %v2207_v13 = vrot.slane %v2206_v4, 4  ;;  %v882_v29 = vshrl.u32 %v5968_v15, 16  ;;  %v2217_v16 = vshll.u32 %v4677_v14, 16  ;;  %v2223_v36 = vshll.u32 %v4678_v44, 16 }
 0x117   : > { %v1444_v17 = vpop.f32.mrf.mxu2  ;;  %v2227_v41 = vshrl.u32 %v4678_v44, 16 }
 0x118   : > { %v1514_v45 = vadd.f32 %v1444_v17, %v1113_v32  ;;  %v1734_v63 = vpop.f32.mrf.mxu3  ;;  %v862_v32 = vrot.slane %v861_v22, 4  ;;  %v878_v17 = vshll.u32 %v5968_v15, 16  ;;  %v2214_v22 = vshrl.u32 %v4677_v14, 16 }
 0x119   : > { %v1046_v12 = vpop.f32.mrf.mxu1  ;;  %v884_v33 = vrot.slane %v882_v29, 4  ;;  %v6001_v14 = vrot.slane %v2223_v36, 5 }
 0x11a   : > { %v1804_v30 = vadd.f32 %v1734_v63, %v1514_v45  ;;  %v1114_v50 = vadd.f32 %v1046_v12, %v5534_v35  ;;  %v5962_v48 = vpop.f32.mrf.mxu0  ;;  %v2197_v35 = vrot.slane %v2196_v53, 4  ;;  %v1346_v63 = vunpack.c.l.b16 %v1302_v21 }
 0x11b   : > { %v2212_v12 = vsel %vm5365_vm6, %v2207_v13, %v2211_v49  ;;  %v2229_v13 = vrot.slane %v2227_v41, 4 }
 0x11c   : > { %4485 = vmatmul.msk.bf16.gmra.mxu1 %vm307_vm1, %v962_v59  ;;  %4518 = vmatmul.msk.bf16.gmra.mxu2 %vm307_vm1, %v1363_v60  ;;  %v5978_v38 = vadd.f32 %v2388_v46, %v1804_v30  ;;  %v857_v60 = vsel %vm5365_vm6, %v852_v11, %v5951_v31  ;;  %v867_v46 = vsel %vm5365_vm6, %v862_v32, %v866_v19  ;;  %v1345_v59 = vunpack.c.l.b16 %v1299_v54 }
 0x11d   : > { %4631 = vmatmul.msk.bf16.gmra.mxu3 %vm307_vm1, %v5009_v0  ;;  %4696 = vmatmul.msk.bf16.gmra.mxu0 %vm307_vm1, %v2307_v23  ;;  %v2202_v31 = vsel %vm5365_vm6, %v2197_v35, %v5955_v27  ;;  %v871_v0 = vrot.slane %v869_v1, 4  ;;  %v874_v23 = vrot.slane %v872_v7, 5  ;;  %v5997_v11 = vrot.slane %v878_v17, 5  ;;  %v1152_v35 = vld [vmem:[%s5307_s19 + $0xa8] sm:$0xe] }
 0x11e   : > { %6790 = vst [vmem:[#allocation12_spill] sm:$0xff] %v5978_v38  ;;  %v1305_v32 = vrot.slane %v5968_v15, 5  ;;  %v2216_v19 = vrot.slane %v2214_v22, 4  ;;  %v2219_v54 = vrot.slane %v2217_v16, 5  ;;  %v944_v21 = vunpack.c.l.b16 %v857_v60 }
 0x11f   : > { %v1447_v18 = vpop.f32.mrf.mxu2  ;;  %v945_v27 = vunpack.c.l.b16 %v867_v46  ;;  %v2289_v49 = vunpack.c.l.b16 %v2202_v31  ;;  %v2290_v1 = vunpack.c.l.b16 %v2212_v12  ;;  %v1364_v44 = vpack.c.b16 %v1346_v63, %v1345_v59  ;;  %v5010_v31 = vld [vmem:[%s5307_s19 + $0xa8] sm:$0xff] }
 0x120   : > { %v1515_v56 = vadd.f32 %v1447_v18, %v1114_v50  ;;  %v1737_v45 = vpop.f32.mrf.mxu3  ;;  %v525_v50 = vld [vmem:[%s5307_s19 + $0xb0] sm:$0x1]  ;;  %v875_v18 = vor.u32 %v874_v23, %v871_v0  ;;  %v885_v17 = vor.u32 %v884_v33, %v5997_v11  ;;  %v1307_v15 = vrot.slane %v1305_v32, 4 }
 0x121   : > { %v1048_v53 = vpop.f32.mrf.mxu1  ;;  %v888_v7 = vshll.u32 %v525_v50, 16  ;;  %v1308_v22 = vrot.slane %v525_v50, 5  ;;  %v2220_v16 = vor.u32 %v2219_v54, %v2216_v19  ;;  %v2230_v36 = vor.u32 %v2229_v13, %v6001_v14  ;;  %v5093_v13 = vld [vmem:[%s5307_s19 + $0x10] sm:$0xf] }
 0x122   : > { %v1805_v4 = vadd.f32 %v1737_v45, %v1515_v56  ;;  %v1115_v40 = vadd.f32 %v1048_v53, %v5569_v3  ;;  %v2393_v30 = vpop.f32.mrf.mxu0  ;;  %v4679_v3 = vld [vmem:[%s5307_s19 + $0xbc] sm:$0x1]  ;;  %v4503_v56 = vrot.slane %v1152_v35, 9  ;;  %v963_v45 = vpack.c.b16 %v945_v27, %v944_v21 }
 0x123   : > { %v2233_v41 = vshll.u32 %v4679_v3, 16  ;;  %v2308_v12 = vpack.c.b16 %v2290_v1, %v2289_v49  ;;  %v890_v38 = vrot.slane %v888_v7, 5  ;;  %v876_v23 = vrot.slane %v875_v18, 4  ;;  %v6024_v49 = vld [vmem:[%s5307_s19 + $0xb8] sm:$0xf] }
 0x124   : > { %v886_v50 = vrot.slane %v885_v17, 4  ;;  %v1309_v33 = vsel %vm5371_vm7, %v1307_v15, %v1308_v22  ;;  %v2221_v19 = vrot.slane %v2220_v16, 4  ;;  %v2231_v54 = vrot.slane %v2230_v36, 4  ;;  %v5094_v1 = vld [vmem:[%s5307_s19 + $0x14] sm:$0x1] }
 0x125   : > { %v2235_v21 = vrot.slane %v2233_v41, 5  ;;  %v6016_v27 = vadd.f32 %v5962_v48, %v1805_v4  ;;  %v2552_v7 = vrot.slane %v5094_v1, 5  ;;  %v881_v3 = vsel %vm5365_vm6, %v876_v23, %v5997_v11  ;;  %v4681_v15 = vld [vmem:[%s5307_s19 + $0xc4] sm:$0xf] }
 0x126   : > { %v891_v48 = vsel %vm5365_vm6, %v886_v50, %v890_v38  ;;  %v1348_v18 = vunpack.c.l.b16 %v1309_v33  ;;  %v2226_v17 = vsel %vm5365_vm6, %v2221_v19, %v6001_v14  ;;  %v902_v11 = vshll.u32 %v6024_v49, 16 }
 0x127   : > { %v1449_v29 = vpop.f32.mrf.mxu2  ;;  %v906_v38 = vshrl.u32 %v6024_v49, 16  ;;  %v947_v36 = vunpack.c.l.b16 %v891_v48  ;;  %v2291_v23 = vunpack.c.l.b16 %v2226_v17  ;;  %v4700_v48 = vld [vmem:[%s5307_s19 + $0xc] sm:$0xe] }
 0x128   : > { %v1516_v60 = vadd.f32 %v1449_v29, %v1115_v40  ;;  %v1739_v46 = vpop.f32.mrf.mxu3  ;;  %v1306_v40 = vsel %vm5371_vm7, %v4503_v56, %v1305_v32  ;;  %v2549_v32 = vrot.slane %v5093_v13, 5 }
 0x129   : > { %v1051_v53 = vpop.f32.mrf.mxu1  ;;  %v1347_v4 = vunpack.c.l.b16 %v1306_v40 }
 0x12a   : > { %v1806_v59 = vadd.f32 %v1739_v46, %v1516_v60  ;;  %v1116_v63 = vadd.f32 %v1051_v53, %v5592_v43  ;;  %v2396_v0 = vpop.f32.mrf.mxu0  ;;  %v526_v43 = vld [vmem:[%s5307_s19 + $0xb4] sm:$0xf]  ;;  %v2236_v60 = vsel %vm5365_vm6, %v2231_v54, %v2235_v21  ;;  %v2551_v19 = vrot.slane %v2549_v32, 4  ;;  %v6043_v54 = vld [vmem:[%s5307_s19 + $0xbc] sm:$0x1] }
 0x12b   : > { %v893_v29 = vshrl.u32 %v526_v43, 16  ;;  %v896_v56 = vshll.u32 %v526_v43, 16  ;;  %v2292_v50 = vunpack.c.l.b16 %v2236_v60  ;;  %v6045_v21 = vrot.slane %v902_v11, 5 }
 0x12c   : > { %4486 = vmatmul.msk.bf16.gmra.mxu1 %vm307_vm1, %v963_v45  ;;  %4519 = vmatmul.msk.bf16.gmra.mxu2 %vm307_vm1, %v1364_v44  ;;  %v6018_v35 = vadd.f32 %v2393_v30, %v1806_v59  ;;  %v4680_v30 = vld [vmem:[%s5307_s19 + $0xc0] sm:$0xf]  ;;  %v946_v45 = vunpack.c.l.b16 %v881_v3  ;;  %v2247_v59 = vshll.u32 %v4681_v15, 16  ;;  %v908_v43 = vrot.slane %v906_v38, 4 }
 0x12d   : > { %4632 = vmatmul.msk.bf16.gmra.mxu3 %vm307_vm1, %v5010_v31  ;;  %4697 = vmatmul.msk.bf16.gmra.mxu0 %vm307_vm1, %v2308_v12  ;;  %v2238_v41 = vshrl.u32 %v4680_v30, 16  ;;  %v2241_v53 = vshll.u32 %v4680_v30, 16  ;;  %v895_v40 = vrot.slane %v893_v29, 4  ;;  %v898_v33 = vrot.slane %v896_v56, 5 }
 0x12e   : > { %v1365_v1 = vpack.c.b16 %v1348_v18, %v1347_v4  ;;  %v964_v30 = vpack.c.b16 %v947_v36, %v946_v45  ;;  %v6051_v17 = vrot.slane %v2247_v59, 5  ;;  %v4716_v56 = vrot.slane %v4700_v48, 9 }
 0x12f   : > { %v1452_v44 = vpop.f32.mrf.mxu2  ;;  %v2243_v3 = vrot.slane %v2241_v53, 5  ;;  %v912_v60 = vshll.u32 %v6043_v54, 16  ;;  %v1312_v11 = vrot.slane %v6024_v49, 5  ;;  %v909_v18 = vor.u32 %v908_v43, %v6045_v21 }
 0x130   : > { %v1517_v22 = vadd.f32 %v1452_v44, %v1116_v63  ;;  %v1742_v16 = vpop.f32.mrf.mxu3  ;;  %v2251_v63 = vshrl.u32 %v4681_v15, 16  ;;  %v1153_v44 = vld [vmem:[%s5307_s19 + $0xb4] sm:$0xe]  ;;  %v2553_v45 = vsel %vm5371_vm7, %v2551_v19, %v2552_v7  ;;  %v4862_v7 = vld [vmem:[%s5307_s19 + $0x18] sm:$0xf]  ;;  %v1315_v48 = vrot.slane %v6043_v54, 5 }
 0x131   : > { %v1053_v46 = vpop.f32.mrf.mxu1  ;;  %v4504_v53 = vrot.slane %v1153_v44, 9  ;;  %v6070_v19 = vld [vmem:[%s5307_s19 + $0x1c] sm:$0xf] }
 0x132   : > { %v1807_v31 = vadd.f32 %v1742_v16, %v1517_v22  ;;  %v1117_v14 = vadd.f32 %v1053_v46, %v5628_v20  ;;  %v2398_v12 = vpop.f32.mrf.mxu0  ;;  %v2240_v20 = vrot.slane %v2238_v41, 4  ;;  %v2253_v29 = vrot.slane %v2251_v63, 4  ;;  %v5011_v41 = vld [vmem:[%s5307_s19 + $0xb4] sm:$0xff] }
 0x133   : > { %v2309_v22 = vpack.c.b16 %v2292_v50, %v2291_v23  ;;  %v899_v16 = vor.u32 %v898_v33, %v895_v40  ;;  %v2550_v46 = vsel %vm5371_vm7, %v4716_v56, %v2549_v32  ;;  %v2662_v63 = vunpack.c.l.b16 %v2553_v45 }
 0x134   : > { %v6047_v13 = vadd.f32 %v2396_v0, %v1807_v31  ;;  %v4682_v0 = vld [vmem:[%s5307_s19 + $0xc8] sm:$0x1]  ;;  %v2244_v31 = vor.u32 %v2243_v3, %v2240_v20  ;;  %v2661_v59 = vunpack.c.l.b16 %v2550_v46  ;;  %v2254_v50 = vor.u32 %v2253_v29, %v6051_v17 }
 0x135   : > { %v2257_v40 = vshll.u32 %v4682_v0, 16  ;;  %v914_v32 = vrot.slane %v912_v60, 5  ;;  %v910_v20 = vrot.slane %v909_v18, 4  ;;  %v1314_v3 = vrot.slane %v1312_v11, 4 }
 0x136   : > { %v6064_v33 = vpack.c.b16 %v2662_v63, %v2661_v59  ;;  %v2245_v44 = vrot.slane %v2244_v31, 4  ;;  %v3223_v60 = vshll.u32 %v4862_v7, 16  ;;  %v3233_v0 = vshrl.u32 %v6070_v19, 16 }
 0x137   : > { %v1454_v15 = vpop.f32.mrf.mxu2  ;;  %v2259_v29 = vrot.slane %v2257_v40, 5  ;;  %v4864_v40 = vld [vmem:[%s5307_s19 + $0x20] sm:$0x1] }
 0x138   : > { %v1518_v38 = vadd.f32 %v1454_v15, %v1117_v14  ;;  %v1744_v4 = vpop.f32.mrf.mxu3  ;;  %v3220_v15 = vshrl.u32 %v4862_v7, 16  ;;  %v3225_v31 = vrot.slane %v3223_v60, 5  ;;  %v3235_v63 = vrot.slane %v3233_v0, 4 }
 0x139   : > { %v1056_v36 = vpop.f32.mrf.mxu1 }
 0x13a   : > { %v1808_v49 = vadd.f32 %v1744_v4, %v1518_v38  ;;  %v1118_v14 = vadd.f32 %v1056_v36, %v5653_v2  ;;  %v2401_v23 = vpop.f32.mrf.mxu0  ;;  %v900_v2 = vrot.slane %v899_v16, 4  ;;  %v1316_v4 = vsel %vm5371_vm7, %v1314_v3, %v1315_v48 }
 0x13b   : > { %v3239_v3 = vshll.u32 %v4864_v40, 16 }
 0x13c   : > { %4487 = vmatmul.msk.bf16.gmra.mxu1 %vm307_vm1, %v964_v30  ;;  %4520 = vmatmul.msk.bf16.gmra.mxu2 %vm307_vm1, %v1365_v1  ;;  %v6072_v43 = vadd.f32 %v2398_v12, %v1808_v49  ;;  %v1313_v30 = vsel %vm5371_vm7, %v4504_v53, %v1312_v11  ;;  %v2255_v1 = vrot.slane %v2254_v50, 4  ;;  %v3229_v12 = vshll.u32 %v6070_v19, 16 }
 0x13d   : > { %4633 = vmatmul.msk.bf16.gmra.mxu3 %vm307_vm1, %v5011_v41  ;;  %4698 = vmatmul.msk.bf16.gmra.mxu0 %vm307_vm1, %v2309_v22  ;;  %v905_v54 = vsel %vm5365_vm6, %v900_v2, %v6045_v21  ;;  %v915_v11 = vsel %vm5365_vm6, %v910_v20, %v914_v32  ;;  %v1349_v18 = vunpack.c.l.b16 %v1313_v30  ;;  %v2250_v41 = vsel %vm5365_vm6, %v2245_v44, %v6051_v17 }
 0x13e   : > { %v2260_v53 = vsel %vm5365_vm6, %v2255_v1, %v2259_v29  ;;  %v3222_v21 = vrot.slane %v3220_v15, 4  ;;  %v3231_v59 = vrot.slane %v3229_v12, 5  ;;  %v948_v49 = vunpack.c.l.b16 %v905_v54  ;;  %v5012_v15 = vld [vmem:[%s5307_s19 + $0xc0] sm:$0xff]  ;;  %v4927_v12 = vld [vmem:[%s5307_s19 + $0x18] sm:$0xe] }
 0x13f   : > { %v1457_v56 = vpop.f32.mrf.mxu2  ;;  %v1350_v50 = vunpack.c.l.b16 %v1316_v4  ;;  %v2294_v7 = vunpack.c.l.b16 %v2260_v53  ;;  %v3891_v29 = vrot.slane %v6070_v19, 5  ;;  %v3241_v54 = vrot.slane %v3239_v3, 5 }
 0x140   : > { %v1519_v38 = vadd.f32 %v1457_v56, %v1118_v14  ;;  %v1747_v22 = vpop.f32.mrf.mxu3  ;;  %v949_v14 = vunpack.c.l.b16 %v915_v11  ;;  %v3226_v20 = vor.u32 %v3225_v31, %v3222_v21  ;;  %v3236_v17 = vor.u32 %v3235_v63, %v3231_v59 }
 0x141   : > { %v1058_v16 = vpop.f32.mrf.mxu1  ;;  %v1366_v1 = vpack.c.b16 %v1350_v50, %v1349_v18  ;;  %v4943_v11 = vrot.slane %v4927_v12, 9  ;;  %v3893_v4 = vrot.slane %v3891_v29, 4  ;;  %v3894_v19 = vrot.slane %v4864_v40, 5 }
 0x142   : > { %v1809_v46 = vadd.f32 %v1747_v22, %v1519_v38  ;;  %v1119_v45 = vadd.f32 %v1058_v16, %v5690_v51  ;;  %v2403_v36 = vpop.f32.mrf.mxu0  ;;  %v2293_v51 = vunpack.c.l.b16 %v2250_v41  ;;  %v965_v44 = vpack.c.b16 %v949_v14, %v948_v49 }
 0x143   : > { %v3227_v22 = vrot.slane %v3226_v20, 4  ;;  %v3237_v16 = vrot.slane %v3236_v17, 4  ;;  %v3895_v63 = vsel %vm5371_vm7, %v3893_v4, %v3894_v19 }
 0x144   : > { %v6095_v32 = vadd.f32 %v2401_v23, %v1809_v46  ;;  %v2310_v60 = vpack.c.b16 %v2294_v7, %v2293_v51  ;;  %v4865_v46 = vld [vmem:[%s5307_s19 + $0x24] sm:$0xf] }
 0x145   : > { %v3232_v41 = vsel %vm5365_vm6, %v3227_v22, %v3231_v59  ;;  %v3242_v31 = vsel %vm5365_vm6, %v3237_v16, %v3241_v54  ;;  %v3244_v14 = vshrl.u32 %v4865_v46, 16  ;;  %v3247_v50 = vshll.u32 %v4865_v46, 16  ;;  %v4701_v54 = vld [vmem:[%s5307_s19 + $0x18] sm:$0xe] }
 0x146   : > { %v3605_v20 = vunpack.c.l.b16 %v3232_v41  ;;  %v3606_v17 = vunpack.c.l.b16 %v3242_v31  ;;  %v4928_v31 = vld [vmem:[%s5307_s19 + $0x24] sm:$0xe] }
 0x147   : > { %v1459_v2 = vpop.f32.mrf.mxu2 }
 0x148   : > { %v1520_v48 = vadd.f32 %v1459_v2, %v1119_v45  ;;  %v1749_v30 = vpop.f32.mrf.mxu3  ;;  %v6109_v45 = vld [vmem:[%s5307_s19 + $0x28] sm:$0xf] }
 0x149   : > { %v1061_v56 = vpop.f32.mrf.mxu1  ;;  %v3253_v40 = vshll.u32 %v6109_v45, 16  ;;  %v3257_v51 = vshrl.u32 %v6109_v45, 16 }
 0x14a   : > { %v1810_v23 = vadd.f32 %v1749_v30, %v1520_v48  ;;  %v1120_v0 = vadd.f32 %v1061_v56, %v5709_v34  ;;  %v2406_v38 = vpop.f32.mrf.mxu0  ;;  %v4004_v48 = vunpack.c.l.b16 %v3895_v63 }
 0x14b   : > { %v3259_v56 = vrot.slane %v3257_v51, 4 }
 0x14c   : > { %4488 = vmatmul.msk.bf16.gmra.mxu1 %vm307_vm1, %v965_v44  ;;  %4521 = vmatmul.msk.bf16.gmra.mxu2 %vm307_vm1, %v1366_v1  ;;  %v6103_v18 = vadd.f32 %v2403_v36, %v1810_v23  ;;  %v3892_v36 = vsel %vm5371_vm7, %v4943_v11, %v3891_v29  ;;  %v3246_v44 = vrot.slane %v3244_v14, 4  ;;  %v3249_v1 = vrot.slane %v3247_v50, 5  ;;  %v5095_v11 = vld [vmem:[%s5307_s19 + $0x1c] sm:$0xf]  ;;  %v4868_v14 = vld [vmem:[%s5307_s19 + $0x30] sm:$0xf] }
 0x14d   : > { %4634 = vmatmul.msk.bf16.gmra.mxu3 %vm307_vm1, %v5012_v15  ;;  %4699 = vmatmul.msk.bf16.gmra.mxu0 %vm307_vm1, %v2310_v60  ;;  %v4003_v3 = vunpack.c.l.b16 %v3892_v36  ;;  %v6124_v29 = vrot.slane %v3253_v40, 5  ;;  %v4867_v15 = vld [vmem:[%s5307_s19 + $0x2c] sm:$0x1]  ;;  %v5096_v36 = vld [vmem:[%s5307_s19 + $0x20] sm:$0x1] }
 0x14e   : > { %v3250_v4 = vor.u32 %v3249_v1, %v3246_v44  ;;  %v3263_v46 = vshll.u32 %v4867_v15, 16  ;;  %v2559_v63 = vrot.slane %v5096_v36, 5  ;;  %v6140_v50 = vld [vmem:[%s5307_s19 + $0x34] sm:$0xf] }
 0x14f   : > { %v1462_v34 = vpop.f32.mrf.mxu2  ;;  %v4035_v22 = vpack.c.b16 %v4004_v48, %v4003_v3  ;;  %v3260_v19 = vor.u32 %v3259_v56, %v6124_v29  ;;  %v3268_v3 = vshrl.u32 %v4868_v14, 16  ;;  %v3271_v48 = vshll.u32 %v4868_v14, 16  ;;  %v4702_v14 = vld [vmem:[%s5307_s19 + $0x24] sm:$0xe] }
 0x150   : > { %v1521_v53 = vadd.f32 %v1462_v34, %v1120_v0  ;;  %v1752_v21 = vpop.f32.mrf.mxu3  ;;  %v3637_v0 = vpack.c.b16 %v3606_v17, %v3605_v20  ;;  %v3901_v17 = vrot.slane %v4867_v15, 5  ;;  %v3277_v44 = vshll.u32 %v6140_v50, 16 }
 0x151   : > { %v1063_v49 = vpop.f32.mrf.mxu1  ;;  %v3261_v51 = vrot.slane %v3260_v19, 4  ;;  %v3281_v1 = vshrl.u32 %v6140_v50, 16 }
 0x152   : > { %v1811_v59 = vadd.f32 %v1752_v21, %v1521_v53  ;;  %v1121_v7 = vadd.f32 %v1063_v49, %v5746_v25  ;;  %v2408_v2 = vpop.f32.mrf.mxu0  ;;  %v5013_v25 = vld [vmem:[%s5307_s19 + $0x18] sm:$0xff]  ;;  %v3898_v21 = vrot.slane %v6109_v45, 5  ;;  %v4717_v49 = vrot.slane %v4701_v54, 9 }
 0x153   : > { %v3251_v45 = vrot.slane %v3250_v4, 4  ;;  %v3273_v4 = vrot.slane %v3271_v48, 5  ;;  %v6162_v19 = vrot.slane %v3277_v44, 5 }
 0x154   : > { %v6122_v30 = vadd.f32 %v2406_v38, %v1811_v59  ;;  %v2556_v38 = vrot.slane %v5095_v11, 5  ;;  %v3265_v59 = vrot.slane %v3263_v46, 5  ;;  %v3900_v20 = vrot.slane %v3898_v21, 4 }
 0x155   : > { %v3256_v15 = vsel %vm5365_vm6, %v3251_v45, %v6124_v29  ;;  %v3283_v29 = vrot.slane %v3281_v1, 4 }
 0x156   : > { %v3902_v11 = vsel %vm5371_vm7, %v3900_v20, %v3901_v17 }
 0x157   : > { %v1464_v60 = vpop.f32.mrf.mxu2 }
 0x158   : > { %v1522_v12 = vadd.f32 %v1464_v60, %v1121_v7  ;;  %v1754_v23 = vpop.f32.mrf.mxu3  ;;  %v4944_v7 = vrot.slane %v4928_v31, 9 }
 0x159   : > { %v1066_v16 = vpop.f32.mrf.mxu1 }
 0x15a   : > { %v1812_v34 = vadd.f32 %v1754_v23, %v1522_v12  ;;  %v1122_v41 = vadd.f32 %v1066_v16, %v5561_v57  ;;  %v2411_v53 = vpop.f32.mrf.mxu0  ;;  %v2558_v57 = vrot.slane %v2556_v38, 4  ;;  %v2557_v12 = vsel %vm5371_vm7, %v4717_v49, %v2556_v38 }
 0x15b   : > { %v3899_v54 = vsel %vm5371_vm7, %v4944_v7, %v3898_v21  ;;  %v3270_v38 = vrot.slane %v3268_v3, 4  ;;  %v2663_v46 = vunpack.c.l.b16 %v2557_v12  ;;  %v4006_v49 = vunpack.c.l.b16 %v3902_v11  ;;  %v5014_v3 = vld [vmem:[%s5307_s19 + $0x24] sm:$0xff] }
 0x15c   : > { %4733 = vmatmul.msk.bf16.vlgmr.msra.gmra.mxu1 %vm307_vm1, %v6064_v33  ;;  %4846 = vmatmul.msk.bf16.vlgmr.msra.gmra.mxu2 %vm307_vm1, %v5013_v25  ;;  %v6142_v40 = vadd.f32 %v2408_v2, %v1812_v34  ;;  %v2560_v23 = vsel %vm5371_vm7, %v2558_v57, %v2559_v63  ;;  %v3266_v25 = vsel %vm5365_vm6, %v3261_v51, %v3265_v59  ;;  %v4005_v63 = vunpack.c.l.b16 %v3899_v54  ;;  %v5097_v57 = vld [vmem:[%s5307_s19 + $0x28] sm:$0xf] }
 0x15d   : > { %4911 = vmatmul.msk.bf16.vlgmr.msra.gmra.mxu3 %vm307_vm1, %v3637_v0  ;;  %4960 = vmatmul.msk.bf16.vlgmr.msra.gmra.mxu0 %vm307_vm1, %v4035_v22  ;;  %v2664_v34 = vunpack.c.l.b16 %v2560_v23  ;;  %v3608_v36 = vunpack.c.l.b16 %v3266_v25  ;;  %v2563_v45 = vrot.slane %v5097_v57, 5  ;;  %v3274_v51 = vor.u32 %v3273_v4, %v3270_v38 }
 0x15e   : > { %v3284_v59 = vor.u32 %v3283_v29, %v6162_v19  ;;  %v4036_v1 = vpack.c.b16 %v4006_v49, %v4005_v63  ;;  %v4718_v25 = vrot.slane %v4702_v14, 9 }
 0x15f   : > { %v1467_v33 = vpop.f32.mrf.mxu2 }
 0x160   : > { %v1523_v2 = vadd.f32 %v1467_v33, %v1122_v41  ;;  %v1757_v56 = vpop.f32.mrf.mxu3  ;;  %v4870_v41 = vld [vmem:[%s5307_s19 + $0x38] sm:$0x1]  ;;  %v2694_v33 = vpack.c.b16 %v2664_v34, %v2663_v46  ;;  %v3285_v54 = vrot.slane %v3284_v59, 4  ;;  %v6183_v46 = vld [vmem:[%s5307_s19 + $0x40] sm:$0xf] }
 0x161   : > { %v1068_v60 = vpop.f32.mrf.mxu1  ;;  %v3287_v7 = vshll.u32 %v4870_v41, 16  ;;  %v3908_v4 = vrot.slane %v4870_v41, 5  ;;  %v3301_v59 = vshll.u32 %v6183_v46, 16 }
 0x162   : > { %v1813_v0 = vadd.f32 %v1757_v56, %v1523_v2  ;;  %v1123_v22 = vadd.f32 %v1068_v60, %v5583_v28  ;;  %v2413_v16 = vpop.f32.mrf.mxu0  ;;  %v3607_v28 = vunpack.c.l.b16 %v3256_v15  ;;  %v4929_v2 = vld [vmem:[%s5307_s19 + $0x30] sm:$0xe]  ;;  %v5098_v56 = vld [vmem:[%s5307_s19 + $0x2c] sm:$0x1] }
 0x163   : > { %v2566_v60 = vrot.slane %v5098_v56, 5  ;;  %v3289_v11 = vrot.slane %v3287_v7, 5  ;;  %v3305_v7 = vshrl.u32 %v6183_v46, 16 }
 0x164   : > { %v6165_v31 = vadd.f32 %v2411_v53, %v1813_v0  ;;  %v3905_v53 = vrot.slane %v6140_v50, 5  ;;  %v3638_v44 = vpack.c.b16 %v3608_v36, %v3607_v28  ;;  %v2565_v0 = vrot.slane %v2563_v45, 4 }
 0x165   : > { %v4945_v50 = vrot.slane %v4929_v2, 9  ;;  %v2564_v28 = vsel %vm5371_vm7, %v4718_v25, %v2563_v45  ;;  %v3290_v49 = vsel %vm5365_vm6, %v3285_v54, %v3289_v11  ;;  %v4873_v25 = vld [vmem:[%s5307_s19 + $0x44] sm:$0x1]  ;;  %v5015_v11 = vld [vmem:[%s5307_s19 + $0x30] sm:$0xff] }
 0x166   : > { %v3907_v38 = vrot.slane %v3905_v53, 4  ;;  %v2567_v36 = vsel %vm5371_vm7, %v2565_v0, %v2566_v60 }
 0x167   : > { %v1469_v21 = vpop.f32.mrf.mxu2 }
 0x168   : > { %v1524_v20 = vadd.f32 %v1469_v21, %v1123_v22  ;;  %v1759_v17 = vpop.f32.mrf.mxu3  ;;  %v3275_v22 = vrot.slane %v3274_v51, 4  ;;  %v3906_v21 = vsel %vm5371_vm7, %v4945_v50, %v3905_v53  ;;  %v3909_v14 = vsel %vm5371_vm7, %v3907_v38, %v3908_v4 }
 0x169   : > { %v1071_v48 = vpop.f32.mrf.mxu1  ;;  %v3610_v53 = vunpack.c.l.b16 %v3290_v49 }
 0x16a   : > { %v1814_v12 = vadd.f32 %v1759_v17, %v1524_v20  ;;  %v1124_v23 = vadd.f32 %v1071_v48, %v5615_v61  ;;  %v2416_v15 = vpop.f32.mrf.mxu0  ;;  %v4871_v61 = vld [vmem:[%s5307_s19 + $0x3c] sm:$0xf]  ;;  %v3280_v41 = vsel %vm5365_vm6, %v3275_v22, %v6162_v19 }
 0x16b   : > { %v3292_v45 = vshrl.u32 %v4871_v61, 16  ;;  %v3295_v51 = vshll.u32 %v4871_v61, 16  ;;  %v3609_v48 = vunpack.c.l.b16 %v3280_v41  ;;  %v4703_v61 = vld [vmem:[%s5307_s19 + $0x30] sm:$0xe]  ;;  %v3311_v41 = vshll.u32 %v4873_v25, 16 }
 0x16c   : > { %4734 = vmatmul.msk.bf16.gmra.mxu1 %vm307_vm1, %v2694_v33  ;;  %4847 = vmatmul.msk.bf16.gmra.mxu2 %vm307_vm1, %v5014_v3  ;;  %v6177_v29 = vadd.f32 %v2413_v16, %v1814_v12  ;;  %v2665_v33 = vunpack.c.l.b16 %v2564_v28  ;;  %v2666_v3 = vunpack.c.l.b16 %v2567_v36  ;;  %v6203_v12 = vrot.slane %v3301_v59, 5  ;;  %v4874_v59 = vld [vmem:[%s5307_s19 + $0x48] sm:$0xf] }
 0x16d   : > { %4912 = vmatmul.msk.bf16.gmra.mxu3 %vm307_vm1, %v3638_v44  ;;  %4961 = vmatmul.msk.bf16.gmra.mxu0 %vm307_vm1, %v4036_v1  ;;  %v4007_v44 = vunpack.c.l.b16 %v3906_v21  ;;  %v4008_v1 = vunpack.c.l.b16 %v3909_v14  ;;  %v3294_v56 = vrot.slane %v3292_v45, 4  ;;  %v3297_v60 = vrot.slane %v3295_v51, 5  ;;  %v4930_v14 = vld [vmem:[%s5307_s19 + $0x3c] sm:$0xe] }
 0x16e   : > { %v2695_v54 = vpack.c.b16 %v2666_v3, %v2665_v33  ;;  %v3639_v50 = vpack.c.b16 %v3610_v53, %v3609_v48  ;;  %v3912_v21 = vrot.slane %v6183_v46, 5  ;;  %v4719_v51 = vrot.slane %v4703_v61, 9 }
 0x16f   : > { %v1472_v34 = vpop.f32.mrf.mxu2  ;;  %v4037_v38 = vpack.c.b16 %v4008_v1, %v4007_v44  ;;  %v3298_v28 = vor.u32 %v3297_v60, %v3294_v56  ;;  %v3313_v33 = vrot.slane %v3311_v41, 5  ;;  %v4946_v3 = vrot.slane %v4930_v14, 9 }
 0x170   : > { %v1525_v16 = vadd.f32 %v1472_v34, %v1124_v23  ;;  %v1762_v63 = vpop.f32.mrf.mxu3  ;;  %v3307_v23 = vrot.slane %v3305_v7, 4  ;;  %v6218_v7 = vld [vmem:[%s5307_s19 + $0x4c] sm:$0xf]  ;;  %v3914_v48 = vrot.slane %v3912_v21, 4  ;;  %v3915_v53 = vrot.slane %v4873_v25, 5 }
 0x171   : > { %v1073_v57 = vpop.f32.mrf.mxu1  ;;  %v3316_v1 = vshrl.u32 %v4874_v59, 16  ;;  %v3319_v56 = vshll.u32 %v4874_v59, 16  ;;  %v3325_v60 = vshll.u32 %v6218_v7, 16  ;;  %v3913_v61 = vsel %vm5371_vm7, %v4946_v3, %v3912_v21  ;;  %v4704_v59 = vld [vmem:[%s5307_s19 + $0x3c] sm:$0xe] }
 0x172   : > { %v1815_v19 = vadd.f32 %v1762_v63, %v1525_v16  ;;  %v1125_v20 = vadd.f32 %v1073_v57, %v5642_v52  ;;  %v2418_v17 = vpop.f32.mrf.mxu0  ;;  %v3308_v36 = vor.u32 %v3307_v23, %v6203_v12  ;;  %v5100_v57 = vld [vmem:[%s5307_s19 + $0x38] sm:$0x1]  ;;  %v3329_v23 = vshrl.u32 %v6218_v7, 16 }
 0x173   : > { %v2573_v45 = vrot.slane %v5100_v57, 5 }
 0x174   : > { %v6201_v2 = vadd.f32 %v2416_v15, %v1815_v19  ;;  %v5099_v15 = vld [vmem:[%s5307_s19 + $0x34] sm:$0xf]  ;;  %v3309_v46 = vrot.slane %v3308_v36, 4  ;;  %v6240_v36 = vrot.slane %v3325_v60, 5 }
 0x175   : > { %v2570_v34 = vrot.slane %v5099_v15, 5  ;;  %v3916_v15 = vsel %vm5371_vm7, %v3914_v48, %v3915_v53 }
 0x177   : > { %v1474_v0 = vpop.f32.mrf.mxu2 }
 0x178   : > { %v1526_v52 = vadd.f32 %v1474_v0, %v1125_v20  ;;  %v1764_v22 = vpop.f32.mrf.mxu3  ;;  %v3299_v20 = vrot.slane %v3298_v28, 4  ;;  %v3321_v28 = vrot.slane %v3319_v56, 5 }
 0x179   : > { %v1076_v4 = vpop.f32.mrf.mxu1 }
 0x17a   : > { %v1816_v16 = vadd.f32 %v1764_v22, %v1526_v52  ;;  %v1126_v63 = vadd.f32 %v1076_v4, %v5679_v39  ;;  %v2421_v49 = vpop.f32.mrf.mxu0  ;;  %v2572_v39 = vrot.slane %v2570_v34, 4  ;;  %v2571_v22 = vsel %vm5371_vm7, %v4719_v51, %v2570_v34 }
 0x17b   : > { %v3304_v25 = vsel %vm5365_vm6, %v3299_v20, %v6203_v12  ;;  %v3318_v34 = vrot.slane %v3316_v1, 4  ;;  %v3331_v12 = vrot.slane %v3329_v23, 4  ;;  %v2667_v41 = vunpack.c.l.b16 %v2571_v22  ;;  %v5016_v1 = vld [vmem:[%s5307_s19 + $0x3c] sm:$0xff] }
 0x17c   : > { %4735 = vmatmul.msk.bf16.gmra.mxu1 %vm307_vm1, %v2695_v54  ;;  %4848 = vmatmul.msk.bf16.gmra.mxu2 %vm307_vm1, %v5015_v11  ;;  %v6220_v19 = vadd.f32 %v2418_v17, %v1816_v16  ;;  %v2574_v54 = vsel %vm5371_vm7, %v2572_v39, %v2573_v45  ;;  %v3314_v11 = vsel %vm5365_vm6, %v3309_v46, %v3313_v33  ;;  %v4009_v45 = vunpack.c.l.b16 %v3913_v61  ;;  %v5101_v39 = vld [vmem:[%s5307_s19 + $0x40] sm:$0xf] }
 0x17d   : > { %4913 = vmatmul.msk.bf16.gmra.mxu3 %vm307_vm1, %v3639_v50  ;;  %4962 = vmatmul.msk.bf16.gmra.mxu0 %vm307_vm1, %v4037_v38  ;;  %v2668_v16 = vunpack.c.l.b16 %v2574_v54  ;;  %v3612_v57 = vunpack.c.l.b16 %v3314_v11  ;;  %v4010_v51 = vunpack.c.l.b16 %v3916_v15  ;;  %v2577_v20 = vrot.slane %v5101_v39, 5 }
 0x17e   : > { %v3322_v46 = vor.u32 %v3321_v28, %v3318_v34  ;;  %v3332_v33 = vor.u32 %v3331_v12, %v6240_v36  ;;  %v4720_v11 = vrot.slane %v4704_v59, 9 }
 0x17f   : > { %v1477_v44 = vpop.f32.mrf.mxu2  ;;  %v4038_v23 = vpack.c.b16 %v4010_v51, %v4009_v45 }
 0x180   : > { %v1527_v17 = vadd.f32 %v1477_v44, %v1126_v63  ;;  %v1767_v0 = vpop.f32.mrf.mxu3  ;;  %v4876_v63 = vld [vmem:[%s5307_s19 + $0x50] sm:$0x1]  ;;  %v2696_v44 = vpack.c.b16 %v2668_v16, %v2667_v41  ;;  %v3333_v61 = vrot.slane %v3332_v33, 4  ;;  %v6261_v41 = vld [vmem:[%s5307_s19 + $0x58] sm:$0xf] }
 0x181   : > { %v1078_v52 = vpop.f32.mrf.mxu1  ;;  %v3335_v3 = vshll.u32 %v4876_v63, 16  ;;  %v3922_v28 = vrot.slane %v4876_v63, 5  ;;  %v3349_v33 = vshll.u32 %v6261_v41, 16 }
 0x182   : > { %v1817_v50 = vadd.f32 %v1767_v0, %v1527_v17  ;;  %v1127_v38 = vadd.f32 %v1078_v52, %v5701_v26  ;;  %v2423_v4 = vpop.f32.mrf.mxu0  ;;  %v3611_v26 = vunpack.c.l.b16 %v3304_v25  ;;  %v4931_v17 = vld [vmem:[%s5307_s19 + $0x48] sm:$0xe]  ;;  %v5102_v0 = vld [vmem:[%s5307_s19 + $0x44] sm:$0x1] }
 0x183   : > { %v2580_v52 = vrot.slane %v5102_v0, 5  ;;  %v3337_v15 = vrot.slane %v3335_v3, 5  ;;  %v3353_v3 = vshrl.u32 %v6261_v41, 16 }
 0x184   : > { %v6243_v14 = vadd.f32 %v2421_v49, %v1817_v50  ;;  %v3919_v49 = vrot.slane %v6218_v7, 5  ;;  %v3640_v60 = vpack.c.b16 %v3612_v57, %v3611_v26  ;;  %v2579_v50 = vrot.slane %v2577_v20, 4 }
 0x185   : > { %v4947_v7 = vrot.slane %v4931_v17, 9  ;;  %v2578_v26 = vsel %vm5371_vm7, %v4720_v11, %v2577_v20  ;;  %v3338_v51 = vsel %vm5365_vm6, %v3333_v61, %v3337_v15  ;;  %v4879_v11 = vld [vmem:[%s5307_s19 + $0x5c] sm:$0x1]  ;;  %v5017_v15 = vld [vmem:[%s5307_s19 + $0x48] sm:$0xff] }
 0x186   : > { %v3921_v34 = vrot.slane %v3919_v49, 4  ;;  %v2581_v57 = vsel %vm5371_vm7, %v2579_v50, %v2580_v52 }
 0x187   : > { %v1479_v21 = vpop.f32.mrf.mxu2 }
 0x188   : > { %v1528_v48 = vadd.f32 %v1479_v21, %v1127_v38  ;;  %v1769_v53 = vpop.f32.mrf.mxu3  ;;  %v3323_v38 = vrot.slane %v3322_v46, 4  ;;  %v3920_v21 = vsel %vm5371_vm7, %v4947_v7, %v3919_v49  ;;  %v3923_v59 = vsel %vm5371_vm7, %v3921_v34, %v3922_v28 }
 0x189   : > { %v1081_v56 = vpop.f32.mrf.mxu1  ;;  %v3614_v49 = vunpack.c.l.b16 %v3338_v51 }
 0x18a   : > { %v1818_v22 = vadd.f32 %v1769_v53, %v1528_v48  ;;  %v1128_v54 = vadd.f32 %v1081_v56, %v5735_v42  ;;  %v2426_v25 = vpop.f32.mrf.mxu0  ;;  %v4877_v42 = vld [vmem:[%s5307_s19 + $0x54] sm:$0xf]  ;;  %v3328_v63 = vsel %vm5365_vm6, %v3323_v38, %v6240_v36 }
 0x18b   : > { %v3340_v20 = vshrl.u32 %v4877_v42, 16  ;;  %v3343_v46 = vshll.u32 %v4877_v42, 16  ;;  %v3613_v56 = vunpack.c.l.b16 %v3328_v63  ;;  %v4705_v42 = vld [vmem:[%s5307_s19 + $0x48] sm:$0xe]  ;;  %v3359_v63 = vshll.u32 %v4879_v11, 16 }
 0x18c   : > { %4736 = vmatmul.msk.bf16.gmra.mxu1 %vm307_vm1, %v2696_v44  ;;  %4849 = vmatmul.msk.bf16.gmra.mxu2 %vm307_vm1, %v5016_v1  ;;  %v6255_v12 = vadd.f32 %v2423_v4, %v1818_v22  ;;  %v2669_v44 = vunpack.c.l.b16 %v2578_v26  ;;  %v2670_v1 = vunpack.c.l.b16 %v2581_v57  ;;  %v6281_v22 = vrot.slane %v3349_v33, 5  ;;  %v4880_v33 = vld [vmem:[%s5307_s19 + $0x60] sm:$0xf] }
 0x18d   : > { %4914 = vmatmul.msk.bf16.gmra.mxu3 %vm307_vm1, %v3640_v60  ;;  %4963 = vmatmul.msk.bf16.gmra.mxu0 %vm307_vm1, %v4038_v23  ;;  %v4011_v60 = vunpack.c.l.b16 %v3920_v21  ;;  %v4012_v23 = vunpack.c.l.b16 %v3923_v59  ;;  %v3342_v0 = vrot.slane %v3340_v20, 4  ;;  %v3345_v52 = vrot.slane %v3343_v46, 5  ;;  %v4932_v59 = vld [vmem:[%s5307_s19 + $0x54] sm:$0xe] }
 0x18e   : > { %v2697_v61 = vpack.c.b16 %v2670_v1, %v2669_v44  ;;  %v3641_v7 = vpack.c.b16 %v3614_v49, %v3613_v56  ;;  %v3926_v21 = vrot.slane %v6261_v41, 5  ;;  %v4721_v46 = vrot.slane %v4705_v42, 9 }
 0x18f   : > { %v1482_v16 = vpop.f32.mrf.mxu2  ;;  %v4039_v34 = vpack.c.b16 %v4012_v23, %v4011_v60  ;;  %v3346_v26 = vor.u32 %v3345_v52, %v3342_v0  ;;  %v3361_v44 = vrot.slane %v3359_v63, 5  ;;  %v4948_v1 = vrot.slane %v4932_v59, 9 }
 0x190   : > { %v1529_v4 = vadd.f32 %v1482_v16, %v1128_v54  ;;  %v1772_v45 = vpop.f32.mrf.mxu3  ;;  %v3355_v54 = vrot.slane %v3353_v3, 4  ;;  %v6296_v3 = vld [vmem:[%s5307_s19 + $0x64] sm:$0xf]  ;;  %v3928_v56 = vrot.slane %v3926_v21, 4  ;;  %v3929_v49 = vrot.slane %v4879_v11, 5 }
 0x191   : > { %v1083_v39 = vpop.f32.mrf.mxu1  ;;  %v3364_v23 = vshrl.u32 %v4880_v33, 16  ;;  %v3367_v0 = vshll.u32 %v4880_v33, 16  ;;  %v3373_v52 = vshll.u32 %v6296_v3, 16  ;;  %v3927_v42 = vsel %vm5371_vm7, %v4948_v1, %v3926_v21  ;;  %v4706_v33 = vld [vmem:[%s5307_s19 + $0x54] sm:$0xe] }
 0x192   : > { %v1819_v36 = vadd.f32 %v1772_v45, %v1529_v4  ;;  %v1129_v48 = vadd.f32 %v1083_v39, %v5764_v24  ;;  %v2428_v53 = vpop.f32.mrf.mxu0  ;;  %v3356_v57 = vor.u32 %v3355_v54, %v6281_v22  ;;  %v5104_v39 = vld [vmem:[%s5307_s19 + $0x50] sm:$0x1]  ;;  %v3377_v54 = vshrl.u32 %v6296_v3, 16 }
 0x193   : > { %v2587_v20 = vrot.slane %v5104_v39, 5 }
 0x194   : > { %v6279_v17 = vadd.f32 %v2426_v25, %v1819_v36  ;;  %v5103_v25 = vld [vmem:[%s5307_s19 + $0x4c] sm:$0xf]  ;;  %v3357_v41 = vrot.slane %v3356_v57, 4  ;;  %v6318_v57 = vrot.slane %v3373_v52, 5 }
 0x195   : > { %v2584_v16 = vrot.slane %v5103_v25, 5  ;;  %v3930_v25 = vsel %vm5371_vm7, %v3928_v56, %v3929_v49 }
 0x197   : > { %v1484_v50 = vpop.f32.mrf.mxu2 }
 0x198   : > { %v1530_v24 = vadd.f32 %v1484_v50, %v1129_v48  ;;  %v1774_v38 = vpop.f32.mrf.mxu3  ;;  %v3347_v48 = vrot.slane %v3346_v26, 4  ;;  %v3369_v26 = vrot.slane %v3367_v0, 5 }
 0x199   : > { %v1086_v28 = vpop.f32.mrf.mxu1 }
 0x19a   : > { %v1820_v4 = vadd.f32 %v1774_v38, %v1530_v24  ;;  %v1130_v45 = vadd.f32 %v1086_v28, %v5566_v62  ;;  %v2431_v51 = vpop.f32.mrf.mxu0  ;;  %v2586_v62 = vrot.slane %v2584_v16, 4  ;;  %v2585_v38 = vsel %vm5371_vm7, %v4721_v46, %v2584_v16 }
 0x19b   : > { %v3352_v11 = vsel %vm5365_vm6, %v3347_v48, %v6281_v22  ;;  %v3366_v16 = vrot.slane %v3364_v23, 4  ;;  %v3379_v22 = vrot.slane %v3377_v54, 4  ;;  %v2671_v63 = vunpack.c.l.b16 %v2585_v38  ;;  %v5018_v23 = vld [vmem:[%s5307_s19 + $0x54] sm:$0xff] }
 0x19c   : > { %4737 = vmatmul.msk.bf16.gmra.mxu1 %vm307_vm1, %v2697_v61  ;;  %4850 = vmatmul.msk.bf16.gmra.mxu2 %vm307_vm1, %v5017_v15  ;;  %v6298_v36 = vadd.f32 %v2428_v53, %v1820_v4  ;;  %v2588_v61 = vsel %vm5371_vm7, %v2586_v62, %v2587_v20  ;;  %v3362_v15 = vsel %vm5365_vm6, %v3357_v41, %v3361_v44  ;;  %v4013_v20 = vunpack.c.l.b16 %v3927_v42  ;;  %v5105_v62 = vld [vmem:[%s5307_s19 + $0x58] sm:$0xf] }
 0x19d   : > { %4915 = vmatmul.msk.bf16.gmra.mxu3 %vm307_vm1, %v3641_v7  ;;  %4964 = vmatmul.msk.bf16.gmra.mxu0 %vm307_vm1, %v4039_v34  ;;  %v2672_v4 = vunpack.c.l.b16 %v2588_v61  ;;  %v3616_v39 = vunpack.c.l.b16 %v3362_v15  ;;  %v4014_v46 = vunpack.c.l.b16 %v3930_v25  ;;  %v2591_v48 = vrot.slane %v5105_v62, 5  ;;  %v6791_v61 = vld [vmem:[#allocation5_spill] sm:$0xff] }
 0x19e   : > { %v3370_v41 = vor.u32 %v3369_v26, %v3366_v16  ;;  %v3380_v44 = vor.u32 %v3379_v22, %v6318_v57 }
 0x19f   : > { %v1487_v60 = vpop.f32.mrf.mxu2  ;;  %v4040_v54 = vpack.c.b16 %v4014_v46, %v4013_v20  ;;  %v2593_v42 = vrot.slane %v2591_v48, 4 }
 0x1a0   : > { %v1531_v53 = vadd.f32 %v1487_v60, %v1130_v45  ;;  %v1777_v50 = vpop.f32.mrf.mxu3  ;;  %v4882_v45 = vld [vmem:[%s5307_s19 + $0x68] sm:$0x1]  ;;  %v2698_v60 = vpack.c.b16 %v2672_v4, %v2671_v63  ;;  %v3381_v25 = vrot.slane %v3380_v44, 4  ;;  %v4883_v4 = vld [vmem:[%s5307_s19 + $0x6c] sm:$0xf] }
 0x1a1   : > { %v1088_v24 = vpop.f32.mrf.mxu1  ;;  %v3383_v1 = vshll.u32 %v4882_v45, 16  ;;  %v3936_v22 = vrot.slane %v4882_v45, 5 }
 0x1a2   : > { %v1821_v7 = vadd.f32 %v1777_v50, %v1531_v53  ;;  %v1131_v34 = vadd.f32 %v1088_v24, %v5587_v37  ;;  %v2433_v28 = vpop.f32.mrf.mxu0  ;;  %v3615_v37 = vunpack.c.l.b16 %v3352_v11  ;;  %v4933_v53 = vld [vmem:[%s5307_s19 + $0x60] sm:$0xe]  ;;  %v5106_v50 = vld [vmem:[%s5307_s19 + $0x5c] sm:$0x1] }
 0x1a3   : > { %v2594_v24 = vrot.slane %v5106_v50, 5  ;;  %v3385_v16 = vrot.slane %v3383_v1, 5  ;;  %v3391_v1 = vshll.u32 %v4883_v4, 16 }
 0x1a4   : > { %v6321_v59 = vadd.f32 %v2431_v51, %v1821_v7  ;;  %v3933_v51 = vrot.slane %v6296_v3, 5  ;;  %v3642_v52 = vpack.c.b16 %v3616_v39, %v3615_v37  ;;  %v4722_v7 = vrot.slane %v4706_v33, 9  ;;  %v6339_v37 = vld [vmem:[%s5307_s19 + $0x70] sm:$0xf] }
 0x1a5   : > { %v4949_v3 = vrot.slane %v4933_v53, 9  ;;  %v2595_v46 = vsel %vm5371_vm7, %v2593_v42, %v2594_v24  ;;  %v3386_v33 = vsel %vm5365_vm6, %v3381_v25, %v3385_v16 }
 0x1a6   : > { %v3935_v26 = vrot.slane %v3933_v51, 4  ;;  %v2592_v20 = vsel %vm5371_vm7, %v4722_v7, %v2591_v48  ;;  %v3388_v48 = vshrl.u32 %v4883_v4, 16 }
 0x1a7   : > { %v1489_v21 = vpop.f32.mrf.mxu2  ;;  %v3934_v62 = vsel %vm5371_vm7, %v4949_v3, %v3933_v51  ;;  %v3618_v51 = vunpack.c.l.b16 %v3386_v33 }
 0x1a8   : > { %v1532_v56 = vadd.f32 %v1489_v21, %v1131_v34  ;;  %v1779_v49 = vpop.f32.mrf.mxu3  ;;  %v3371_v34 = vrot.slane %v3370_v41, 4  ;;  %v3937_v41 = vsel %vm5371_vm7, %v3935_v26, %v3936_v22  ;;  %v4015_v50 = vunpack.c.l.b16 %v3934_v62  ;;  %v5019_v22 = vld [vmem:[%s5307_s19 + $0x60] sm:$0xff] }
 0x1a9   : > { %v1091_v0 = vpop.f32.mrf.mxu1  ;;  %v4016_v24 = vunpack.c.l.b16 %v3937_v41  ;;  %v6793_v41 = vld [vmem:[#allocation7_spill] sm:$0xff] }
 0x1aa   : > { %v1822_v38 = vadd.f32 %v1779_v49, %v1532_v56  ;;  %v1132_v11 = vadd.f32 %v1091_v0, %v6791_v61  ;;  %v2436_v15 = vpop.f32.mrf.mxu0  ;;  %v3376_v45 = vsel %vm5365_vm6, %v3371_v34, %v6318_v57  ;;  %v3397_v56 = vshll.u32 %v6339_v37, 16  ;;  %v4885_v34 = vld [vmem:[%s5307_s19 + $0x74] sm:$0x1] }
 0x1ab   : > { %v3401_v49 = vshrl.u32 %v6339_v37, 16  ;;  %v3617_v53 = vunpack.c.l.b16 %v3376_v45  ;;  %v3390_v61 = vrot.slane %v3388_v48, 4  ;;  %v3407_v33 = vshll.u32 %v4885_v34, 16 }
 0x1ac   : > { %4738 = vmatmul.msk.bf16.gmra.mxu1 %vm307_vm1, %v2698_v60  ;;  %4851 = vmatmul.msk.bf16.gmra.mxu2 %vm307_vm1, %v5018_v23  ;;  %v6333_v63 = vadd.f32 %v2433_v28, %v1822_v38  ;;  %v6792_v60 = vld [vmem:[#allocation6_spill] sm:$0xff]  ;;  %v6359_v7 = vrot.slane %v3397_v56, 5 }
 0x1ad   : > { %4916 = vmatmul.msk.bf16.gmra.mxu3 %vm307_vm1, %v3642_v52  ;;  %4965 = vmatmul.msk.bf16.gmra.mxu0 %vm307_vm1, %v4040_v54  ;;  %v2673_v52 = vunpack.c.l.b16 %v2592_v20  ;;  %v2674_v54 = vunpack.c.l.b16 %v2595_v46  ;;  %v3403_v42 = vrot.slane %v3401_v49, 4  ;;  %v3643_v4 = vpack.c.b16 %v3618_v51, %v3617_v53  ;;  %v4707_v46 = vld [vmem:[%s5307_s19 + $0x60] sm:$0xe]  ;;  %v4934_v56 = vld [vmem:[%s5307_s19 + $0x6c] sm:$0xe] }
 0x1ae   : > { %v5108_v49 = vld [vmem:[%s5307_s19 + $0x68] sm:$0x1] }
 0x1af   : > { %v1492_v39 = vpop.f32.mrf.mxu2  ;;  %v2699_v26 = vpack.c.b16 %v2674_v54, %v2673_v52  ;;  %v6374_v52 = vld [vmem:[%s5307_s19 + $0x7c] sm:$0xf] }
 0x1b0   : > { %v1533_v28 = vadd.f32 %v1492_v39, %v1132_v11  ;;  %v1782_v21 = vpop.f32.mrf.mxu3  ;;  %v3393_v11 = vrot.slane %v3391_v1, 5  ;;  %v4041_v39 = vpack.c.b16 %v4016_v24, %v4015_v50  ;;  %v3940_v1 = vrot.slane %v6339_v37, 5 }
 0x1b1   : > { %v1093_v44 = vpop.f32.mrf.mxu1  ;;  %v3409_v50 = vrot.slane %v3407_v33, 5  ;;  %v4950_v24 = vrot.slane %v4934_v56, 9 }
 0x1b2   : > { %v1823_v57 = vadd.f32 %v1782_v21, %v1533_v28  ;;  %v1133_v23 = vadd.f32 %v1093_v44, %v6792_v60  ;;  %v2438_v0 = vpop.f32.mrf.mxu0  ;;  %v3394_v28 = vor.u32 %v3393_v11, %v3390_v61  ;;  %v3404_v21 = vor.u32 %v3403_v42, %v6359_v7 }
 0x1b3   : > { %v4723_v60 = vrot.slane %v4707_v46, 9  ;;  %v3942_v61 = vrot.slane %v3940_v1, 4  ;;  %v3943_v11 = vrot.slane %v4885_v34, 5 }
 0x1b4   : > { %v6357_v38 = vadd.f32 %v2436_v15, %v1823_v57  ;;  %v5107_v15 = vld [vmem:[%s5307_s19 + $0x64] sm:$0xf]  ;;  %v2601_v57 = vrot.slane %v5108_v49, 5  ;;  %v3395_v51 = vrot.slane %v3394_v28, 4  ;;  %v3405_v37 = vrot.slane %v3404_v21, 4  ;;  %v6794_v28 = vld [vmem:[#allocation8_spill] sm:$0xff] }
 0x1b5   : > { %v2598_v45 = vrot.slane %v5107_v15, 5 }
 0x1b6   : > { %v3400_v34 = vsel %vm5365_vm6, %v3395_v51, %v6359_v7  ;;  %v3410_v46 = vsel %vm5365_vm6, %v3405_v37, %v3409_v50 }
 0x1b7   : > { %v1494_v25 = vpop.f32.mrf.mxu2  ;;  %v2600_v53 = vrot.slane %v2598_v45, 4  ;;  %v3620_v51 = vunpack.c.l.b16 %v3410_v46 }
 0x1b8   : > { %v1534_v16 = vadd.f32 %v1494_v25, %v1133_v23  ;;  %v1784_v3 = vpop.f32.mrf.mxu3  ;;  %v4886_v23 = vld [vmem:[%s5307_s19 + $0x78] sm:$0xf] }
 0x1b9   : > { %v1096_v20 = vpop.f32.mrf.mxu1  ;;  %v3412_v25 = vshrl.u32 %v4886_v23, 16 }
 0x1ba   : > { %v1824_v62 = vadd.f32 %v1784_v3, %v1534_v16  ;;  %v1134_v44 = vadd.f32 %v1096_v20, %v6793_v41  ;;  %v2441_v48 = vpop.f32.mrf.mxu0  ;;  %v3415_v16 = vshll.u32 %v4886_v23, 16  ;;  %v3421_v3 = vshll.u32 %v6374_v52, 16 }
 0x1bb   : > { %v3414_v41 = vrot.slane %v3412_v25, 4 }
 0x1bc   : > { %4739 = vmatmul.msk.bf16.gmra.mxu1 %vm307_vm1, %v2699_v26  ;;  %4852 = vmatmul.msk.bf16.gmra.mxu2 %vm307_vm1, %v5019_v22  ;;  %v6376_v54 = vadd.f32 %v2438_v0, %v1824_v62  ;;  %v3425_v26 = vshrl.u32 %v6374_v52, 16  ;;  %v3941_v62 = vsel %vm5371_vm7, %v4950_v24, %v3940_v1  ;;  %v6396_v56 = vrot.slane %v3421_v3, 5  ;;  %v4708_v24 = vld [vmem:[%s5307_s19 + $0x6c] sm:$0xe] }
 0x1bd   : > { %4917 = vmatmul.msk.bf16.gmra.mxu3 %vm307_vm1, %v3643_v4  ;;  %4966 = vmatmul.msk.bf16.gmra.mxu0 %vm307_vm1, %v4041_v39  ;;  %v2599_v4 = vsel %vm5371_vm7, %v4723_v60, %v2598_v45  ;;  %v2602_v39 = vsel %vm5371_vm7, %v2600_v53, %v2601_v57  ;;  %v3944_v45 = vsel %vm5371_vm7, %v3942_v61, %v3943_v11  ;;  %v4888_v60 = vld [vmem:[%s5307_s19 + $0x80] sm:$0x1]  ;;  %v3619_v53 = vunpack.c.l.b16 %v3400_v34  ;;  %v4935_v34 = vld [vmem:[%s5307_s19 + $0x78] sm:$0xe] }
 0x1be   : > { %v3427_v7 = vrot.slane %v3425_v26, 4  ;;  %v2675_v49 = vunpack.c.l.b16 %v2599_v4  ;;  %v2676_v57 = vunpack.c.l.b16 %v2602_v39  ;;  %v4017_v37 = vunpack.c.l.b16 %v3941_v62 }
 0x1bf   : > { %v1497_v42 = vpop.f32.mrf.mxu2  ;;  %v4018_v50 = vunpack.c.l.b16 %v3944_v45  ;;  %v3644_v4 = vpack.c.b16 %v3620_v51, %v3619_v53  ;;  %v4724_v45 = vrot.slane %v4708_v24, 9  ;;  %v3950_v53 = vrot.slane %v4888_v60, 5 }
 0x1c0   : > { %v1535_v0 = vadd.f32 %v1497_v42, %v1134_v44  ;;  %v1787_v22 = vpop.f32.mrf.mxu3  ;;  %v3417_v44 = vrot.slane %v3415_v16, 5  ;;  %v5109_v42 = vld [vmem:[%s5307_s19 + $0x70] sm:$0xf]  ;;  %v3428_v25 = vor.u32 %v3427_v7, %v6396_v56  ;;  %v3431_v16 = vshll.u32 %v4888_v60, 16 }
 0x1c1   : > { %v1098_v20 = vpop.f32.mrf.mxu1  ;;  %v2605_v61 = vrot.slane %v5109_v42, 5  ;;  %v4042_v39 = vpack.c.b16 %v4018_v50, %v4017_v37  ;;  %v4889_v37 = vld [vmem:[%s5307_s19 + $0x84] sm:$0xf]  ;;  %v6417_v50 = vld [vmem:[%s5307_s19 + $0x88] sm:$0xf] }
 0x1c2   : > { %v1825_v15 = vadd.f32 %v1787_v22, %v1535_v0  ;;  %v1135_v21 = vadd.f32 %v1098_v20, %v6794_v28  ;;  %v2443_v33 = vpop.f32.mrf.mxu0  ;;  %v3418_v11 = vor.u32 %v3417_v44, %v3414_v41  ;;  %v2700_v0 = vpack.c.b16 %v2676_v57, %v2675_v49  ;;  %v5020_v22 = vld [vmem:[%s5307_s19 + $0x6c] sm:$0xff]  ;;  %v5110_v41 = vld [vmem:[%s5307_s19 + $0x74] sm:$0x1] }
 0x1c3   : > { %v2608_v44 = vrot.slane %v5110_v41, 5  ;;  %v2607_v7 = vrot.slane %v2605_v61, 4  ;;  %v3433_v49 = vrot.slane %v3431_v16, 5  ;;  %v2606_v42 = vsel %vm5371_vm7, %v4724_v45, %v2605_v61 }
 0x1c4   : > { %v6399_v23 = vadd.f32 %v2441_v48, %v1825_v15  ;;  %v3947_v48 = vrot.slane %v6374_v52, 5  ;;  %v6795_v15 = vld [vmem:[#allocation9_spill] sm:$0xff]  ;;  %v4951_v52 = vrot.slane %v4935_v34, 9  ;;  %v3436_v61 = vshrl.u32 %v4889_v37, 16 }
 0x1c6   : > { %v3949_v57 = vrot.slane %v3947_v48, 4 }
 0x1c7   : > { %v1499_v1 = vpop.f32.mrf.mxu2 }
 0x1c8   : > { %v1536_v3 = vadd.f32 %v1499_v1, %v1135_v21  ;;  %v1789_v26 = vpop.f32.mrf.mxu3  ;;  %v3419_v21 = vrot.slane %v3418_v11, 4  ;;  %v3429_v1 = vrot.slane %v3428_v25, 4  ;;  %v2609_v11 = vsel %vm5371_vm7, %v2607_v7, %v2608_v44 }
 0x1c9   : > { %v1101_v20 = vpop.f32.mrf.mxu1 }
 0x1ca   : > { %v1826_v46 = vadd.f32 %v1789_v26, %v1536_v3  ;;  %v1136_v28 = vadd.f32 %v1101_v20, %v6795_v15  ;;  %v2446_v62 = vpop.f32.mrf.mxu0  ;;  %v3424_v60 = vsel %vm5365_vm6, %v3419_v21, %v6396_v56  ;;  %v3434_v16 = vsel %vm5365_vm6, %v3429_v1, %v3433_v49 }
 0x1cb   : > { %v3948_v3 = vsel %vm5371_vm7, %v4951_v52, %v3947_v48  ;;  %v3951_v26 = vsel %vm5371_vm7, %v3949_v57, %v3950_v53  ;;  %v3445_v20 = vshll.u32 %v6417_v50, 16  ;;  %v2677_v15 = vunpack.c.l.b16 %v2606_v42  ;;  %v4891_v57 = vld [vmem:[%s5307_s19 + $0x8c] sm:$0x1] }
 0x1cc   : > { %4740 = vmatmul.msk.bf16.gmra.mxu1 %vm307_vm1, %v2700_v0  ;;  %4853 = vmatmul.msk.bf16.gmra.mxu2 %vm307_vm1, %v5020_v22  ;;  %v6411_v51 = vadd.f32 %v2443_v33, %v1826_v46  ;;  %v3439_v22 = vshll.u32 %v4889_v37, 16  ;;  %v3621_v45 = vunpack.c.l.b16 %v3424_v60  ;;  %v3622_v48 = vunpack.c.l.b16 %v3434_v16 }
 0x1cd   : > { %4918 = vmatmul.msk.bf16.gmra.mxu3 %vm307_vm1, %v3644_v4  ;;  %4967 = vmatmul.msk.bf16.gmra.mxu0 %vm307_vm1, %v4042_v39  ;;  %v3449_v4 = vshrl.u32 %v6417_v50, 16  ;;  %v6796_v39 = vld [vmem:[#allocation10_spill] sm:$0xff]  ;;  %v4019_v41 = vunpack.c.l.b16 %v3948_v3  ;;  %v4020_v44 = vunpack.c.l.b16 %v3951_v26  ;;  %v3438_v21 = vrot.slane %v3436_v61, 4  ;;  %v4709_v3 = vld [vmem:[%s5307_s19 + $0x78] sm:$0xe] }
 0x1ce   : > { %v3441_v1 = vrot.slane %v3439_v22, 5  ;;  %v6437_v49 = vrot.slane %v3445_v20, 5  ;;  %v3645_v60 = vpack.c.b16 %v3622_v48, %v3621_v45  ;;  %v3455_v61 = vshll.u32 %v4891_v57, 16  ;;  %v5112_v48 = vld [vmem:[%s5307_s19 + $0x80] sm:$0x1] }
 0x1cf   : > { %v1502_v24 = vpop.f32.mrf.mxu2  ;;  %v3451_v52 = vrot.slane %v3449_v4, 4  ;;  %v4043_v16 = vpack.c.b16 %v4020_v44, %v4019_v41  ;;  %v3954_v4 = vrot.slane %v6417_v50, 5  ;;  %v2615_v41 = vrot.slane %v5112_v48, 5 }
 0x1d0   : > { %v1537_v33 = vadd.f32 %v1502_v24, %v1136_v28  ;;  %v1792_v25 = vpop.f32.mrf.mxu3  ;;  %v2678_v28 = vunpack.c.l.b16 %v2609_v11  ;;  %v5021_v11 = vld [vmem:[%s5307_s19 + $0x78] sm:$0xff]  ;;  %v3442_v26 = vor.u32 %v3441_v1, %v3438_v21  ;;  %v3457_v21 = vrot.slane %v3455_v61, 5 }
 0x1d1   : > { %v1103_v0 = vpop.f32.mrf.mxu1 }
 0x1d2   : > { %v1827_v56 = vadd.f32 %v1792_v25, %v1537_v33  ;;  %v1137_v34 = vadd.f32 %v1103_v0, %v6796_v39  ;;  %v2448_v46 = vpop.f32.mrf.mxu0  ;;  %v2701_v42 = vpack.c.b16 %v2678_v28, %v2677_v15  ;;  %v5111_v33 = vld [vmem:[%s5307_s19 + $0x7c] sm:$0xf]  ;;  %v3452_v0 = vor.u32 %v3451_v52, %v6437_v49  ;;  %v4892_v15 = vld [vmem:[%s5307_s19 + $0x90] sm:$0xf]  ;;  %v6450_v28 = vld [vmem:[%s5307_s19 + $0x94] sm:$0xf] }
 0x1d3   : > { %v2612_v25 = vrot.slane %v5111_v33, 5  ;;  %v4725_v39 = vrot.slane %v4709_v3, 9  ;;  %v3443_v50 = vrot.slane %v3442_v26, 4 }
 0x1d4   : > { %v6435_v7 = vadd.f32 %v2446_v62, %v1827_v56  ;;  %v4936_v56 = vld [vmem:[%s5307_s19 + $0x84] sm:$0xe]  ;;  %v3453_v44 = vrot.slane %v3452_v0, 4 }
 0x1d5   : > { %v4952_v52 = vrot.slane %v4936_v56, 9  ;;  %v2613_v26 = vsel %vm5371_vm7, %v4725_v39, %v2612_v25 }
 0x1d6   : > { %v3458_v61 = vsel %vm5365_vm6, %v3453_v44, %v3457_v21  ;;  %v2679_v48 = vunpack.c.l.b16 %v2613_v26 }
 0x1d7   : > { %v1504_v53 = vpop.f32.mrf.mxu2 }
 0x1d8   : > { %v1538_v37 = vadd.f32 %v1504_v53, %v1137_v34  ;;  %v1794_v24 = vpop.f32.mrf.mxu3  ;;  %v2614_v34 = vrot.slane %v2612_v25, 4  ;;  %v3956_v53 = vrot.slane %v3954_v4, 4 }
 0x1d9   : > { %v2769_v62 = vpop.f32.mrf.mxu1 }
 0x1da   : > { %v1828_v22 = vadd.f32 %v1794_v24, %v1538_v37  ;;  %v4111_v20 = vpop.f32.mrf.mxu0  ;;  %v2849_v1 = vadd.f32 %v2769_v62, %v5830_v47  ;;  %v3957_v37 = vrot.slane %v4891_v57, 5  ;;  %v2616_v47 = vsel %vm5371_vm7, %v2614_v34, %v2615_v41 }
 0x1db   : > { %v3448_v57 = vsel %vm5365_vm6, %v3443_v50, %v6437_v49  ;;  %v2680_v41 = vunpack.c.l.b16 %v2616_v47  ;;  %v4894_v50 = vld [vmem:[%s5307_s19 + $0x98] sm:$0x1] }
 0x1dc   : > { %4741 = vmatmul.msk.bf16.gmra.mxu1 %vm307_vm1, %v2701_v42  ;;  %4854 = vmatmul.msk.bf16.gmra.mxu2 %vm307_vm1, %v5021_v11  ;;  %v6452_v45 = vadd.f32 %v2448_v46, %v1828_v22  ;;  %v3460_v42 = vshrl.u32 %v4892_v15, 16  ;;  %v3463_v46 = vshll.u32 %v4892_v15, 16  ;;  %v3469_v11 = vshll.u32 %v6450_v28, 16 }
 0x1dd   : > { %4919 = vmatmul.msk.bf16.gmra.mxu3 %vm307_vm1, %v3645_v60  ;;  %4968 = vmatmul.msk.bf16.gmra.mxu0 %vm307_vm1, %v4043_v16  ;;  %v3473_v60 = vshrl.u32 %v6450_v28, 16  ;;  %v3955_v22 = vsel %vm5371_vm7, %v4952_v52, %v3954_v4  ;;  %v3958_v25 = vsel %vm5371_vm7, %v3956_v53, %v3957_v37  ;;  %v6798_v52 = vld [vmem:[#allocation11_spill] sm:$0xff]  ;;  %v2702_v47 = vpack.c.b16 %v2680_v41, %v2679_v48 }
 0x1de   : > { %6797 = vst [vmem:[#allocation5_spill] sm:$0xff] %v6452_v45  ;;  %v3462_v56 = vrot.slane %v3460_v42, 4  ;;  %v3465_v39 = vrot.slane %v3463_v46, 5  ;;  %v6476_v34 = vrot.slane %v3469_v11, 5  ;;  %v4021_v44 = vunpack.c.l.b16 %v3955_v22  ;;  %v4710_v42 = vld [vmem:[%s5307_s19 + $0x84] sm:$0xe] }
 0x1df   : > { %v3059_v24 = vpop.f32.mrf.mxu2  ;;  %v3475_v49 = vrot.slane %v3473_v60, 4  ;;  %v4022_v21 = vunpack.c.l.b16 %v3958_v25  ;;  %v4937_v25 = vld [vmem:[%s5307_s19 + $0x90] sm:$0xe]  ;;  %v3964_v41 = vrot.slane %v4894_v50, 5 }
 0x1e0   : > { %v3139_v33 = vadd.f32 %v3059_v24, %v2849_v1  ;;  %v3713_v16 = vpop.f32.mrf.mxu3  ;;  %v3623_v1 = vunpack.c.l.b16 %v3448_v57  ;;  %v3624_v24 = vunpack.c.l.b16 %v3458_v61  ;;  %v3466_v46 = vor.u32 %v3465_v39, %v3462_v56  ;;  %v5022_v57 = vld [vmem:[%s5307_s19 + $0x84] sm:$0xff] }
 0x1e1   : > { %v2771_v3 = vpop.f32.mrf.mxu1  ;;  %v3476_v11 = vor.u32 %v3475_v49, %v6476_v34  ;;  %v4044_v22 = vpack.c.b16 %v4022_v21, %v4021_v44  ;;  %v4726_v39 = vrot.slane %v4710_v42, 9  ;;  %v4895_v44 = vld [vmem:[%s5307_s19 + $0x9c] sm:$0xf]  ;;  %v6497_v21 = vld [vmem:[%s5307_s19 + $0xa0] sm:$0xf] }
 0x1e2   : > { %v3793_v62 = vadd.f32 %v3713_v16, %v3139_v33  ;;  %v4113_v0 = vpop.f32.mrf.mxu0  ;;  %v2850_v33 = vadd.f32 %v2771_v3, %v6798_v52  ;;  %v5113_v16 = vld [vmem:[%s5307_s19 + $0x88] sm:$0xf]  ;;  %v3961_v3 = vrot.slane %v6450_v28, 5  ;;  %v3646_v61 = vpack.c.b16 %v3624_v24, %v3623_v1  ;;  %v5114_v52 = vld [vmem:[%s5307_s19 + $0x8c] sm:$0x1] }
 0x1e3   : > { %v2619_v53 = vrot.slane %v5113_v16, 5  ;;  %v2622_v16 = vrot.slane %v5114_v52, 5  ;;  %v3467_v45 = vrot.slane %v3466_v46, 4  ;;  %v4953_v28 = vrot.slane %v4937_v25, 9 }
 0x1e4   : > { %v4191_v15 = vadd.f32 %v4111_v20, %v3793_v62  ;;  %v3479_v20 = vshll.u32 %v4894_v50, 16  ;;  %v3963_v48 = vrot.slane %v3961_v3, 4 }
 0x1e5   : > { %v2621_v49 = vrot.slane %v2619_v53, 4  ;;  %v3472_v50 = vsel %vm5365_vm6, %v3467_v45, %v6476_v34 }
 0x1e6   : > { %v4223_v4 = vmax.f32 %v4191_v15, 0.0 }
 0x1e7   : > { %v3061_v37 = vpop.f32.mrf.mxu2  ;;  %v2623_v46 = vsel %vm5371_vm7, %v2621_v49, %v2622_v16 }
 0x1e8   : > { %4255 = vst [vmem:[%s6483_s11] sm:$0xff] %v4223_v4  ;;  %v3140_v60 = vadd.f32 %v3061_v37, %v2850_v33  ;;  %v3715_v26 = vpop.f32.mrf.mxu3  ;;  %v3477_v4 = vrot.slane %v3476_v11, 4  ;;  %v3481_v33 = vrot.slane %v3479_v20, 5  ;;  %v2682_v25 = vunpack.c.l.b16 %v2623_v46  ;;  %v4711_v46 = vld [vmem:[%s5307_s19 + $0x90] sm:$0xe] }
 0x1e9   : > { %v2774_v62 = vpop.f32.mrf.mxu1 }
 0x1ea   : > { %v3794_v15 = vadd.f32 %v3715_v26, %v3140_v60  ;;  %v4116_v56 = vpop.f32.mrf.mxu0  ;;  %v2851_v24 = vadd.f32 %v2774_v62, %v5877_v8  ;;  %v3482_v8 = vsel %vm5365_vm6, %v3477_v4, %v3481_v33  ;;  %v3962_v60 = vsel %vm5371_vm7, %v4953_v28, %v3961_v3 }
 0x1eb   : > { %v3965_v26 = vsel %vm5371_vm7, %v3963_v48, %v3964_v41  ;;  %v3493_v62 = vshll.u32 %v6497_v21, 16  ;;  %v3626_v3 = vunpack.c.l.b16 %v3482_v8  ;;  %v4023_v49 = vunpack.c.l.b16 %v3962_v60  ;;  %v4897_v41 = vld [vmem:[%s5307_s19 + $0xa4] sm:$0x1] }
 0x1ec   : > { %v4192_v37 = vadd.f32 %v4113_v0, %v3794_v15  ;;  %4742 = vmatmul.msk.bf16.gmra.mxu1 %vm307_vm1, %v2702_v47  ;;  %4855 = vmatmul.msk.bf16.gmra.mxu2 %vm307_vm1, %v5022_v57  ;;  %v2620_v0 = vsel %vm5371_vm7, %v4726_v39, %v2619_v53  ;;  %v3484_v47 = vshrl.u32 %v4895_v44, 16  ;;  %v3487_v57 = vshll.u32 %v4895_v44, 16 }
 0x1ed   : > { %4920 = vmatmul.msk.bf16.gmra.mxu3 %vm307_vm1, %v3646_v61  ;;  %4969 = vmatmul.msk.bf16.gmra.mxu0 %vm307_vm1, %v4044_v22  ;;  %v3497_v61 = vshrl.u32 %v6497_v21, 16  ;;  %v2681_v22 = vunpack.c.l.b16 %v2620_v0  ;;  %v3625_v15 = vunpack.c.l.b16 %v3472_v50  ;;  %v4024_v52 = vunpack.c.l.b16 %v3965_v26  ;;  %v5115_v50 = vld [vmem:[%s5307_s19 + $0x94] sm:$0xf] }
 0x1ee   : > { %v4224_v1 = vmax.f32 %v4192_v37, 0.0  ;;  %v3486_v16 = vrot.slane %v3484_v47, 4  ;;  %v3489_v4 = vrot.slane %v3487_v57, 5  ;;  %v6515_v33 = vrot.slane %v3493_v62, 5  ;;  %v4938_v57 = vld [vmem:[%s5307_s19 + $0x9c] sm:$0xe] }
 0x1ef   : > { %v3064_v42 = vpop.f32.mrf.mxu2  ;;  %v3499_v37 = vrot.slane %v3497_v61, 4  ;;  %v2703_v44 = vpack.c.b16 %v2682_v25, %v2681_v22  ;;  %v3647_v0 = vpack.c.b16 %v3626_v3, %v3625_v15  ;;  %v4045_v8 = vpack.c.b16 %v4024_v52, %v4023_v49  ;;  %v5116_v25 = vld [vmem:[%s5307_s19 + $0x98] sm:$0x1]  ;;  %v6531_v3 = vld [vmem:[%s5307_s19 + $0xac] sm:$0xf] }
 0x1f0   : > { %4256 = vst [vmem:[%s6483_s11 + $0x8] sm:$0xff] %v4224_v1  ;;  %v3141_v11 = vadd.f32 %v3064_v42, %v2851_v24  ;;  %v3718_v20 = vpop.f32.mrf.mxu3  ;;  %v5023_v42 = vld [vmem:[%s5307_s19 + $0x90] sm:$0xff]  ;;  %v3490_v60 = vor.u32 %v3489_v4, %v3486_v16  ;;  %v3503_v26 = vshll.u32 %v4897_v41, 16  ;;  %v3968_v62 = vrot.slane %v6497_v21, 5 }
 0x1f1   : > { %v2776_v53 = vpop.f32.mrf.mxu1  ;;  %v4727_v61 = vrot.slane %v4711_v46, 9  ;;  %v2629_v15 = vrot.slane %v5116_v25, 5  ;;  %v4954_v16 = vrot.slane %v4938_v57, 9  ;;  %v4900_v25 = vld [vmem:[%s5307_s19 + $0xb0] sm:$0x1] }
 0x1f2   : > { %v3795_v45 = vadd.f32 %v3718_v20, %v3141_v11  ;;  %v4118_v34 = vpop.f32.mrf.mxu0  ;;  %v2852_v48 = vadd.f32 %v2776_v53, %v5879_v9  ;;  %v2626_v11 = vrot.slane %v5115_v50, 5  ;;  %v3500_v9 = vor.u32 %v3499_v37, %v6515_v33 }
 0x1f3   : > { %v3491_v49 = vrot.slane %v3490_v60, 4  ;;  %v3505_v21 = vrot.slane %v3503_v26, 5  ;;  %v3970_v37 = vrot.slane %v3968_v62, 4 }
 0x1f4   : > { %v4193_v39 = vadd.f32 %v4116_v56, %v3795_v45  ;;  %v2628_v22 = vrot.slane %v2626_v11, 4  ;;  %v3501_v52 = vrot.slane %v3500_v9, 4  ;;  %v2627_v50 = vsel %vm5371_vm7, %v4727_v61, %v2626_v11 }
 0x1f5   : > { %v3969_v9 = vsel %vm5371_vm7, %v4954_v16, %v3968_v62  ;;  %v5117_v16 = vld [vmem:[%s5307_s19 + $0xa0] sm:$0xf] }
 0x1f6   : > { %v4225_v28 = vmax.f32 %v4193_v39, 0.0  ;;  %v4898_v39 = vld [vmem:[%s5307_s19 + $0xa8] sm:$0xf]  ;;  %v3506_v60 = vsel %vm5365_vm6, %v3501_v52, %v3505_v21 }
 0x1f7   : > { %v3066_v1 = vpop.f32.mrf.mxu2 }
 0x1f8   : > { %4257 = vst [vmem:[%s6483_s11 + $0x10] sm:$0xff] %v4225_v28  ;;  %v3142_v24 = vadd.f32 %v3066_v1, %v2852_v48  ;;  %v3720_v56 = vpop.f32.mrf.mxu3  ;;  %v3971_v28 = vrot.slane %v4897_v41, 5  ;;  %v3508_v1 = vshrl.u32 %v4898_v39, 16  ;;  %v3496_v41 = vsel %vm5365_vm6, %v3491_v49, %v6515_v33 }
 0x1f9   : > { %v2779_v20 = vpop.f32.mrf.mxu1  ;;  %v2683_v33 = vunpack.c.l.b16 %v2627_v50  ;;  %v4025_v49 = vunpack.c.l.b16 %v3969_v9  ;;  %v5118_v9 = vld [vmem:[%s5307_s19 + $0xa4] sm:$0x1] }
 0x1fa   : > { %v3796_v53 = vadd.f32 %v3720_v56, %v3142_v24  ;;  %v4121_v47 = vpop.f32.mrf.mxu0  ;;  %v2853_v4 = vadd.f32 %v2779_v20, %v5927_v55  ;;  %v3511_v24 = vshll.u32 %v4898_v39, 16  ;;  %v3517_v56 = vshll.u32 %v6531_v3, 16 }
 0x1fb   : > { %v2630_v55 = vsel %vm5371_vm7, %v2628_v22, %v2629_v15  ;;  %v3972_v26 = vsel %vm5371_vm7, %v3970_v37, %v3971_v28  ;;  %v3510_v11 = vrot.slane %v3508_v1, 4  ;;  %v3627_v15 = vunpack.c.l.b16 %v3496_v41  ;;  %v4712_v37 = vld [vmem:[%s5307_s19 + $0x9c] sm:$0xe] }
 0x1fc   : > { %v4194_v45 = vadd.f32 %v4118_v34, %v3796_v53  ;;  %4743 = vmatmul.msk.bf16.gmra.mxu1 %vm307_vm1, %v2703_v44  ;;  %4856 = vmatmul.msk.bf16.gmra.mxu2 %vm307_vm1, %v5023_v42  ;;  %v3521_v44 = vshrl.u32 %v6531_v3, 16  ;;  %v3513_v53 = vrot.slane %v3511_v24, 5  ;;  %v6552_v57 = vrot.slane %v3517_v56, 5 }
 0x1fd   : > { %4921 = vmatmul.msk.bf16.gmra.mxu3 %vm307_vm1, %v3647_v0  ;;  %4970 = vmatmul.msk.bf16.gmra.mxu0 %vm307_vm1, %v4045_v8  ;;  %v2684_v22 = vunpack.c.l.b16 %v2630_v55  ;;  %v3628_v39 = vunpack.c.l.b16 %v3506_v60  ;;  %v4026_v62 = vunpack.c.l.b16 %v3972_v26  ;;  %v2636_v26 = vrot.slane %v5118_v9, 5 }
 0x1fe   : > { %v4226_v34 = vmax.f32 %v4194_v45, 0.0  ;;  %v3523_v61 = vrot.slane %v3521_v44, 4  ;;  %v3514_v28 = vor.u32 %v3513_v53, %v3510_v11  ;;  %v5024_v44 = vld [vmem:[%s5307_s19 + $0x9c] sm:$0xff] }
 0x1ff   : > { %v3069_v48 = vpop.f32.mrf.mxu2  ;;  %v2704_v56 = vpack.c.b16 %v2684_v22, %v2683_v33  ;;  %v3648_v50 = vpack.c.b16 %v3628_v39, %v3627_v15  ;;  %v3978_v22 = vrot.slane %v4900_v25, 5 }
 0x200   : > { %4258 = vst [vmem:[%s6483_s11 + $0x18] sm:$0xff] %v4226_v34  ;;  %v3143_v42 = vadd.f32 %v3069_v48, %v2853_v4  ;;  %v3723_v0 = vpop.f32.mrf.mxu3  ;;  %v2633_v34 = vrot.slane %v5117_v16, 5  ;;  %v3527_v48 = vshll.u32 %v4900_v25, 16  ;;  %v3515_v11 = vrot.slane %v3514_v28, 4 }
 0x201   : > { %v2781_v46 = vpop.f32.mrf.mxu1 }
 0x202   : > { %v3797_v20 = vadd.f32 %v3723_v0, %v3143_v42  ;;  %v4123_v8 = vpop.f32.mrf.mxu0  ;;  %v2854_v21 = vadd.f32 %v2781_v46, %v5929_v58  ;;  %v3975_v42 = vrot.slane %v6531_v3, 5  ;;  %v4046_v58 = vpack.c.b16 %v4026_v62, %v4025_v49  ;;  %v4939_v46 = vld [vmem:[%s5307_s19 + $0xa8] sm:$0xe]  ;;  %v4901_v49 = vld [vmem:[%s5307_s19 + $0xb4] sm:$0xf] }
 0x203   : > { %v2635_v60 = vrot.slane %v2633_v34, 4  ;;  %v4955_v3 = vrot.slane %v4939_v46, 9  ;;  %v6571_v62 = vld [vmem:[%s5307_s19 + $0xb8] sm:$0xf]  ;;  %v3520_v25 = vsel %vm5365_vm6, %v3515_v11, %v6552_v57 }
 0x204   : > { %v4195_v45 = vadd.f32 %v4121_v47, %v3797_v20  ;;  %v3524_v47 = vor.u32 %v3523_v61, %v6552_v57  ;;  %v4728_v20 = vrot.slane %v4712_v37, 9  ;;  %v3529_v61 = vrot.slane %v3527_v48, 5 }
 0x205   : > { %v3977_v33 = vrot.slane %v3975_v42, 4  ;;  %v3976_v37 = vsel %vm5371_vm7, %v4955_v3, %v3975_v42  ;;  %v3535_v48 = vshll.u32 %v4901_v49, 16 }
 0x206   : > { %v4227_v52 = vmax.f32 %v4195_v45, 0.0  ;;  %v3525_v53 = vrot.slane %v3524_v47, 4  ;;  %v3532_v47 = vshrl.u32 %v4901_v49, 16  ;;  %v4027_v46 = vunpack.c.l.b16 %v3976_v37  ;;  %v4713_v49 = vld [vmem:[%s5307_s19 + $0xa8] sm:$0xe] }
 0x207   : > { %v3071_v4 = vpop.f32.mrf.mxu2  ;;  %v3979_v28 = vsel %vm5371_vm7, %v3977_v33, %v3978_v22 }
 0x208   : > { %4259 = vst [vmem:[%s6483_s11 + $0x20] sm:$0xff] %v4227_v52  ;;  %v3144_v1 = vadd.f32 %v3071_v4, %v2854_v21  ;;  %v3725_v24 = vpop.f32.mrf.mxu3  ;;  %v2637_v21 = vsel %vm5371_vm7, %v2635_v60, %v2636_v26  ;;  %v3537_v60 = vrot.slane %v3535_v48, 5  ;;  %v4729_v48 = vrot.slane %v4713_v49, 9 }
 0x209   : > { %v2784_v0 = vpop.f32.mrf.mxu1 }
 0x20a   : > { %v3798_v55 = vadd.f32 %v3725_v24, %v3144_v1  ;;  %v4126_v41 = vpop.f32.mrf.mxu0  ;;  %v2855_v39 = vadd.f32 %v2784_v0, %v5976_v6  ;;  %v3530_v6 = vsel %vm5365_vm6, %v3525_v53, %v3529_v61  ;;  %v3541_v1 = vshll.u32 %v6571_v62, 16  ;;  %v6799_v53 = vld [vmem:[#allocation12_spill] sm:$0xff] }
 0x20b   : > { %v3545_v24 = vshrl.u32 %v6571_v62, 16  ;;  %v2686_v0 = vunpack.c.l.b16 %v2637_v21  ;;  %v3630_v42 = vunpack.c.l.b16 %v3530_v6 }
 0x20c   : > { %v4196_v45 = vadd.f32 %v4123_v8, %v3798_v55  ;;  %4744 = vmatmul.msk.bf16.gmra.mxu1 %vm307_vm1, %v2704_v56  ;;  %4857 = vmatmul.msk.bf16.gmra.mxu2 %vm307_vm1, %v5024_v44  ;;  %v2634_v8 = vsel %vm5371_vm7, %v4728_v20, %v2633_v34  ;;  %v4028_v55 = vunpack.c.l.b16 %v3979_v28  ;;  %v3534_v20 = vrot.slane %v3532_v47, 4 }
 0x20d   : > { %4922 = vmatmul.msk.bf16.gmra.mxu3 %vm307_vm1, %v3648_v50  ;;  %4971 = vmatmul.msk.bf16.gmra.mxu0 %vm307_vm1, %v4046_v58  ;;  %v2685_v44 = vunpack.c.l.b16 %v2634_v8  ;;  %v3629_v50 = vunpack.c.l.b16 %v3520_v25  ;;  %v6589_v9 = vrot.slane %v3541_v1, 5  ;;  %v3547_v26 = vrot.slane %v3545_v24, 4 }
 0x20e   : > { %v4228_v15 = vmax.f32 %v4196_v45, 0.0  ;;  %v4903_v45 = vld [vmem:[%s5307_s19 + $0xbc] sm:$0x1]  ;;  %v4047_v25 = vpack.c.b16 %v4028_v55, %v4027_v46  ;;  %v3982_v47 = vrot.slane %v6571_v62, 5 }
 0x20f   : > { %v3074_v52 = vpop.f32.mrf.mxu2  ;;  %v2705_v22 = vpack.c.b16 %v2686_v0, %v2685_v44  ;;  %v3551_v6 = vshll.u32 %v4903_v45, 16  ;;  %v4904_v0 = vld [vmem:[%s5307_s19 + $0xc0] sm:$0xf] }
 0x210   : > { %4260 = vst [vmem:[%s6483_s11 + $0x28] sm:$0xff] %v4228_v15  ;;  %v3145_v16 = vadd.f32 %v3074_v52, %v2855_v39  ;;  %v3728_v4 = vpop.f32.mrf.mxu3  ;;  %v5025_v15 = vld [vmem:[%s5307_s19 + $0xa8] sm:$0xff]  ;;  %v3649_v39 = vpack.c.b16 %v3630_v42, %v3629_v50  ;;  %v6605_v50 = vld [vmem:[%s5307_s19 + $0xc4] sm:$0xf] }
 0x211   : > { %v2786_v34 = vpop.f32.mrf.mxu1  ;;  %v5119_v52 = vld [vmem:[%s5307_s19 + $0xac] sm:$0xf]  ;;  %v3553_v62 = vrot.slane %v3551_v6, 5 }
 0x212   : > { %v3799_v57 = vadd.f32 %v3728_v4, %v3145_v16  ;;  %v4128_v56 = vpop.f32.mrf.mxu0  ;;  %v2856_v61 = vadd.f32 %v2786_v34, %v6799_v53  ;;  %v2640_v8 = vrot.slane %v5119_v52, 5  ;;  %v3538_v16 = vor.u32 %v3537_v60, %v3534_v20  ;;  %v4940_v34 = vld [vmem:[%s5307_s19 + $0xb4] sm:$0xe] }
 0x213   : > { %v3548_v4 = vor.u32 %v3547_v26, %v6589_v9  ;;  %v4956_v46 = vrot.slane %v4940_v34, 9  ;;  %v3984_v20 = vrot.slane %v3982_v47, 4  ;;  %v3985_v60 = vrot.slane %v4903_v45, 5 }
 0x214   : > { %v4197_v58 = vadd.f32 %v4126_v41, %v3799_v57  ;;  %v2642_v24 = vrot.slane %v2640_v8, 4  ;;  %v5120_v57 = vld [vmem:[%s5307_s19 + $0xb0] sm:$0x1]  ;;  %v3559_v53 = vshll.u32 %v4904_v0, 16 }
 0x215   : > { %v2643_v44 = vrot.slane %v5120_v57, 5  ;;  %v3549_v42 = vrot.slane %v3548_v4, 4 }
 0x216   : > { %v4229_v11 = vmax.f32 %v4197_v58, 0.0  ;;  %v3539_v58 = vrot.slane %v3538_v16, 4  ;;  %v3561_v16 = vrot.slane %v3559_v53, 5  ;;  %v3989_v53 = vrot.slane %v6605_v50, 5 }
 0x217   : > { %v3076_v3 = vpop.f32.mrf.mxu2  ;;  %v3554_v52 = vsel %vm5365_vm6, %v3549_v42, %v3553_v62 }
 0x218   : > { %4261 = vst [vmem:[%s6483_s11 + $0x30] sm:$0xff] %v4229_v11  ;;  %v3146_v33 = vadd.f32 %v3076_v3, %v2856_v61  ;;  %v3730_v41 = vpop.f32.mrf.mxu3  ;;  %v3556_v11 = vshrl.u32 %v4904_v0, 16  ;;  %v3565_v61 = vshll.u32 %v6605_v50, 16  ;;  %v3569_v3 = vshrl.u32 %v6605_v50, 16 }
 0x219   : > { %v2789_v21 = vpop.f32.mrf.mxu1  ;;  %v3544_v45 = vsel %vm5365_vm6, %v3539_v58, %v6589_v9  ;;  %v5121_v58 = vld [vmem:[%s5307_s19 + $0xb8] sm:$0xf] }
 0x21a   : > { %v3800_v37 = vadd.f32 %v3730_v41, %v3146_v33  ;;  %v4131_v28 = vpop.f32.mrf.mxu0  ;;  %v2857_v55 = vadd.f32 %v2789_v21, %v6016_v27  ;;  %v2644_v27 = vsel %vm5371_vm7, %v2642_v24, %v2643_v44  ;;  %v3983_v21 = vsel %vm5371_vm7, %v4956_v46, %v3982_v47  ;;  %v4714_v46 = vld [vmem:[%s5307_s19 + $0xb4] sm:$0xe] }
 0x21b   : > { %v6626_v4 = vrot.slane %v3565_v61, 5  ;;  %v3571_v6 = vrot.slane %v3569_v3, 4  ;;  %v2688_v34 = vunpack.c.l.b16 %v2644_v27  ;;  %v3632_v24 = vunpack.c.l.b16 %v3554_v52 }
 0x21c   : > { %v4198_v1 = vadd.f32 %v4128_v56, %v3800_v37  ;;  %4745 = vmatmul.msk.bf16.gmra.mxu1 %vm307_vm1, %v2705_v22  ;;  %4858 = vmatmul.msk.bf16.gmra.mxu2 %vm307_vm1, %v5025_v15  ;;  %v2641_v15 = vsel %vm5371_vm7, %v4729_v48, %v2640_v8  ;;  %v3558_v8 = vrot.slane %v3556_v11, 4  ;;  %v4906_v48 = vld [vmem:[%s5307_s19 + $0xc8] sm:$0x1]  ;;  %v4029_v57 = vunpack.c.l.b16 %v3983_v21  ;;  %v5026_v11 = vld [vmem:[%s5307_s19 + $0xb4] sm:$0xff] }
 0x21d   : > { %4923 = vmatmul.msk.bf16.gmra.mxu3 %vm307_vm1, %v3649_v39  ;;  %4972 = vmatmul.msk.bf16.gmra.mxu0 %vm307_vm1, %v4047_v25  ;;  %v3986_v25 = vsel %vm5371_vm7, %v3984_v20, %v3985_v60  ;;  %v2687_v9 = vunpack.c.l.b16 %v2641_v15  ;;  %v2647_v42 = vrot.slane %v5121_v58, 5  ;;  %v4730_v15 = vrot.slane %v4714_v46, 9 }
 0x21e   : > { %v4230_v56 = vmax.f32 %v4198_v1, 0.0  ;;  %v3631_v1 = vunpack.c.l.b16 %v3544_v45  ;;  %v4030_v47 = vunpack.c.l.b16 %v3986_v25  ;;  %v5122_v45 = vld [vmem:[%s5307_s19 + $0xbc] sm:$0x1] }
 0x21f   : > { %v3079_v26 = vpop.f32.mrf.mxu2  ;;  %v2649_v27 = vrot.slane %v2647_v42, 4 }
 0x220   : > { %4262 = vst [vmem:[%s6483_s11 + $0x38] sm:$0xff] %v4230_v56  ;;  %v3147_v33 = vadd.f32 %v3079_v26, %v2857_v55  ;;  %v3733_v41 = vpop.f32.mrf.mxu3  ;;  %v3562_v56 = vor.u32 %v3561_v16, %v3558_v8  ;;  %v3575_v55 = vshll.u32 %v4906_v48, 16  ;;  %v2706_v26 = vpack.c.b16 %v2688_v34, %v2687_v9  ;;  %v4907_v34 = vld [vmem:[%s5307_s19 + $0xcc] sm:$0xf] }
 0x221   : > { %v2791_v22 = vpop.f32.mrf.mxu1  ;;  %v3650_v3 = vpack.c.b16 %v3632_v24, %v3631_v1  ;;  %v3991_v16 = vrot.slane %v3989_v53, 4  ;;  %v6645_v1 = vld [vmem:[%s5307_s19 + $0xd0] sm:$0xf]  ;;  %v3583_v46 = vshll.u32 %v4907_v34, 16 }
 0x222   : > { %v3801_v39 = vadd.f32 %v3733_v41, %v3147_v33  ;;  %v4133_v49 = vpop.f32.mrf.mxu0  ;;  %v2858_v0 = vadd.f32 %v2791_v22, %v6018_v35  ;;  %v4048_v35 = vpack.c.b16 %v4030_v47, %v4029_v57  ;;  %v4941_v33 = vld [vmem:[%s5307_s19 + $0xc0] sm:$0xe]  ;;  %v3563_v52 = vrot.slane %v3562_v56, 4 }
 0x223   : > { %v3577_v25 = vrot.slane %v3575_v55, 5  ;;  %v4957_v50 = vrot.slane %v4941_v33, 9  ;;  %v3589_v56 = vshll.u32 %v6645_v1, 16  ;;  %v3585_v33 = vrot.slane %v3583_v46, 5 }
 0x224   : > { %v4199_v37 = vadd.f32 %v4131_v28, %v3801_v39  ;;  %v3572_v28 = vor.u32 %v3571_v6, %v6626_v4  ;;  %v2650_v39 = vrot.slane %v5122_v45, 5  ;;  %v3992_v6 = vrot.slane %v4906_v48, 5 }
 0x225   : > { %v3568_v48 = vsel %vm5365_vm6, %v3563_v52, %v6626_v4 }
 0x226   : > { %v4231_v44 = vmax.f32 %v4199_v37, 0.0  ;;  %v3573_v21 = vrot.slane %v3572_v28, 4  ;;  %v2651_v57 = vsel %vm5371_vm7, %v2649_v27, %v2650_v39  ;;  %v3993_v58 = vsel %vm5371_vm7, %v3991_v16, %v3992_v6  ;;  %v4909_v39 = vld [vmem:[%s5307_s19 + $0xd4] sm:$0x1]  ;;  %v5123_v16 = vld [vmem:[%s5307_s19 + $0xc4] sm:$0xf] }
 0x227   : > { %v3081_v62 = vpop.f32.mrf.mxu2  ;;  %v3593_v28 = vshrl.u32 %v6645_v1, 16  ;;  %v2654_v6 = vrot.slane %v5123_v16, 5 }
 0x228   : > { %4263 = vst [vmem:[%s6483_s11 + $0x40] sm:$0xff] %v4231_v44  ;;  %v3148_v20 = vadd.f32 %v3081_v62, %v2858_v0  ;;  %v3735_v60 = vpop.f32.mrf.mxu3  ;;  %v3990_v0 = vsel %vm5371_vm7, %v4957_v50, %v3989_v53  ;;  %v3580_v62 = vshrl.u32 %v4907_v34, 16  ;;  %v4715_v34 = vld [vmem:[%s5307_s19 + $0xc0] sm:$0xe] }
 0x229   : > { %v2794_v61 = vpop.f32.mrf.mxu1 }
 0x22a   : > { %v3802_v41 = vadd.f32 %v3735_v60, %v3148_v20  ;;  %v4136_v22 = vpop.f32.mrf.mxu0  ;;  %v2859_v9 = vadd.f32 %v2794_v61, %v6047_v13  ;;  %v3578_v13 = vsel %vm5365_vm6, %v3573_v21, %v3577_v25  ;;  %v2690_v60 = vunpack.c.l.b16 %v2651_v57 }
 0x22b   : > { %v3634_v53 = vunpack.c.l.b16 %v3578_v13  ;;  %v4031_v61 = vunpack.c.l.b16 %v3990_v0  ;;  %v3599_v57 = vshll.u32 %v4909_v39, 16  ;;  %v4731_v0 = vrot.slane %v4715_v34, 9 }
 0x22c   : > { %v4200_v8 = vadd.f32 %v4133_v49, %v3802_v41  ;;  %4746 = vmatmul.msk.bf16.gmra.mxu1 %vm307_vm1, %v2706_v26  ;;  %4859 = vmatmul.msk.bf16.gmra.mxu2 %vm307_vm1, %v5026_v11  ;;  %v2648_v49 = vsel %vm5371_vm7, %v4730_v15, %v2647_v42  ;;  %v3633_v26 = vunpack.c.l.b16 %v3568_v48  ;;  %v3591_v41 = vrot.slane %v3589_v56, 5 }
 0x22d   : > { %4924 = vmatmul.msk.bf16.gmra.mxu3 %vm307_vm1, %v3650_v3  ;;  %4973 = vmatmul.msk.bf16.gmra.mxu0 %vm307_vm1, %v4048_v35  ;;  %v2689_v20 = vunpack.c.l.b16 %v2648_v49  ;;  %v4032_v3 = vunpack.c.l.b16 %v3993_v58  ;;  %v3582_v35 = vrot.slane %v3580_v62, 4  ;;  %v3595_v15 = vrot.slane %v3593_v28, 4 }
 0x22e   : > { %v4232_v37 = vmax.f32 %v4200_v8, 0.0  ;;  %v5027_v8 = vld [vmem:[%s5307_s19 + $0xc0] sm:$0xff]  ;;  %v3651_v50 = vpack.c.b16 %v3634_v53, %v3633_v26  ;;  %v2656_v58 = vrot.slane %v2654_v6, 4  ;;  %v3601_v28 = vrot.slane %v3599_v57, 5 }
 0x22f   : > { %v3084_v24 = vpop.f32.mrf.mxu2  ;;  %v3596_v49 = vor.u32 %v3595_v15, %v3591_v41 }
 0x230   : > { %4264 = vst [vmem:[%s6483_s11 + $0x48] sm:$0xff] %v4232_v37  ;;  %v3149_v47 = vadd.f32 %v3084_v24, %v2859_v9  ;;  %v3738_v44 = vpop.f32.mrf.mxu3  ;;  %v4049_v9 = vpack.c.b16 %v4032_v3, %v4031_v61  ;;  %v3586_v24 = vor.u32 %v3585_v33, %v3582_v35  ;;  %v2655_v3 = vsel %vm5371_vm7, %v4731_v0, %v2654_v6 }
 0x231   : > { %v2796_v42 = vpop.f32.mrf.mxu1  ;;  %v3597_v56 = vrot.slane %v3596_v49, 4 }
 0x232   : > { %v3803_v4 = vadd.f32 %v3738_v44, %v3149_v47  ;;  %v4138_v55 = vpop.f32.mrf.mxu0  ;;  %v2860_v45 = vadd.f32 %v2796_v42, %v6072_v43  ;;  %v4942_v47 = vld [vmem:[%s5307_s19 + $0xcc] sm:$0xe]  ;;  %v3996_v44 = vrot.slane %v6645_v1, 5  ;;  %v5124_v42 = vld [vmem:[%s5307_s19 + $0xc8] sm:$0x1]  ;;  %v3587_v46 = vrot.slane %v3586_v24, 4 }
 0x233   : > { %v2657_v62 = vrot.slane %v5124_v42, 5  ;;  %v5028_v24 = vld [vmem:[%s5307_s19 + $0xcc] sm:$0xff] }
 0x234   : > { %v4201_v11 = vadd.f32 %v4136_v22, %v3803_v4  ;;  %v2707_v22 = vpack.c.b16 %v2690_v60, %v2689_v20  ;;  %v4958_v4 = vrot.slane %v4942_v47, 9  ;;  %v3999_v60 = vrot.slane %v4909_v39, 5 }
 0x235   : > { %v2658_v35 = vsel %vm5371_vm7, %v2656_v58, %v2657_v62  ;;  %v3592_v33 = vsel %vm5365_vm6, %v3587_v46, %v3591_v41 }
 0x236   : > { %v4233_v27 = vmax.f32 %v4201_v11, 0.0 }
 0x237   : > { %v3086_v52 = vpop.f32.mrf.mxu2 }
 0x238   : > { %4265 = vst [vmem:[%s6483_s11 + $0x50] sm:$0xff] %v4233_v27  ;;  %v3150_v21 = vadd.f32 %v3086_v52, %v2860_v45  ;;  %v3740_v25 = vpop.f32.mrf.mxu3  ;;  %v3997_v45 = vsel %vm5371_vm7, %v4958_v4, %v3996_v44 }
 0x239   : > { %v2799_v37 = vpop.f32.mrf.mxu1 }
 0x23a   : > { %v3804_v48 = vadd.f32 %v3740_v25, %v3150_v21  ;;  %v4141_v43 = vpop.f32.mrf.mxu0  ;;  %v2861_v1 = vadd.f32 %v2799_v37, %v6095_v32  ;;  %v3602_v32 = vsel %vm5365_vm6, %v3597_v56, %v3601_v28  ;;  %v2691_v21 = vunpack.c.l.b16 %v2655_v3 }
 0x23b   : > { %v2692_v25 = vunpack.c.l.b16 %v2658_v35 }
 0x23c   : > { %v4202_v13 = vadd.f32 %v4138_v55, %v3804_v48  ;;  %4747 = vmatmul.msk.bf16.gmra.mxu1 %vm307_vm1, %v2707_v22  ;;  %4860 = vmatmul.msk.bf16.gmra.mxu2 %vm307_vm1, %v5027_v8  ;;  %v3998_v55 = vrot.slane %v3996_v44, 4  ;;  %v3635_v22 = vunpack.c.l.b16 %v3592_v33  ;;  %v3636_v8 = vunpack.c.l.b16 %v3602_v32 }
 0x23d   : > { %4925 = vmatmul.msk.bf16.gmra.mxu3 %vm307_vm1, %v3651_v50  ;;  %4974 = vmatmul.msk.bf16.gmra.mxu0 %vm307_vm1, %v4049_v9  ;;  %v4033_v50 = vunpack.c.l.b16 %v3997_v45  ;;  %v2708_v34 = vpack.c.b16 %v2692_v25, %v2691_v21 }
 0x23e   : > { %v4234_v20 = vmax.f32 %v4202_v13, 0.0  ;;  %v4000_v39 = vsel %vm5371_vm7, %v3998_v55, %v3999_v60  ;;  %v3652_v49 = vpack.c.b16 %v3636_v8, %v3635_v22 }
 0x23f   : > { %v3089_v26 = vpop.f32.mrf.mxu2  ;;  %v4034_v41 = vunpack.c.l.b16 %v4000_v39 }
 0x240   : > { %4266 = vst [vmem:[%s6483_s11 + $0x58] sm:$0xff] %v4234_v20  ;;  %v3151_v11 = vadd.f32 %v3089_v26, %v2861_v1  ;;  %v3743_v53 = vpop.f32.mrf.mxu3 }
 0x241   : > { %v2801_v61 = vpop.f32.mrf.mxu1  ;;  %v4050_v57 = vpack.c.b16 %v4034_v41, %v4033_v50 }
 0x242   : > { %v3805_v15 = vadd.f32 %v3743_v53, %v3151_v11  ;;  %v4143_v27 = vpop.f32.mrf.mxu0  ;;  %v2862_v6 = vadd.f32 %v2801_v61, %v6103_v18 }
 0x244   : > { %v4203_v52 = vadd.f32 %v4141_v43, %v3805_v15 }
 0x246   : > { %v4235_v16 = vmax.f32 %v4203_v52, 0.0 }
 0x247   : > { %v3091_v37 = vpop.f32.mrf.mxu2 }
 0x248   : > { %4267 = vst [vmem:[%s6483_s11 + $0x60] sm:$0xff] %v4235_v16  ;;  %v3152_v5 = vadd.f32 %v3091_v37, %v2862_v6  ;;  %v3745_v9 = vpop.f32.mrf.mxu3 }
 0x249   : > { %v2804_v10 = vpop.f32.mrf.mxu1 }
 0x24a   : > { %v3806_v48 = vadd.f32 %v3745_v9, %v3152_v5  ;;  %v4146_v43 = vpop.f32.mrf.mxu0  ;;  %v2863_v44 = vadd.f32 %v2804_v10, %v6122_v30 }
 0x24c   : > { %v4204_v47 = vadd.f32 %v4143_v27, %v3806_v48  ;;  %4748 = vmatmul.msk.bf16.gmra.mxu1 %vm307_vm1, %v2708_v34  ;;  %4861 = vmatmul.msk.bf16.gmra.mxu2 %vm307_vm1, %v5028_v24 }
 0x24d   : > { %4926 = vmatmul.msk.bf16.gmra.mxu3 %vm307_vm1, %v3652_v49  ;;  %4975 = vmatmul.msk.bf16.gmra.mxu0 %vm307_vm1, %v4050_v57 }
 0x24e   : > { %v4236_v18 = vmax.f32 %v4204_v47, 0.0 }
 0x24f   : > { %v3094_v13 = vpop.f32.mrf.mxu2 }
 0x250   : > { %4268 = vst [vmem:[%s6483_s11 + $0x68] sm:$0xff] %v4236_v18  ;;  %v3153_v0 = vadd.f32 %v3094_v13, %v2863_v44  ;;  %v3748_v58 = vpop.f32.mrf.mxu3 }
 0x251   : > { %v2806_v42 = vpop.f32.mrf.mxu1 }
 0x252   : > { %v3807_v62 = vadd.f32 %v3748_v58, %v3153_v0  ;;  %v4148_v46 = vpop.f32.mrf.mxu0  ;;  %v2864_v4 = vadd.f32 %v2806_v42, %v6142_v40 }
 0x254   : > { %v4205_v56 = vadd.f32 %v4146_v43, %v3807_v62 }
 0x256   : > { %v4237_v28 = vmax.f32 %v4205_v56, 0.0 }
 0x257   : > { %v3096_v20 = vpop.f32.mrf.mxu2 }
 0x258   : > { %4269 = vst [vmem:[%s6483_s11 + $0x70] sm:$0xff] %v4237_v28  ;;  %v3154_v1 = vadd.f32 %v3096_v20, %v2864_v4  ;;  %v3750_v55 = vpop.f32.mrf.mxu3 }
 0x259   : > { %v2809_v60 = vpop.f32.mrf.mxu1 }
 0x25a   : > { %v3808_v26 = vadd.f32 %v3750_v55, %v3154_v1  ;;  %v4151_v30 = vpop.f32.mrf.mxu0  ;;  %v2865_v61 = vadd.f32 %v2809_v60, %v6165_v31 }
 0x25c   : > { %v4206_v11 = vadd.f32 %v4148_v46, %v3808_v26 }
 0x25e   : > { %v4238_v53 = vmax.f32 %v4206_v11, 0.0 }
 0x25f   : > { %v3099_v3 = vpop.f32.mrf.mxu2 }
 0x260   : > { %4270 = vst [vmem:[%s6483_s11 + $0x78] sm:$0xff] %v4238_v53  ;;  %v3155_v35 = vadd.f32 %v3099_v3, %v2865_v61  ;;  %v3753_v33 = vpop.f32.mrf.mxu3 }
 0x261   : > { %v2811_v15 = vpop.f32.mrf.mxu1 }
 0x262   : > { %v3809_v27 = vadd.f32 %v3753_v33, %v3155_v35  ;;  %v4153_v40 = vpop.f32.mrf.mxu0  ;;  %v2866_v39 = vadd.f32 %v2811_v15, %v6177_v29 }
 0x264   : > { %v4207_v32 = vadd.f32 %v4151_v30, %v3809_v27 }
 0x266   : > { %v4239_v45 = vmax.f32 %v4207_v32, 0.0 }
 0x267   : > { %v3101_v52 = vpop.f32.mrf.mxu2 }
 0x268   : > { %4271 = vst [vmem:[%s6483_s11 + $0x80] sm:$0xff] %v4239_v45  ;;  %v3156_v21 = vadd.f32 %v3101_v52, %v2866_v39  ;;  %v3755_v25 = vpop.f32.mrf.mxu3 }
 0x269   : > { %v2814_v22 = vpop.f32.mrf.mxu1 }
 0x26a   : > { %v3810_v8 = vadd.f32 %v3755_v25, %v3156_v21  ;;  %v4156_v31 = vpop.f32.mrf.mxu0  ;;  %v2867_v16 = vadd.f32 %v2814_v22, %v6201_v2 }
 0x26c   : > { %v4208_v50 = vadd.f32 %v4153_v40, %v3810_v8 }
 0x26e   : > { %v4240_v41 = vmax.f32 %v4208_v50, 0.0 }
 0x26f   : > { %v3104_v6 = vpop.f32.mrf.mxu2 }
 0x270   : > { %4272 = vst [vmem:[%s6483_s11 + $0x88] sm:$0xff] %v4240_v41  ;;  %v3157_v37 = vadd.f32 %v3104_v6, %v2867_v16  ;;  %v3758_v5 = vpop.f32.mrf.mxu3 }
 0x271   : > { %v2816_v9 = vpop.f32.mrf.mxu1 }
 0x272   : > { %v3811_v34 = vadd.f32 %v3758_v5, %v3157_v37  ;;  %v4158_v29 = vpop.f32.mrf.mxu0  ;;  %v2868_v49 = vadd.f32 %v2816_v9, %v6220_v19 }
 0x274   : > { %v4209_v24 = vadd.f32 %v4156_v31, %v3811_v34 }
 0x276   : > { %v4241_v10 = vmax.f32 %v4209_v24, 0.0 }
 0x277   : > { %v3106_v57 = vpop.f32.mrf.mxu2 }
 0x278   : > { %4273 = vst [vmem:[%s6483_s11 + $0x90] sm:$0xff] %v4241_v10  ;;  %v3158_v48 = vadd.f32 %v3106_v57, %v2868_v49  ;;  %v3760_v43 = vpop.f32.mrf.mxu3 }
 0x279   : > { %v2819_v47 = vpop.f32.mrf.mxu1 }
 0x27a   : > { %v3812_v18 = vadd.f32 %v3760_v43, %v3158_v48  ;;  %v4161_v2 = vpop.f32.mrf.mxu0  ;;  %v2869_v0 = vadd.f32 %v2819_v47, %v6243_v14 }
 0x27c   : > { %v4210_v44 = vadd.f32 %v4158_v29, %v3812_v18 }
 0x27e   : > { %v4242_v13 = vmax.f32 %v4210_v44, 0.0 }
 0x27f   : > { %v3109_v58 = vpop.f32.mrf.mxu2 }
 0x280   : > { %4274 = vst [vmem:[%s6483_s11 + $0x98] sm:$0xff] %v4242_v13  ;;  %v3159_v42 = vadd.f32 %v3109_v58, %v2869_v0  ;;  %v3763_v62 = vpop.f32.mrf.mxu3 }
 0x281   : > { %v2821_v46 = vpop.f32.mrf.mxu1 }
 0x282   : > { %v3813_v56 = vadd.f32 %v3763_v62, %v3159_v42  ;;  %v4163_v19 = vpop.f32.mrf.mxu0  ;;  %v2870_v20 = vadd.f32 %v2821_v46, %v6255_v12 }
 0x284   : > { %v4211_v28 = vadd.f32 %v4161_v2, %v3813_v56 }
 0x286   : > { %v4243_v4 = vmax.f32 %v4211_v28, 0.0 }
 0x287   : > { %v3111_v1 = vpop.f32.mrf.mxu2 }
 0x288   : > { %4275 = vst [vmem:[%s6483_s11 + $0xa0] sm:$0xff] %v4243_v4  ;;  %v3160_v55 = vadd.f32 %v3111_v1, %v2870_v20  ;;  %v3765_v60 = vpop.f32.mrf.mxu3 }
 0x289   : > { %v2824_v26 = vpop.f32.mrf.mxu1 }
 0x28a   : > { %v3814_v30 = vadd.f32 %v3765_v60, %v3160_v55  ;;  %v4166_v14 = vpop.f32.mrf.mxu0  ;;  %v2871_v61 = vadd.f32 %v2824_v26, %v6279_v17 }
 0x28c   : > { %v4212_v11 = vadd.f32 %v4163_v19, %v3814_v30 }
 0x28e   : > { %v4244_v53 = vmax.f32 %v4212_v11, 0.0 }
 0x28f   : > { %v3114_v3 = vpop.f32.mrf.mxu2 }
 0x290   : > { %4276 = vst [vmem:[%s6483_s11 + $0xa8] sm:$0xff] %v4244_v53  ;;  %v3161_v35 = vadd.f32 %v3114_v3, %v2871_v61  ;;  %v3768_v33 = vpop.f32.mrf.mxu3 }
 0x291   : > { %v2826_v15 = vpop.f32.mrf.mxu1 }
 0x292   : > { %v3815_v27 = vadd.f32 %v3768_v33, %v3161_v35  ;;  %v4168_v12 = vpop.f32.mrf.mxu0  ;;  %v2872_v45 = vadd.f32 %v2826_v15, %v6298_v36 }
 0x294   : > { %v4213_v40 = vadd.f32 %v4166_v14, %v3815_v27 }
 0x296   : > { %v4245_v32 = vmax.f32 %v4213_v40, 0.0 }
 0x297   : > { %v3116_v39 = vpop.f32.mrf.mxu2 }
 0x298   : > { %4277 = vst [vmem:[%s6483_s11 + $0xb0] sm:$0xff] %v4245_v32  ;;  %v3162_v52 = vadd.f32 %v3116_v39, %v2872_v45  ;;  %v3770_v21 = vpop.f32.mrf.mxu3 }
 0x299   : > { %v2829_v25 = vpop.f32.mrf.mxu1 }
 0x29a   : > { %v3816_v22 = vadd.f32 %v3770_v21, %v3162_v52  ;;  %v4171_v17 = vpop.f32.mrf.mxu0  ;;  %v2873_v50 = vadd.f32 %v2829_v25, %v6321_v59 }
 0x29c   : > { %v4214_v8 = vadd.f32 %v4168_v12, %v3816_v22 }
 0x29e   : > { %v4246_v31 = vmax.f32 %v4214_v8, 0.0 }
 0x29f   : > { %v3119_v41 = vpop.f32.mrf.mxu2 }
 0x2a0   : > { %4278 = vst [vmem:[%s6483_s11 + $0xb8] sm:$0xff] %v4246_v31  ;;  %v3163_v16 = vadd.f32 %v3119_v41, %v2873_v50  ;;  %v3773_v6 = vpop.f32.mrf.mxu3  ;;  %v6800_v31 = vld [vmem:[#allocation5_spill] sm:$0xff] }
 0x2a1   : > { %v2831_v37 = vpop.f32.mrf.mxu1 }
 0x2a2   : > { %v3817_v5 = vadd.f32 %v3773_v6, %v3163_v16  ;;  %v4173_v36 = vpop.f32.mrf.mxu0  ;;  %v2874_v29 = vadd.f32 %v2831_v37, %v6333_v63 }
 0x2a4   : > { %v4215_v9 = vadd.f32 %v4171_v17, %v3817_v5 }
 0x2a6   : > { %v4247_v34 = vmax.f32 %v4215_v9, 0.0 }
 0x2a7   : > { %v3121_v24 = vpop.f32.mrf.mxu2 }
 0x2a8   : > { %4279 = vst [vmem:[%s6483_s11 + $0xc0] sm:$0xff] %v4247_v34  ;;  %v3164_v10 = vadd.f32 %v3121_v24, %v2874_v29  ;;  %v3775_v49 = vpop.f32.mrf.mxu3 }
 0x2a9   : > { %v2834_v57 = vpop.f32.mrf.mxu1 }
 0x2aa   : > { %v3818_v48 = vadd.f32 %v3775_v49, %v3164_v10  ;;  %v4176_v59 = vpop.f32.mrf.mxu0  ;;  %v2875_v18 = vadd.f32 %v2834_v57, %v6357_v38 }
 0x2ac   : > { %v4216_v43 = vadd.f32 %v4173_v36, %v3818_v48 }
 0x2ae   : > { %v4248_v47 = vmax.f32 %v4216_v43, 0.0 }
 0x2af   : > { %v3124_v2 = vpop.f32.mrf.mxu2 }
 0x2b0   : > { %4280 = vst [vmem:[%s6483_s11 + $0xc8] sm:$0xff] %v4248_v47  ;;  %v3165_v44 = vadd.f32 %v3124_v2, %v2875_v18  ;;  %v3778_v13 = vpop.f32.mrf.mxu3 }
 0x2b1   : > { %v2836_v0 = vpop.f32.mrf.mxu1 }
 0x2b2   : > { %v3819_v58 = vadd.f32 %v3778_v13, %v3165_v44  ;;  %v4178_v63 = vpop.f32.mrf.mxu0  ;;  %v2876_v46 = vadd.f32 %v2836_v0, %v6376_v54 }
 0x2b4   : > { %v4217_v42 = vadd.f32 %v4176_v59, %v3819_v58 }
 0x2b6   : > { %v4249_v62 = vmax.f32 %v4217_v42, 0.0 }
 0x2b7   : > { %v3126_v56 = vpop.f32.mrf.mxu2 }
 0x2b8   : > { %4281 = vst [vmem:[%s6483_s11 + $0xd0] sm:$0xff] %v4249_v62  ;;  %v3166_v19 = vadd.f32 %v3126_v56, %v2876_v46  ;;  %v3780_v28 = vpop.f32.mrf.mxu3 }
 0x2b9   : > { %v2839_v4 = vpop.f32.mrf.mxu1 }
 0x2ba   : > { %v3820_v20 = vadd.f32 %v3780_v28, %v3166_v19  ;;  %v4181_v1 = vpop.f32.mrf.mxu0  ;;  %v2877_v60 = vadd.f32 %v2839_v4, %v6399_v23 }
 0x2bc   : > { %v4218_v38 = vadd.f32 %v4178_v63, %v3820_v20 }
 0x2be   : > { %v4250_v55 = vmax.f32 %v4218_v38, 0.0 }
 0x2bf   : > { %v3129_v26 = vpop.f32.mrf.mxu2 }
 0x2c0   : > { %4282 = vst [vmem:[%s6483_s11 + $0xd8] sm:$0xff] %v4250_v55  ;;  %v3167_v30 = vadd.f32 %v3129_v26, %v2877_v60  ;;  %v3783_v14 = vpop.f32.mrf.mxu3 }
 0x2c1   : > { %v2841_v11 = vpop.f32.mrf.mxu1 }
 0x2c2   : > { %v3821_v53 = vadd.f32 %v3783_v14, %v3167_v30  ;;  %v2878_v3 = vadd.f32 %v2841_v11, %v6411_v51  ;;  %v4183_v35 = vpop.f32.mrf.mxu0 }
 0x2c4   : > { %v4219_v54 = vadd.f32 %v4181_v1, %v3821_v53 }
 0x2c6   : > { %v4251_v61 = vmax.f32 %v4219_v54, 0.0 }
 0x2c7   : > { %v3131_v33 = vpop.f32.mrf.mxu2 }
 0x2c8   : > { %4283 = vst [vmem:[%s6483_s11 + $0xe0] sm:$0xff] %v4251_v61  ;;  %v3168_v15 = vadd.f32 %v3131_v33, %v2878_v3  ;;  %v3785_v27 = vpop.f32.mrf.mxu3 }
 0x2c9   : > { %v2844_v12 = vpop.f32.mrf.mxu1 }
 0x2ca   : > { %v3822_v40 = vadd.f32 %v3785_v27, %v3168_v15  ;;  %v2879_v45 = vadd.f32 %v2844_v12, %v6435_v7  ;;  %v4186_v25 = vpop.f32.mrf.mxu0 }
 0x2cc   : > { %v4220_v23 = vadd.f32 %v4183_v35, %v3822_v40 }
 0x2ce   : > { %v4252_v32 = vmax.f32 %v4220_v23, 0.0 }
 0x2cf   : > { %v3134_v39 = vpop.f32.mrf.mxu2 }
 0x2d0   : > { %4284 = vst [vmem:[%s6483_s11 + $0xe8] sm:$0xff] %v4252_v32  ;;  %v3169_v52 = vadd.f32 %v3134_v39, %v2879_v45  ;;  %v3788_v21 = vpop.f32.mrf.mxu3 }
 0x2d1   : > { %v2846_v22 = vpop.f32.mrf.mxu1 }
 0x2d2   : > { %v3823_v51 = vadd.f32 %v3788_v21, %v3169_v52  ;;  %v2880_v50 = vadd.f32 %v2846_v22, %v6800_v31  ;;  %v4188_v37 = vpop.f32.mrf.mxu0 }
 0x2d4   : > { %v4221_v17 = vadd.f32 %v4186_v25, %v3823_v51 }
 0x2d6   : > { %v4253_v8 = vmax.f32 %v4221_v17, 0.0 }
 0x2d7   : > { %v3136_v41 = vpop.f32.mrf.mxu2 }
 0x2d8   : > { %4285 = vst [vmem:[%s6483_s11 + $0xf0] sm:$0xff] %v4253_v8  ;;  %v3170_v7 = vadd.f32 %v3136_v41, %v2880_v50  ;;  %v3790_v16 = vpop.f32.mrf.mxu3 }
 0x2da   : > { %v3824_v6 = vadd.f32 %v3790_v16, %v3170_v7 }
 0x2dc   : > { %v4222_v5 = vadd.f32 %v4188_v37, %v3824_v6 }
 0x2de   : > { %v4254_v36 = vmax.f32 %v4222_v5, 0.0 }
 0x2e0   : > { %4286 = vst [vmem:[%s6483_s11 + $0xf8] sm:$0xff] %v4254_v36 }
 0x2e1   : > { %5152 = shalt.err (!%p5149_p5)
}
 0x2e2   : > { %s5205_s8 = smov 128   ;;  %s5206_s9 = smov 8  }
 0x2e3   : > { %5034 = dma.vmem_to_hbm [thread:$0]  (%p5267_p4), %s4302_s26, 4096, %s4304_s27, %s4288_s15, %s5205_s8, %s5205_s8, %s5206_s9  }
 0x2e4 PF: > { %p5040_p6 = scmp.ge.s32.totalorder %s5203_s17, 2  ;;  %s4318_s10 = sand.u32 1, %s5183_s12  }
 0x2e5   : > { %s4319_s11 = scalar_lea.sflag [#allocation3], %s4318_s10 }
 0x2e6   : > { %p5037_p7 = pnand %p5040_p6, %p5274_p8 }
 0x2e8   : > { %p5038_p9 = pneg %p5037_p7 }
 0x2ea   : > { %5178 = dma.done.wait (%p5038_p9), %s4319_s11, 4096  }
 0x2eb   : > { %5180 = vsyncadd (%p5038_p9), %s4319_s11, 4294963200  ;;  %s16_s17 = sadd.s32 1, %s5203_s17   ;;  %s6801_s12 = smov %s5187_s13 }
 0x2ec   : > { %p13_p10 = scmp.ge.s32.totalorder %s16_s17, 4   ;;  %s6802_s13 = smov %s5191_s14 }
 0x2ed   : > { %s6803_s14 = smov %s5280_s25  ;;  %s6804_s15 = smov %s5199_s16 }
 0x2ee   : > { %s6805_s16 = smov %s6807_s20  ;;  %15 = sbr.rel (!%p13_p10) target bundleno = 4 (0x4), region = 78 }
 0x2f3   :  { %4325 = vsyncpa [#allocation3], 1 }
 0x2f4   :  { %4327 = vsyncpa [#allocation3 + $0x1], 1 }

</bundles_post_ra>
